<compile_context>
chip_gen: v5e
topology: v5e:2x2
jax: 0.10.0
libtpu: 0.0.40
codegen_flags: <defaults>
</compile_context>

<pallas_src>
import jax
import jax.numpy as jnp
from jax.experimental import pallas as pl
from jax.experimental.pallas import tpu as pltpu


SQRT5 = 2.23606797749979


# ----------------------------------------------------------------------------
# Fused kernel: 2-layer GRU encoder + SVGP predictive mean + de-normalization.
# ----------------------------------------------------------------------------
def fused_residual_kernel(x_ref,      # (T*Bp, D_in) f32  time-major packed input
                          wih0_ref,   # (D_in, 3*Hp) f32  layer-0 input proj, gates [r|z|n]
                          bi0_ref,    # (1, 3*Hp)   f32   = [b_ir+b_hr | b_iz+b_hz | b_in]
                          bhn0_ref,   # (1, Hp)     f32   = b_hn0 (stays inside r* term)
                          wm0_ref,    # (Hp, 6*Hp)  bf16  = [whh0 | wih1] merged
                          whh1_ref,   # (Hp, 3*Hp)  bf16
                          bi1_ref,    # (1, 3*Hp)   f32
                          bhn1_ref,   # (1, Hp)     f32
                          zt_ref,     # (Hp, M)     f32   inducing points, pre-transposed
                          zisq_ref,   # (1, M)      f32   sum(Z**2, axis=-1)
                          alpha_ref,  # (1, M)      f32   (outputscale*y_std) * L_zz^{-T} m
                          scal_ref,   # SMEM (3,)   [1/ls_matern, 0.5/ls_rbf^2, out_bias]
                          out_ref):   # (Bp, 128)   f32   lane-dense output slab
    TB, _ = x_ref.shape
    Hp = bhn0_ref.shape[1]
    G = 3 * Hp
    Bp = out_ref.shape[0]
    T = TB // Bp

    # Hoisted layer-0 input-to-hidden projection: one dot for all timesteps,
    # off the recurrent critical path (kept f32; multi-pass here is hidden).
    gi0_all = (jnp.dot(x_ref[...], wih0_ref[...],
                       preferred_element_type=jnp.float32) + bi0_ref[...])  # (T*Bp, 3Hp)

    wm0 = wm0_ref[...]      # bf16 (Hp, 6Hp)
    whh1 = whh1_ref[...]    # bf16 (Hp, 3Hp)
    bi1 = bi1_ref[...]
    bhn0 = bhn0_ref[...]
    bhn1 = bhn1_ref[...]

    def cell(gi, gh, h_prev, bhn):
        # PyTorch gate order r, z, n.  All slices are at 128-lane boundaries.
        rz = jax.nn.sigmoid(gi[:, :2 * Hp] + gh[:, :2 * Hp])   # one combined slab
        r = rz[:, :Hp]
        z = rz[:, Hp:]
        n = jnp.tanh(gi[:, 2 * Hp:] + r * (gh[:, 2 * Hp:] + bhn))
        return (1.0 - z) * n + z * h_prev
        # Padded lanes (>= H): gi=gh=bhn=0 -> z=0.5, n=0, h stays exactly 0.

    h0 = jnp.zeros((Bp, Hp), jnp.float32)
    h1 = jnp.zeros((Bp, Hp), jnp.float32)
    gh0 = jnp.zeros((Bp, G), jnp.float32)   # h0_init @ whh0 == 0
    gh1 = jnp.zeros((Bp, G), jnp.float32)   # h1_init @ whh1 == 0

    # T is a small static trip count -> fully unrolled; every slice is static
    # and the scheduler sees the whole DAG (MXU/EUP/VPU interleave across steps).
    for t in range(T):
        h0 = cell(gi0_all[t * Bp:(t + 1) * Bp, :], gh0, h0, bhn0)
        # Single merged dot on h0: [gh0 for step t+1 | gi1 for step t].
        merged = jnp.dot(h0.astype(jnp.bfloat16), wm0,
                         preferred_element_type=jnp.float32)        # (Bp, 6Hp)
        gh0 = merged[:, :G]
        gi1 = merged[:, G:] + bi1
        h1 = cell(gi1, gh1, h1, bhn1)
        if t + 1 < T:
            gh1 = jnp.dot(h1.astype(jnp.bfloat16), whh1,
                          preferred_element_type=jnp.float32)       # (Bp, 3Hp)

    # ---- SVGP predictive mean + likelihood mean + de-normalization (fused) ----
    inv_ls_m = scal_ref[0]
    inv_2ls_r2 = scal_ref[1]
    out_bias = scal_ref[2]

    # Padded lanes of h1 are zero, so the f32 cross dot / norms are exact.
    cross = jnp.dot(h1, zt_ref[...], preferred_element_type=jnp.float32)  # (Bp, M)
    hsq = jnp.sum(h1 * h1, axis=1, keepdims=True)                         # (Bp, 1)
    d2 = jnp.maximum(hsq + zisq_ref[...] - 2.0 * cross, 0.0)

    # Matern 2.5 (scalar lengthscale: distance divided by lengthscale)
    d = jnp.sqrt(d2) * inv_ls_m
    k_mat = (1.0 + SQRT5 * d + (5.0 / 3.0) * (d * d)) * jnp.exp(-SQRT5 * d)
    # RBF
    k_rbf = jnp.exp(-d2 * inv_2ls_r2)
    k_sum = k_mat + k_rbf                                                  # (Bp, M)

    # Tail: VPU multiply + lane reduce instead of an (Bp,M)x(M,1) MXU round trip.
    # outputscale*y_std folded into alpha; const_mean*y_std + y_mean into out_bias.
    pred = jnp.sum(k_sum * alpha_ref[...], axis=-1, keepdims=True) + out_bias  # (Bp, 1)
    out_ref[...] = jnp.broadcast_to(pred, out_ref.shape)


# ----------------------------------------------------------------------------
# Wrapper (jit'ed: pad/transpose/pack fuse into one tiny op, slice fuses too)
# ----------------------------------------------------------------------------
@jax.jit
def residual_model_forward(x, params):
    # x: (B, T, D_in) batch-first like PyTorch.
    B, T, D_in = x.shape
    Bp = max(8, ((B + 7) // 8) * 8)
    # Pack once: pad batch to a sublane multiple, go time-major, flatten to 2-D
    # so the kernel consumes (T*Bp, D_in) directly (no in-kernel reshape).
    x_tm = jnp.zeros((T, Bp, D_in), jnp.float32).at[:, :B, :].set(
        jnp.transpose(x.astype(jnp.float32), (1, 0, 2)))
    x2d = x_tm.reshape(T * Bp, D_in)

    vmem = pl.BlockSpec(memory_space=pltpu.MemorySpace.VMEM)
    smem = pl.BlockSpec(memory_space=pltpu.MemorySpace.SMEM)

    # Single fused ungridded launch; all operands are VMEM-resident (<1 MiB).
    # If batch grows (Bp >= 16), add a grid over Bp/8 with
    # dimension_semantics=("parallel",) so v7x's second TensorCore takes half.
    out = pl.pallas_call(
        fused_residual_kernel,
        out_shape=jax.ShapeDtypeStruct((Bp, 128), jnp.float32),
        in_specs=[vmem] * 11 + [smem],
        out_specs=vmem,
    )(x2d,
      params["wih0"], params["bi0"], params["bhn0"],
      params["Wm0"], params["whh1"], params["bi1"], params["bhn1"],
      params["Zt"], params["Zsq"], params["alpha"], params["scalars"])

    return out[:B, :1]                                    # (B, 1)


# ----------------------------------------------------------------------------
# Parameter construction (synthetic, deterministic) + host-side GP prep.
# ----------------------------------------------------------------------------
def _scaled_kernel_host(x1, x2, ls_m, ls_r, oscale):
    d2 = jnp.maximum(
        jnp.sum(x1 * x1, axis=1, keepdims=True)
        + jnp.sum(x2 * x2, axis=1)[None, :]
        - 2.0 * x1 @ x2.T,
        0.0,
    )
    d = jnp.sqrt(d2) / ls_m
    k_mat = (1.0 + SQRT5 * d + (5.0 / 3.0) * d * d) * jnp.exp(-SQRT5 * d)
    k_rbf = jnp.exp(-0.5 * d2 / (ls_r * ls_r))
    return oscale * (k_mat + k_rbf)


def build_params(key, d_in=6, d_model=32, n_inducing=16, hp=128):
    H, M, Hp = d_model, n_inducing, hp
    keys = jax.random.split(key, 4)
    s = 0.2

    def rnd(k, shape):
        return (s * jax.random.normal(k, shape)).astype(jnp.float32)

    def pad_cols(w_gates, rows):
        # w_gates: (3, rows, H) -> (rows, 3*Hp) with each gate in its own
        # 128-lane block (zeros beyond H) so in-kernel slices are vreg-aligned.
        out = jnp.zeros((rows, 3 * Hp), jnp.float32)
        for g in range(3):
            out = out.at[:, g * Hp:g * Hp + H].set(w_gates[g])
        return out

    def pad_rec(w_gates):
        # (3, H, H) -> (Hp, 3*Hp): rows >= H zero (hidden carried 128 lanes wide).
        out = jnp.zeros((Hp, 3 * Hp), jnp.float32)
        for g in range(3):
            out = out.at[:H, g * Hp:g * Hp + H].set(w_gates[g])
        return out

    def pad_b3(b_list):
        out = jnp.zeros((1, 3 * Hp), jnp.float32)
        for g, b in enumerate(b_list):
            out = out.at[:, g * Hp:g * Hp + H].set(b)
        return out

    def make_layer(kw, in_dim):
        k = jax.random.split(kw, 4)
        wih = rnd(k[0], (3, in_dim, H))     # gates r, z, n (PyTorch order)
        whh = rnd(k[1], (3, H, H))
        bih = rnd(k[2], (3, 1, H))
        bhh = rnd(k[3], (3, 1, H))
        # Fold b_ih + b_hh for r/z gates; b_hn must stay separate (inside r*).
        bi = pad_b3([bih[0] + bhh[0], bih[1] + bhh[1], bih[2]])            # (1, 3Hp)
        bhn = jnp.zeros((1, Hp), jnp.float32).at[:, :H].set(bhh[2])        # (1, Hp)
        return wih, whh, bi, bhn

    wih0, whh0, bi0, bhn0 = make_layer(keys[0], d_in)
    wih1, whh1, bi1, bhn1 = make_layer(keys[1], H)

    # SVGP parameters (deterministic synthetic init)
    Z = jax.random.normal(keys[2], (M, H)).astype(jnp.float32)          # inducing points
    m_var = (0.5 * jax.random.normal(keys[3], (M,))).astype(jnp.float32)
    const_mean = jnp.float32(0.1)
    ls_matern = jnp.float32(1.5)
    ls_rbf = jnp.float32(2.0)
    outputscale = jnp.float32(0.8)
    y_mean = jnp.float32(0.3)
    y_std = jnp.float32(2.0)

    # Whitened variational term: alpha = L_zz^{-T} m  (input-independent prep)
    Kzz = _scaled_kernel_host(Z, Z, ls_matern, ls_rbf, outputscale)
    Kzz = Kzz + 1e-6 * jnp.eye(M, dtype=jnp.float32)
    L = jnp.linalg.cholesky(Kzz)
    alpha = jax.scipy.linalg.solve_triangular(L.T, m_var, lower=False)

    params = {}
    # Layer-0 input projection stays f32 (hoisted, off the recurrence chain).
    params["wih0"] = pad_cols(wih0, d_in)                               # (d_in, 3Hp) f32
    params["bi0"] = bi0
    params["bhn0"] = bhn0
    # Merged recurrence weight [whh0 | wih1] and whh1 -> bf16 (single-pass MXU,
    # f32 accumulation in-kernel).
    params["Wm0"] = jnp.concatenate([pad_rec(whh0), pad_rec(wih1)],
                                    axis=1).astype(jnp.bfloat16)        # (Hp, 6Hp)
    params["whh1"] = pad_rec(whh1).astype(jnp.bfloat16)                 # (Hp, 3Hp)
    params["bi1"] = bi1
    params["bhn1"] = bhn1
    # GP head: inducing points pre-transposed and row-padded to Hp; ||Z||^2 row;
    # alpha as a (1, M) row for the VPU multiply + lane-reduce tail.
    params["Zt"] = jnp.zeros((Hp, M), jnp.float32).at[:H, :].set(Z.T)   # (Hp, M)
    params["Zsq"] = jnp.sum(Z * Z, axis=1).reshape(1, M).astype(jnp.float32)
    params["alpha"] = (outputscale * y_std * alpha).reshape(1, M).astype(jnp.float32)
    params["scalars"] = jnp.array(
        [1.0 / ls_matern, 0.5 / (ls_rbf * ls_rbf), const_mean * y_std + y_mean],
        dtype=jnp.float32,
    )
    return params


if __name__ == "__main__":
    B, T, D_IN, D_MODEL, M = 2, 8, 6, 32, 16

    key = jax.random.PRNGKey(0)
    k_x, k_p = jax.random.split(key)
    x = jax.random.normal(k_x, (B, T, D_IN), dtype=jnp.float32)
    params = build_params(k_p, d_in=D_IN, d_model=D_MODEL, n_inducing=M)

    out = residual_model_forward(x, params)
    out = jax.block_until_ready(out)
    assert out.shape == (B, 1) and out.dtype == jnp.float32
    assert bool(jnp.all(jnp.isfinite(out)))
    print("KERNEL_OK")
</pallas_src>

<mosaic_0001>
module attributes {stable_mosaic.version = 11 : i64} {
  func.func @fused_residual_kernel(%arg0: memref<64x6xf32, #tpu.memory_space<vmem>>, %arg1: memref<6x384xf32, #tpu.memory_space<vmem>>, %arg2: memref<1x384xf32, #tpu.memory_space<vmem>>, %arg3: memref<1x128xf32, #tpu.memory_space<vmem>>, %arg4: memref<128x768xbf16, #tpu.memory_space<vmem>>, %arg5: memref<128x384xbf16, #tpu.memory_space<vmem>>, %arg6: memref<1x384xf32, #tpu.memory_space<vmem>>, %arg7: memref<1x128xf32, #tpu.memory_space<vmem>>, %arg8: memref<128x16xf32, #tpu.memory_space<vmem>>, %arg9: memref<1x16xf32, #tpu.memory_space<vmem>>, %arg10: memref<1x16xf32, #tpu.memory_space<vmem>>, %arg11: memref<3xf32, #tpu.memory_space<smem>>, %arg12: memref<8x128xf32, #tpu.memory_space<vmem>>) attributes {dimension_semantics = [], scalar_prefetch = 0 : i64, scratch_operands = 0 : i64, tpu.core_type = #tpu.core_type<tc>} {
    %c0 = arith.constant 0 : index
    %c0_0 = arith.constant 0 : index
    %0 = vector.load %arg0[%c0, %c0_0] : memref<64x6xf32, #tpu.memory_space<vmem>>, vector<64x6xf32>
    %c0_1 = arith.constant 0 : index
    %c0_2 = arith.constant 0 : index
    %1 = vector.load %arg1[%c0_1, %c0_2] : memref<6x384xf32, #tpu.memory_space<vmem>>, vector<6x384xf32>
    %cst = arith.constant dense<0.000000e+00> : vector<64x384xf32>
    %2 = tpu.matmul %0, %1, %cst {dimension_numbers = #tpu.dot_dimension_numbers<[1], [0], [0], [1], [0, 0, 1, 1], [], []>} : vector<64x6xf32>, vector<6x384xf32>, vector<64x384xf32> -> vector<64x384xf32>
    %c0_3 = arith.constant 0 : index
    %c0_4 = arith.constant 0 : index
    %3 = vector.load %arg2[%c0_3, %c0_4] : memref<1x384xf32, #tpu.memory_space<vmem>>, vector<1x384xf32>
    %4 = vector.broadcast %3 : vector<1x384xf32> to vector<64x384xf32>
    %5 = arith.addf %2, %4 : vector<64x384xf32>
    %c0_5 = arith.constant 0 : index
    %c0_6 = arith.constant 0 : index
    %6 = vector.load %arg4[%c0_5, %c0_6] : memref<128x768xbf16, #tpu.memory_space<vmem>>, vector<128x768xbf16>
    %c0_7 = arith.constant 0 : index
    %c0_8 = arith.constant 0 : index
    %7 = vector.load %arg5[%c0_7, %c0_8] : memref<128x384xbf16, #tpu.memory_space<vmem>>, vector<128x384xbf16>
    %c0_9 = arith.constant 0 : index
    %c0_10 = arith.constant 0 : index
    %8 = vector.load %arg6[%c0_9, %c0_10] : memref<1x384xf32, #tpu.memory_space<vmem>>, vector<1x384xf32>
    %c0_11 = arith.constant 0 : index
    %c0_12 = arith.constant 0 : index
    %9 = vector.load %arg3[%c0_11, %c0_12] : memref<1x128xf32, #tpu.memory_space<vmem>>, vector<1x128xf32>
    %c0_13 = arith.constant 0 : index
    %c0_14 = arith.constant 0 : index
    %10 = vector.load %arg7[%c0_13, %c0_14] : memref<1x128xf32, #tpu.memory_space<vmem>>, vector<1x128xf32>
    %cst_15 = arith.constant 0.000000e+00 : f32
    %11 = vector.broadcast %cst_15 : f32 to vector<8x128xf32>
    %cst_16 = arith.constant 0.000000e+00 : f32
    %12 = vector.broadcast %cst_16 : f32 to vector<8x128xf32>
    %cst_17 = arith.constant 0.000000e+00 : f32
    %13 = vector.broadcast %cst_17 : f32 to vector<8x384xf32>
    %cst_18 = arith.constant 0.000000e+00 : f32
    %14 = vector.broadcast %cst_18 : f32 to vector<8x384xf32>
    %15 = vector.extract_strided_slice %5 {offsets = [0, 0], sizes = [8, 384], strides = [1, 1]} : vector<64x384xf32> to vector<8x384xf32>
    %16 = vector.extract_strided_slice %15 {offsets = [0, 0], sizes = [8, 256], strides = [1, 1]} : vector<8x384xf32> to vector<8x256xf32>
    %17 = vector.extract_strided_slice %13 {offsets = [0, 0], sizes = [8, 256], strides = [1, 1]} : vector<8x384xf32> to vector<8x256xf32>
    %18 = arith.addf %16, %17 : vector<8x256xf32>
    %19 = arith.negf %18 : vector<8x256xf32>
    %20 = math.exp %19 : vector<8x256xf32>
    %cst_19 = arith.constant 1.000000e+00 : f32
    %21 = vector.broadcast %cst_19 : f32 to vector<8x256xf32>
    %22 = arith.addf %21, %20 : vector<8x256xf32>
    %23 = arith.divf %21, %22 : vector<8x256xf32>
    %24 = vector.extract_strided_slice %23 {offsets = [0, 0], sizes = [8, 128], strides = [1, 1]} : vector<8x256xf32> to vector<8x128xf32>
    %25 = vector.extract_strided_slice %23 {offsets = [0, 128], sizes = [8, 128], strides = [1, 1]} : vector<8x256xf32> to vector<8x128xf32>
    %26 = vector.extract_strided_slice %15 {offsets = [0, 256], sizes = [8, 128], strides = [1, 1]} : vector<8x384xf32> to vector<8x128xf32>
    %27 = vector.extract_strided_slice %13 {offsets = [0, 256], sizes = [8, 128], strides = [1, 1]} : vector<8x384xf32> to vector<8x128xf32>
    %28 = vector.broadcast %9 : vector<1x128xf32> to vector<8x128xf32>
    %29 = arith.addf %27, %28 : vector<8x128xf32>
    %30 = arith.mulf %24, %29 : vector<8x128xf32>
    %31 = arith.addf %26, %30 : vector<8x128xf32>
    %32 = math.tanh %31 : vector<8x128xf32>
    %cst_20 = arith.constant 1.000000e+00 : f32
    %33 = vector.broadcast %cst_20 : f32 to vector<8x128xf32>
    %34 = arith.subf %33, %25 : vector<8x128xf32>
    %35 = arith.mulf %34, %32 : vector<8x128xf32>
    %36 = arith.mulf %25, %11 : vector<8x128xf32>
    %37 = arith.addf %35, %36 : vector<8x128xf32>
    %38 = arith.truncf %37 : vector<8x128xf32> to vector<8x128xbf16>
    %cst_21 = arith.constant dense<0.000000e+00> : vector<8x768xf32>
    %39 = tpu.matmul %38, %6, %cst_21 {dimension_numbers = #tpu.dot_dimension_numbers<[1], [0], [0], [1], [0, 0, 1, 1], [], []>} : vector<8x128xbf16>, vector<128x768xbf16>, vector<8x768xf32> -> vector<8x768xf32>
    %40 = vector.extract_strided_slice %39 {offsets = [0, 0], sizes = [8, 384], strides = [1, 1]} : vector<8x768xf32> to vector<8x384xf32>
    %41 = vector.extract_strided_slice %39 {offsets = [0, 384], sizes = [8, 384], strides = [1, 1]} : vector<8x768xf32> to vector<8x384xf32>
    %42 = vector.broadcast %8 : vector<1x384xf32> to vector<8x384xf32>
    %43 = arith.addf %41, %42 : vector<8x384xf32>
    %44 = vector.extract_strided_slice %43 {offsets = [0, 0], sizes = [8, 256], strides = [1, 1]} : vector<8x384xf32> to vector<8x256xf32>
    %45 = vector.extract_strided_slice %14 {offsets = [0, 0], sizes = [8, 256], strides = [1, 1]} : vector<8x384xf32> to vector<8x256xf32>
    %46 = arith.addf %44, %45 : vector<8x256xf32>
    %47 = arith.negf %46 : vector<8x256xf32>
    %48 = math.exp %47 : vector<8x256xf32>
    %cst_22 = arith.constant 1.000000e+00 : f32
    %49 = vector.broadcast %cst_22 : f32 to vector<8x256xf32>
    %50 = arith.addf %49, %48 : vector<8x256xf32>
    %51 = arith.divf %49, %50 : vector<8x256xf32>
    %52 = vector.extract_strided_slice %51 {offsets = [0, 0], sizes = [8, 128], strides = [1, 1]} : vector<8x256xf32> to vector<8x128xf32>
    %53 = vector.extract_strided_slice %51 {offsets = [0, 128], sizes = [8, 128], strides = [1, 1]} : vector<8x256xf32> to vector<8x128xf32>
    %54 = vector.extract_strided_slice %43 {offsets = [0, 256], sizes = [8, 128], strides = [1, 1]} : vector<8x384xf32> to vector<8x128xf32>
    %55 = vector.extract_strided_slice %14 {offsets = [0, 256], sizes = [8, 128], strides = [1, 1]} : vector<8x384xf32> to vector<8x128xf32>
    %56 = vector.broadcast %10 : vector<1x128xf32> to vector<8x128xf32>
    %57 = arith.addf %55, %56 : vector<8x128xf32>
    %58 = arith.mulf %52, %57 : vector<8x128xf32>
    %59 = arith.addf %54, %58 : vector<8x128xf32>
    %60 = math.tanh %59 : vector<8x128xf32>
    %cst_23 = arith.constant 1.000000e+00 : f32
    %61 = vector.broadcast %cst_23 : f32 to vector<8x128xf32>
    %62 = arith.subf %61, %53 : vector<8x128xf32>
    %63 = arith.mulf %62, %60 : vector<8x128xf32>
    %64 = arith.mulf %53, %12 : vector<8x128xf32>
    %65 = arith.addf %63, %64 : vector<8x128xf32>
    %66 = arith.truncf %65 : vector<8x128xf32> to vector<8x128xbf16>
    %cst_24 = arith.constant dense<0.000000e+00> : vector<8x384xf32>
    %67 = tpu.matmul %66, %7, %cst_24 {dimension_numbers = #tpu.dot_dimension_numbers<[1], [0], [0], [1], [0, 0, 1, 1], [], []>} : vector<8x128xbf16>, vector<128x384xbf16>, vector<8x384xf32> -> vector<8x384xf32>
    %68 = vector.extract_strided_slice %5 {offsets = [8, 0], sizes = [8, 384], strides = [1, 1]} : vector<64x384xf32> to vector<8x384xf32>
    %69 = vector.extract_strided_slice %68 {offsets = [0, 0], sizes = [8, 256], strides = [1, 1]} : vector<8x384xf32> to vector<8x256xf32>
    %70 = vector.extract_strided_slice %40 {offsets = [0, 0], sizes = [8, 256], strides = [1, 1]} : vector<8x384xf32> to vector<8x256xf32>
    %71 = arith.addf %69, %70 : vector<8x256xf32>
    %72 = arith.negf %71 : vector<8x256xf32>
    %73 = math.exp %72 : vector<8x256xf32>
    %cst_25 = arith.constant 1.000000e+00 : f32
    %74 = vector.broadcast %cst_25 : f32 to vector<8x256xf32>
    %75 = arith.addf %74, %73 : vector<8x256xf32>
    %76 = arith.divf %74, %75 : vector<8x256xf32>
    %77 = vector.extract_strided_slice %76 {offsets = [0, 0], sizes = [8, 128], strides = [1, 1]} : vector<8x256xf32> to vector<8x128xf32>
    %78 = vector.extract_strided_slice %76 {offsets = [0, 128], sizes = [8, 128], strides = [1, 1]} : vector<8x256xf32> to vector<8x128xf32>
    %79 = vector.extract_strided_slice %68 {offsets = [0, 256], sizes = [8, 128], strides = [1, 1]} : vector<8x384xf32> to vector<8x128xf32>
    %80 = vector.extract_strided_slice %40 {offsets = [0, 256], sizes = [8, 128], strides = [1, 1]} : vector<8x384xf32> to vector<8x128xf32>
    %81 = vector.broadcast %9 : vector<1x128xf32> to vector<8x128xf32>
    %82 = arith.addf %80, %81 : vector<8x128xf32>
    %83 = arith.mulf %77, %82 : vector<8x128xf32>
    %84 = arith.addf %79, %83 : vector<8x128xf32>
    %85 = math.tanh %84 : vector<8x128xf32>
    %cst_26 = arith.constant 1.000000e+00 : f32
    %86 = vector.broadcast %cst_26 : f32 to vector<8x128xf32>
    %87 = arith.subf %86, %78 : vector<8x128xf32>
    %88 = arith.mulf %87, %85 : vector<8x128xf32>
    %89 = arith.mulf %78, %37 : vector<8x128xf32>
    %90 = arith.addf %88, %89 : vector<8x128xf32>
    %91 = arith.truncf %90 : vector<8x128xf32> to vector<8x128xbf16>
    %cst_27 = arith.constant dense<0.000000e+00> : vector<8x768xf32>
    %92 = tpu.matmul %91, %6, %cst_27 {dimension_numbers = #tpu.dot_dimension_numbers<[1], [0], [0], [1], [0, 0, 1, 1], [], []>} : vector<8x128xbf16>, vector<128x768xbf16>, vector<8x768xf32> -> vector<8x768xf32>
    %93 = vector.extract_strided_slice %92 {offsets = [0, 0], sizes = [8, 384], strides = [1, 1]} : vector<8x768xf32> to vector<8x384xf32>
    %94 = vector.extract_strided_slice %92 {offsets = [0, 384], sizes = [8, 384], strides = [1, 1]} : vector<8x768xf32> to vector<8x384xf32>
    %95 = vector.broadcast %8 : vector<1x384xf32> to vector<8x384xf32>
    %96 = arith.addf %94, %95 : vector<8x384xf32>
    %97 = vector.extract_strided_slice %96 {offsets = [0, 0], sizes = [8, 256], strides = [1, 1]} : vector<8x384xf32> to vector<8x256xf32>
    %98 = vector.extract_strided_slice %67 {offsets = [0, 0], sizes = [8, 256], strides = [1, 1]} : vector<8x384xf32> to vector<8x256xf32>
    %99 = arith.addf %97, %98 : vector<8x256xf32>
    %100 = arith.negf %99 : vector<8x256xf32>
    %101 = math.exp %100 : vector<8x256xf32>
    %cst_28 = arith.constant 1.000000e+00 : f32
    %102 = vector.broadcast %cst_28 : f32 to vector<8x256xf32>
    %103 = arith.addf %102, %101 : vector<8x256xf32>
    %104 = arith.divf %102, %103 : vector<8x256xf32>
    %105 = vector.extract_strided_slice %104 {offsets = [0, 0], sizes = [8, 128], strides = [1, 1]} : vector<8x256xf32> to vector<8x128xf32>
    %106 = vector.extract_strided_slice %104 {offsets = [0, 128], sizes = [8, 128], strides = [1, 1]} : vector<8x256xf32> to vector<8x128xf32>
    %107 = vector.extract_strided_slice %96 {offsets = [0, 256], sizes = [8, 128], strides = [1, 1]} : vector<8x384xf32> to vector<8x128xf32>
    %108 = vector.extract_strided_slice %67 {offsets = [0, 256], sizes = [8, 128], strides = [1, 1]} : vector<8x384xf32> to vector<8x128xf32>
    %109 = vector.broadcast %10 : vector<1x128xf32> to vector<8x128xf32>
    %110 = arith.addf %108, %109 : vector<8x128xf32>
    %111 = arith.mulf %105, %110 : vector<8x128xf32>
    %112 = arith.addf %107, %111 : vector<8x128xf32>
    %113 = math.tanh %112 : vector<8x128xf32>
    %cst_29 = arith.constant 1.000000e+00 : f32
    %114 = vector.broadcast %cst_29 : f32 to vector<8x128xf32>
    %115 = arith.subf %114, %106 : vector<8x128xf32>
    %116 = arith.mulf %115, %113 : vector<8x128xf32>
    %117 = arith.mulf %106, %65 : vector<8x128xf32>
    %118 = arith.addf %116, %117 : vector<8x128xf32>
    %119 = arith.truncf %118 : vector<8x128xf32> to vector<8x128xbf16>
    %cst_30 = arith.constant dense<0.000000e+00> : vector<8x384xf32>
    %120 = tpu.matmul %119, %7, %cst_30 {dimension_numbers = #tpu.dot_dimension_numbers<[1], [0], [0], [1], [0, 0, 1, 1], [], []>} : vector<8x128xbf16>, vector<128x384xbf16>, vector<8x384xf32> -> vector<8x384xf32>
    %121 = vector.extract_strided_slice %5 {offsets = [16, 0], sizes = [8, 384], strides = [1, 1]} : vector<64x384xf32> to vector<8x384xf32>
    %122 = vector.extract_strided_slice %121 {offsets = [0, 0], sizes = [8, 256], strides = [1, 1]} : vector<8x384xf32> to vector<8x256xf32>
    %123 = vector.extract_strided_slice %93 {offsets = [0, 0], sizes = [8, 256], strides = [1, 1]} : vector<8x384xf32> to vector<8x256xf32>
    %124 = arith.addf %122, %123 : vector<8x256xf32>
    %125 = arith.negf %124 : vector<8x256xf32>
    %126 = math.exp %125 : vector<8x256xf32>
    %cst_31 = arith.constant 1.000000e+00 : f32
    %127 = vector.broadcast %cst_31 : f32 to vector<8x256xf32>
    %128 = arith.addf %127, %126 : vector<8x256xf32>
    %129 = arith.divf %127, %128 : vector<8x256xf32>
    %130 = vector.extract_strided_slice %129 {offsets = [0, 0], sizes = [8, 128], strides = [1, 1]} : vector<8x256xf32> to vector<8x128xf32>
    %131 = vector.extract_strided_slice %129 {offsets = [0, 128], sizes = [8, 128], strides = [1, 1]} : vector<8x256xf32> to vector<8x128xf32>
    %132 = vector.extract_strided_slice %121 {offsets = [0, 256], sizes = [8, 128], strides = [1, 1]} : vector<8x384xf32> to vector<8x128xf32>
    %133 = vector.extract_strided_slice %93 {offsets = [0, 256], sizes = [8, 128], strides = [1, 1]} : vector<8x384xf32> to vector<8x128xf32>
    %134 = vector.broadcast %9 : vector<1x128xf32> to vector<8x128xf32>
    %135 = arith.addf %133, %134 : vector<8x128xf32>
    %136 = arith.mulf %130, %135 : vector<8x128xf32>
    %137 = arith.addf %132, %136 : vector<8x128xf32>
    %138 = math.tanh %137 : vector<8x128xf32>
    %cst_32 = arith.constant 1.000000e+00 : f32
    %139 = vector.broadcast %cst_32 : f32 to vector<8x128xf32>
    %140 = arith.subf %139, %131 : vector<8x128xf32>
    %141 = arith.mulf %140, %138 : vector<8x128xf32>
    %142 = arith.mulf %131, %90 : vector<8x128xf32>
    %143 = arith.addf %141, %142 : vector<8x128xf32>
    %144 = arith.truncf %143 : vector<8x128xf32> to vector<8x128xbf16>
    %cst_33 = arith.constant dense<0.000000e+00> : vector<8x768xf32>
    %145 = tpu.matmul %144, %6, %cst_33 {dimension_numbers = #tpu.dot_dimension_numbers<[1], [0], [0], [1], [0, 0, 1, 1], [], []>} : vector<8x128xbf16>, vector<128x768xbf16>, vector<8x768xf32> -> vector<8x768xf32>
    %146 = vector.extract_strided_slice %145 {offsets = [0, 0], sizes = [8, 384], strides = [1, 1]} : vector<8x768xf32> to vector<8x384xf32>
    %147 = vector.extract_strided_slice %145 {offsets = [0, 384], sizes = [8, 384], strides = [1, 1]} : vector<8x768xf32> to vector<8x384xf32>
    %148 = vector.broadcast %8 : vector<1x384xf32> to vector<8x384xf32>
    %149 = arith.addf %147, %148 : vector<8x384xf32>
    %150 = vector.extract_strided_slice %149 {offsets = [0, 0], sizes = [8, 256], strides = [1, 1]} : vector<8x384xf32> to vector<8x256xf32>
    %151 = vector.extract_strided_slice %120 {offsets = [0, 0], sizes = [8, 256], strides = [1, 1]} : vector<8x384xf32> to vector<8x256xf32>
    %152 = arith.addf %150, %151 : vector<8x256xf32>
    %153 = arith.negf %152 : vector<8x256xf32>
    %154 = math.exp %153 : vector<8x256xf32>
    %cst_34 = arith.constant 1.000000e+00 : f32
    %155 = vector.broadcast %cst_34 : f32 to vector<8x256xf32>
    %156 = arith.addf %155, %154 : vector<8x256xf32>
    %157 = arith.divf %155, %156 : vector<8x256xf32>
    %158 = vector.extract_strided_slice %157 {offsets = [0, 0], sizes = [8, 128], strides = [1, 1]} : vector<8x256xf32> to vector<8x128xf32>
    %159 = vector.extract_strided_slice %157 {offsets = [0, 128], sizes = [8, 128], strides = [1, 1]} : vector<8x256xf32> to vector<8x128xf32>
    %160 = vector.extract_strided_slice %149 {offsets = [0, 256], sizes = [8, 128], strides = [1, 1]} : vector<8x384xf32> to vector<8x128xf32>
    %161 = vector.extract_strided_slice %120 {offsets = [0, 256], sizes = [8, 128], strides = [1, 1]} : vector<8x384xf32> to vector<8x128xf32>
    %162 = vector.broadcast %10 : vector<1x128xf32> to vector<8x128xf32>
    %163 = arith.addf %161, %162 : vector<8x128xf32>
    %164 = arith.mulf %158, %163 : vector<8x128xf32>
    %165 = arith.addf %160, %164 : vector<8x128xf32>
    %166 = math.tanh %165 : vector<8x128xf32>
    %cst_35 = arith.constant 1.000000e+00 : f32
    %167 = vector.broadcast %cst_35 : f32 to vector<8x128xf32>
    %168 = arith.subf %167, %159 : vector<8x128xf32>
    %169 = arith.mulf %168, %166 : vector<8x128xf32>
    %170 = arith.mulf %159, %118 : vector<8x128xf32>
    %171 = arith.addf %169, %170 : vector<8x128xf32>
    %172 = arith.truncf %171 : vector<8x128xf32> to vector<8x128xbf16>
    %cst_36 = arith.constant dense<0.000000e+00> : vector<8x384xf32>
    %173 = tpu.matmul %172, %7, %cst_36 {dimension_numbers = #tpu.dot_dimension_numbers<[1], [0], [0], [1], [0, 0, 1, 1], [], []>} : vector<8x128xbf16>, vector<128x384xbf16>, vector<8x384xf32> -> vector<8x384xf32>
    %174 = vector.extract_strided_slice %5 {offsets = [24, 0], sizes = [8, 384], strides = [1, 1]} : vector<64x384xf32> to vector<8x384xf32>
    %175 = vector.extract_strided_slice %174 {offsets = [0, 0], sizes = [8, 256], strides = [1, 1]} : vector<8x384xf32> to vector<8x256xf32>
    %176 = vector.extract_strided_slice %146 {offsets = [0, 0], sizes = [8, 256], strides = [1, 1]} : vector<8x384xf32> to vector<8x256xf32>
    %177 = arith.addf %175, %176 : vector<8x256xf32>
    %178 = arith.negf %177 : vector<8x256xf32>
    %179 = math.exp %178 : vector<8x256xf32>
    %cst_37 = arith.constant 1.000000e+00 : f32
    %180 = vector.broadcast %cst_37 : f32 to vector<8x256xf32>
    %181 = arith.addf %180, %179 : vector<8x256xf32>
    %182 = arith.divf %180, %181 : vector<8x256xf32>
    %183 = vector.extract_strided_slice %182 {offsets = [0, 0], sizes = [8, 128], strides = [1, 1]} : vector<8x256xf32> to vector<8x128xf32>
    %184 = vector.extract_strided_slice %182 {offsets = [0, 128], sizes = [8, 128], strides = [1, 1]} : vector<8x256xf32> to vector<8x128xf32>
    %185 = vector.extract_strided_slice %174 {offsets = [0, 256], sizes = [8, 128], strides = [1, 1]} : vector<8x384xf32> to vector<8x128xf32>
    %186 = vector.extract_strided_slice %146 {offsets = [0, 256], sizes = [8, 128], strides = [1, 1]} : vector<8x384xf32> to vector<8x128xf32>
    %187 = vector.broadcast %9 : vector<1x128xf32> to vector<8x128xf32>
    %188 = arith.addf %186, %187 : vector<8x128xf32>
    %189 = arith.mulf %183, %188 : vector<8x128xf32>
    %190 = arith.addf %185, %189 : vector<8x128xf32>
    %191 = math.tanh %190 : vector<8x128xf32>
    %cst_38 = arith.constant 1.000000e+00 : f32
    %192 = vector.broadcast %cst_38 : f32 to vector<8x128xf32>
    %193 = arith.subf %192, %184 : vector<8x128xf32>
    %194 = arith.mulf %193, %191 : vector<8x128xf32>
    %195 = arith.mulf %184, %143 : vector<8x128xf32>
    %196 = arith.addf %194, %195 : vector<8x128xf32>
    %197 = arith.truncf %196 : vector<8x128xf32> to vector<8x128xbf16>
    %cst_39 = arith.constant dense<0.000000e+00> : vector<8x768xf32>
    %198 = tpu.matmul %197, %6, %cst_39 {dimension_numbers = #tpu.dot_dimension_numbers<[1], [0], [0], [1], [0, 0, 1, 1], [], []>} : vector<8x128xbf16>, vector<128x768xbf16>, vector<8x768xf32> -> vector<8x768xf32>
    %199 = vector.extract_strided_slice %198 {offsets = [0, 0], sizes = [8, 384], strides = [1, 1]} : vector<8x768xf32> to vector<8x384xf32>
    %200 = vector.extract_strided_slice %198 {offsets = [0, 384], sizes = [8, 384], strides = [1, 1]} : vector<8x768xf32> to vector<8x384xf32>
    %201 = vector.broadcast %8 : vector<1x384xf32> to vector<8x384xf32>
    %202 = arith.addf %200, %201 : vector<8x384xf32>
    %203 = vector.extract_strided_slice %202 {offsets = [0, 0], sizes = [8, 256], strides = [1, 1]} : vector<8x384xf32> to vector<8x256xf32>
    %204 = vector.extract_strided_slice %173 {offsets = [0, 0], sizes = [8, 256], strides = [1, 1]} : vector<8x384xf32> to vector<8x256xf32>
    %205 = arith.addf %203, %204 : vector<8x256xf32>
    %206 = arith.negf %205 : vector<8x256xf32>
    %207 = math.exp %206 : vector<8x256xf32>
    %cst_40 = arith.constant 1.000000e+00 : f32
    %208 = vector.broadcast %cst_40 : f32 to vector<8x256xf32>
    %209 = arith.addf %208, %207 : vector<8x256xf32>
    %210 = arith.divf %208, %209 : vector<8x256xf32>
    %211 = vector.extract_strided_slice %210 {offsets = [0, 0], sizes = [8, 128], strides = [1, 1]} : vector<8x256xf32> to vector<8x128xf32>
    %212 = vector.extract_strided_slice %210 {offsets = [0, 128], sizes = [8, 128], strides = [1, 1]} : vector<8x256xf32> to vector<8x128xf32>
    %213 = vector.extract_strided_slice %202 {offsets = [0, 256], sizes = [8, 128], strides = [1, 1]} : vector<8x384xf32> to vector<8x128xf32>
    %214 = vector.extract_strided_slice %173 {offsets = [0, 256], sizes = [8, 128], strides = [1, 1]} : vector<8x384xf32> to vector<8x128xf32>
    %215 = vector.broadcast %10 : vector<1x128xf32> to vector<8x128xf32>
    %216 = arith.addf %214, %215 : vector<8x128xf32>
    %217 = arith.mulf %211, %216 : vector<8x128xf32>
    %218 = arith.addf %213, %217 : vector<8x128xf32>
    %219 = math.tanh %218 : vector<8x128xf32>
    %cst_41 = arith.constant 1.000000e+00 : f32
    %220 = vector.broadcast %cst_41 : f32 to vector<8x128xf32>
    %221 = arith.subf %220, %212 : vector<8x128xf32>
    %222 = arith.mulf %221, %219 : vector<8x128xf32>
    %223 = arith.mulf %212, %171 : vector<8x128xf32>
    %224 = arith.addf %222, %223 : vector<8x128xf32>
    %225 = arith.truncf %224 : vector<8x128xf32> to vector<8x128xbf16>
    %cst_42 = arith.constant dense<0.000000e+00> : vector<8x384xf32>
    %226 = tpu.matmul %225, %7, %cst_42 {dimension_numbers = #tpu.dot_dimension_numbers<[1], [0], [0], [1], [0, 0, 1, 1], [], []>} : vector<8x128xbf16>, vector<128x384xbf16>, vector<8x384xf32> -> vector<8x384xf32>
    %227 = vector.extract_strided_slice %5 {offsets = [32, 0], sizes = [8, 384], strides = [1, 1]} : vector<64x384xf32> to vector<8x384xf32>
    %228 = vector.extract_strided_slice %227 {offsets = [0, 0], sizes = [8, 256], strides = [1, 1]} : vector<8x384xf32> to vector<8x256xf32>
    %229 = vector.extract_strided_slice %199 {offsets = [0, 0], sizes = [8, 256], strides = [1, 1]} : vector<8x384xf32> to vector<8x256xf32>
    %230 = arith.addf %228, %229 : vector<8x256xf32>
    %231 = arith.negf %230 : vector<8x256xf32>
    %232 = math.exp %231 : vector<8x256xf32>
    %cst_43 = arith.constant 1.000000e+00 : f32
    %233 = vector.broadcast %cst_43 : f32 to vector<8x256xf32>
    %234 = arith.addf %233, %232 : vector<8x256xf32>
    %235 = arith.divf %233, %234 : vector<8x256xf32>
    %236 = vector.extract_strided_slice %235 {offsets = [0, 0], sizes = [8, 128], strides = [1, 1]} : vector<8x256xf32> to vector<8x128xf32>
    %237 = vector.extract_strided_slice %235 {offsets = [0, 128], sizes = [8, 128], strides = [1, 1]} : vector<8x256xf32> to vector<8x128xf32>
    %238 = vector.extract_strided_slice %227 {offsets = [0, 256], sizes = [8, 128], strides = [1, 1]} : vector<8x384xf32> to vector<8x128xf32>
    %239 = vector.extract_strided_slice %199 {offsets = [0, 256], sizes = [8, 128], strides = [1, 1]} : vector<8x384xf32> to vector<8x128xf32>
    %240 = vector.broadcast %9 : vector<1x128xf32> to vector<8x128xf32>
    %241 = arith.addf %239, %240 : vector<8x128xf32>
    %242 = arith.mulf %236, %241 : vector<8x128xf32>
    %243 = arith.addf %238, %242 : vector<8x128xf32>
    %244 = math.tanh %243 : vector<8x128xf32>
    %cst_44 = arith.constant 1.000000e+00 : f32
    %245 = vector.broadcast %cst_44 : f32 to vector<8x128xf32>
    %246 = arith.subf %245, %237 : vector<8x128xf32>
    %247 = arith.mulf %246, %244 : vector<8x128xf32>
    %248 = arith.mulf %237, %196 : vector<8x128xf32>
    %249 = arith.addf %247, %248 : vector<8x128xf32>
    %250 = arith.truncf %249 : vector<8x128xf32> to vector<8x128xbf16>
    %cst_45 = arith.constant dense<0.000000e+00> : vector<8x768xf32>
    %251 = tpu.matmul %250, %6, %cst_45 {dimension_numbers = #tpu.dot_dimension_numbers<[1], [0], [0], [1], [0, 0, 1, 1], [], []>} : vector<8x128xbf16>, vector<128x768xbf16>, vector<8x768xf32> -> vector<8x768xf32>
    %252 = vector.extract_strided_slice %251 {offsets = [0, 0], sizes = [8, 384], strides = [1, 1]} : vector<8x768xf32> to vector<8x384xf32>
    %253 = vector.extract_strided_slice %251 {offsets = [0, 384], sizes = [8, 384], strides = [1, 1]} : vector<8x768xf32> to vector<8x384xf32>
    %254 = vector.broadcast %8 : vector<1x384xf32> to vector<8x384xf32>
    %255 = arith.addf %253, %254 : vector<8x384xf32>
    %256 = vector.extract_strided_slice %255 {offsets = [0, 0], sizes = [8, 256], strides = [1, 1]} : vector<8x384xf32> to vector<8x256xf32>
    %257 = vector.extract_strided_slice %226 {offsets = [0, 0], sizes = [8, 256], strides = [1, 1]} : vector<8x384xf32> to vector<8x256xf32>
    %258 = arith.addf %256, %257 : vector<8x256xf32>
    %259 = arith.negf %258 : vector<8x256xf32>
    %260 = math.exp %259 : vector<8x256xf32>
    %cst_46 = arith.constant 1.000000e+00 : f32
    %261 = vector.broadcast %cst_46 : f32 to vector<8x256xf32>
    %262 = arith.addf %261, %260 : vector<8x256xf32>
    %263 = arith.divf %261, %262 : vector<8x256xf32>
    %264 = vector.extract_strided_slice %263 {offsets = [0, 0], sizes = [8, 128], strides = [1, 1]} : vector<8x256xf32> to vector<8x128xf32>
    %265 = vector.extract_strided_slice %263 {offsets = [0, 128], sizes = [8, 128], strides = [1, 1]} : vector<8x256xf32> to vector<8x128xf32>
    %266 = vector.extract_strided_slice %255 {offsets = [0, 256], sizes = [8, 128], strides = [1, 1]} : vector<8x384xf32> to vector<8x128xf32>
    %267 = vector.extract_strided_slice %226 {offsets = [0, 256], sizes = [8, 128], strides = [1, 1]} : vector<8x384xf32> to vector<8x128xf32>
    %268 = vector.broadcast %10 : vector<1x128xf32> to vector<8x128xf32>
    %269 = arith.addf %267, %268 : vector<8x128xf32>
    %270 = arith.mulf %264, %269 : vector<8x128xf32>
    %271 = arith.addf %266, %270 : vector<8x128xf32>
    %272 = math.tanh %271 : vector<8x128xf32>
    %cst_47 = arith.constant 1.000000e+00 : f32
    %273 = vector.broadcast %cst_47 : f32 to vector<8x128xf32>
    %274 = arith.subf %273, %265 : vector<8x128xf32>
    %275 = arith.mulf %274, %272 : vector<8x128xf32>
    %276 = arith.mulf %265, %224 : vector<8x128xf32>
    %277 = arith.addf %275, %276 : vector<8x128xf32>
    %278 = arith.truncf %277 : vector<8x128xf32> to vector<8x128xbf16>
    %cst_48 = arith.constant dense<0.000000e+00> : vector<8x384xf32>
    %279 = tpu.matmul %278, %7, %cst_48 {dimension_numbers = #tpu.dot_dimension_numbers<[1], [0], [0], [1], [0, 0, 1, 1], [], []>} : vector<8x128xbf16>, vector<128x384xbf16>, vector<8x384xf32> -> vector<8x384xf32>
    %280 = vector.extract_strided_slice %5 {offsets = [40, 0], sizes = [8, 384], strides = [1, 1]} : vector<64x384xf32> to vector<8x384xf32>
    %281 = vector.extract_strided_slice %280 {offsets = [0, 0], sizes = [8, 256], strides = [1, 1]} : vector<8x384xf32> to vector<8x256xf32>
    %282 = vector.extract_strided_slice %252 {offsets = [0, 0], sizes = [8, 256], strides = [1, 1]} : vector<8x384xf32> to vector<8x256xf32>
    %283 = arith.addf %281, %282 : vector<8x256xf32>
    %284 = arith.negf %283 : vector<8x256xf32>
    %285 = math.exp %284 : vector<8x256xf32>
    %cst_49 = arith.constant 1.000000e+00 : f32
    %286 = vector.broadcast %cst_49 : f32 to vector<8x256xf32>
    %287 = arith.addf %286, %285 : vector<8x256xf32>
    %288 = arith.divf %286, %287 : vector<8x256xf32>
    %289 = vector.extract_strided_slice %288 {offsets = [0, 0], sizes = [8, 128], strides = [1, 1]} : vector<8x256xf32> to vector<8x128xf32>
    %290 = vector.extract_strided_slice %288 {offsets = [0, 128], sizes = [8, 128], strides = [1, 1]} : vector<8x256xf32> to vector<8x128xf32>
    %291 = vector.extract_strided_slice %280 {offsets = [0, 256], sizes = [8, 128], strides = [1, 1]} : vector<8x384xf32> to vector<8x128xf32>
    %292 = vector.extract_strided_slice %252 {offsets = [0, 256], sizes = [8, 128], strides = [1, 1]} : vector<8x384xf32> to vector<8x128xf32>
    %293 = vector.broadcast %9 : vector<1x128xf32> to vector<8x128xf32>
    %294 = arith.addf %292, %293 : vector<8x128xf32>
    %295 = arith.mulf %289, %294 : vector<8x128xf32>
    %296 = arith.addf %291, %295 : vector<8x128xf32>
    %297 = math.tanh %296 : vector<8x128xf32>
    %cst_50 = arith.constant 1.000000e+00 : f32
    %298 = vector.broadcast %cst_50 : f32 to vector<8x128xf32>
    %299 = arith.subf %298, %290 : vector<8x128xf32>
    %300 = arith.mulf %299, %297 : vector<8x128xf32>
    %301 = arith.mulf %290, %249 : vector<8x128xf32>
    %302 = arith.addf %300, %301 : vector<8x128xf32>
    %303 = arith.truncf %302 : vector<8x128xf32> to vector<8x128xbf16>
    %cst_51 = arith.constant dense<0.000000e+00> : vector<8x768xf32>
    %304 = tpu.matmul %303, %6, %cst_51 {dimension_numbers = #tpu.dot_dimension_numbers<[1], [0], [0], [1], [0, 0, 1, 1], [], []>} : vector<8x128xbf16>, vector<128x768xbf16>, vector<8x768xf32> -> vector<8x768xf32>
    %305 = vector.extract_strided_slice %304 {offsets = [0, 0], sizes = [8, 384], strides = [1, 1]} : vector<8x768xf32> to vector<8x384xf32>
    %306 = vector.extract_strided_slice %304 {offsets = [0, 384], sizes = [8, 384], strides = [1, 1]} : vector<8x768xf32> to vector<8x384xf32>
    %307 = vector.broadcast %8 : vector<1x384xf32> to vector<8x384xf32>
    %308 = arith.addf %306, %307 : vector<8x384xf32>
    %309 = vector.extract_strided_slice %308 {offsets = [0, 0], sizes = [8, 256], strides = [1, 1]} : vector<8x384xf32> to vector<8x256xf32>
    %310 = vector.extract_strided_slice %279 {offsets = [0, 0], sizes = [8, 256], strides = [1, 1]} : vector<8x384xf32> to vector<8x256xf32>
    %311 = arith.addf %309, %310 : vector<8x256xf32>
    %312 = arith.negf %311 : vector<8x256xf32>
    %313 = math.exp %312 : vector<8x256xf32>
    %cst_52 = arith.constant 1.000000e+00 : f32
    %314 = vector.broadcast %cst_52 : f32 to vector<8x256xf32>
    %315 = arith.addf %314, %313 : vector<8x256xf32>
    %316 = arith.divf %314, %315 : vector<8x256xf32>
    %317 = vector.extract_strided_slice %316 {offsets = [0, 0], sizes = [8, 128], strides = [1, 1]} : vector<8x256xf32> to vector<8x128xf32>
    %318 = vector.extract_strided_slice %316 {offsets = [0, 128], sizes = [8, 128], strides = [1, 1]} : vector<8x256xf32> to vector<8x128xf32>
    %319 = vector.extract_strided_slice %308 {offsets = [0, 256], sizes = [8, 128], strides = [1, 1]} : vector<8x384xf32> to vector<8x128xf32>
    %320 = vector.extract_strided_slice %279 {offsets = [0, 256], sizes = [8, 128], strides = [1, 1]} : vector<8x384xf32> to vector<8x128xf32>
    %321 = vector.broadcast %10 : vector<1x128xf32> to vector<8x128xf32>
    %322 = arith.addf %320, %321 : vector<8x128xf32>
    %323 = arith.mulf %317, %322 : vector<8x128xf32>
    %324 = arith.addf %319, %323 : vector<8x128xf32>
    %325 = math.tanh %324 : vector<8x128xf32>
    %cst_53 = arith.constant 1.000000e+00 : f32
    %326 = vector.broadcast %cst_53 : f32 to vector<8x128xf32>
    %327 = arith.subf %326, %318 : vector<8x128xf32>
    %328 = arith.mulf %327, %325 : vector<8x128xf32>
    %329 = arith.mulf %318, %277 : vector<8x128xf32>
    %330 = arith.addf %328, %329 : vector<8x128xf32>
    %331 = arith.truncf %330 : vector<8x128xf32> to vector<8x128xbf16>
    %cst_54 = arith.constant dense<0.000000e+00> : vector<8x384xf32>
    %332 = tpu.matmul %331, %7, %cst_54 {dimension_numbers = #tpu.dot_dimension_numbers<[1], [0], [0], [1], [0, 0, 1, 1], [], []>} : vector<8x128xbf16>, vector<128x384xbf16>, vector<8x384xf32> -> vector<8x384xf32>
    %333 = vector.extract_strided_slice %5 {offsets = [48, 0], sizes = [8, 384], strides = [1, 1]} : vector<64x384xf32> to vector<8x384xf32>
    %334 = vector.extract_strided_slice %333 {offsets = [0, 0], sizes = [8, 256], strides = [1, 1]} : vector<8x384xf32> to vector<8x256xf32>
    %335 = vector.extract_strided_slice %305 {offsets = [0, 0], sizes = [8, 256], strides = [1, 1]} : vector<8x384xf32> to vector<8x256xf32>
    %336 = arith.addf %334, %335 : vector<8x256xf32>
    %337 = arith.negf %336 : vector<8x256xf32>
    %338 = math.exp %337 : vector<8x256xf32>
    %cst_55 = arith.constant 1.000000e+00 : f32
    %339 = vector.broadcast %cst_55 : f32 to vector<8x256xf32>
    %340 = arith.addf %339, %338 : vector<8x256xf32>
    %341 = arith.divf %339, %340 : vector<8x256xf32>
    %342 = vector.extract_strided_slice %341 {offsets = [0, 0], sizes = [8, 128], strides = [1, 1]} : vector<8x256xf32> to vector<8x128xf32>
    %343 = vector.extract_strided_slice %341 {offsets = [0, 128], sizes = [8, 128], strides = [1, 1]} : vector<8x256xf32> to vector<8x128xf32>
    %344 = vector.extract_strided_slice %333 {offsets = [0, 256], sizes = [8, 128], strides = [1, 1]} : vector<8x384xf32> to vector<8x128xf32>
    %345 = vector.extract_strided_slice %305 {offsets = [0, 256], sizes = [8, 128], strides = [1, 1]} : vector<8x384xf32> to vector<8x128xf32>
    %346 = vector.broadcast %9 : vector<1x128xf32> to vector<8x128xf32>
    %347 = arith.addf %345, %346 : vector<8x128xf32>
    %348 = arith.mulf %342, %347 : vector<8x128xf32>
    %349 = arith.addf %344, %348 : vector<8x128xf32>
    %350 = math.tanh %349 : vector<8x128xf32>
    %cst_56 = arith.constant 1.000000e+00 : f32
    %351 = vector.broadcast %cst_56 : f32 to vector<8x128xf32>
    %352 = arith.subf %351, %343 : vector<8x128xf32>
    %353 = arith.mulf %352, %350 : vector<8x128xf32>
    %354 = arith.mulf %343, %302 : vector<8x128xf32>
    %355 = arith.addf %353, %354 : vector<8x128xf32>
    %356 = arith.truncf %355 : vector<8x128xf32> to vector<8x128xbf16>
    %cst_57 = arith.constant dense<0.000000e+00> : vector<8x768xf32>
    %357 = tpu.matmul %356, %6, %cst_57 {dimension_numbers = #tpu.dot_dimension_numbers<[1], [0], [0], [1], [0, 0, 1, 1], [], []>} : vector<8x128xbf16>, vector<128x768xbf16>, vector<8x768xf32> -> vector<8x768xf32>
    %358 = vector.extract_strided_slice %357 {offsets = [0, 0], sizes = [8, 384], strides = [1, 1]} : vector<8x768xf32> to vector<8x384xf32>
    %359 = vector.extract_strided_slice %357 {offsets = [0, 384], sizes = [8, 384], strides = [1, 1]} : vector<8x768xf32> to vector<8x384xf32>
    %360 = vector.broadcast %8 : vector<1x384xf32> to vector<8x384xf32>
    %361 = arith.addf %359, %360 : vector<8x384xf32>
    %362 = vector.extract_strided_slice %361 {offsets = [0, 0], sizes = [8, 256], strides = [1, 1]} : vector<8x384xf32> to vector<8x256xf32>
    %363 = vector.extract_strided_slice %332 {offsets = [0, 0], sizes = [8, 256], strides = [1, 1]} : vector<8x384xf32> to vector<8x256xf32>
    %364 = arith.addf %362, %363 : vector<8x256xf32>
    %365 = arith.negf %364 : vector<8x256xf32>
    %366 = math.exp %365 : vector<8x256xf32>
    %cst_58 = arith.constant 1.000000e+00 : f32
    %367 = vector.broadcast %cst_58 : f32 to vector<8x256xf32>
    %368 = arith.addf %367, %366 : vector<8x256xf32>
    %369 = arith.divf %367, %368 : vector<8x256xf32>
    %370 = vector.extract_strided_slice %369 {offsets = [0, 0], sizes = [8, 128], strides = [1, 1]} : vector<8x256xf32> to vector<8x128xf32>
    %371 = vector.extract_strided_slice %369 {offsets = [0, 128], sizes = [8, 128], strides = [1, 1]} : vector<8x256xf32> to vector<8x128xf32>
    %372 = vector.extract_strided_slice %361 {offsets = [0, 256], sizes = [8, 128], strides = [1, 1]} : vector<8x384xf32> to vector<8x128xf32>
    %373 = vector.extract_strided_slice %332 {offsets = [0, 256], sizes = [8, 128], strides = [1, 1]} : vector<8x384xf32> to vector<8x128xf32>
    %374 = vector.broadcast %10 : vector<1x128xf32> to vector<8x128xf32>
    %375 = arith.addf %373, %374 : vector<8x128xf32>
    %376 = arith.mulf %370, %375 : vector<8x128xf32>
    %377 = arith.addf %372, %376 : vector<8x128xf32>
    %378 = math.tanh %377 : vector<8x128xf32>
    %cst_59 = arith.constant 1.000000e+00 : f32
    %379 = vector.broadcast %cst_59 : f32 to vector<8x128xf32>
    %380 = arith.subf %379, %371 : vector<8x128xf32>
    %381 = arith.mulf %380, %378 : vector<8x128xf32>
    %382 = arith.mulf %371, %330 : vector<8x128xf32>
    %383 = arith.addf %381, %382 : vector<8x128xf32>
    %384 = arith.truncf %383 : vector<8x128xf32> to vector<8x128xbf16>
    %cst_60 = arith.constant dense<0.000000e+00> : vector<8x384xf32>
    %385 = tpu.matmul %384, %7, %cst_60 {dimension_numbers = #tpu.dot_dimension_numbers<[1], [0], [0], [1], [0, 0, 1, 1], [], []>} : vector<8x128xbf16>, vector<128x384xbf16>, vector<8x384xf32> -> vector<8x384xf32>
    %386 = vector.extract_strided_slice %5 {offsets = [56, 0], sizes = [8, 384], strides = [1, 1]} : vector<64x384xf32> to vector<8x384xf32>
    %387 = vector.extract_strided_slice %386 {offsets = [0, 0], sizes = [8, 256], strides = [1, 1]} : vector<8x384xf32> to vector<8x256xf32>
    %388 = vector.extract_strided_slice %358 {offsets = [0, 0], sizes = [8, 256], strides = [1, 1]} : vector<8x384xf32> to vector<8x256xf32>
    %389 = arith.addf %387, %388 : vector<8x256xf32>
    %390 = arith.negf %389 : vector<8x256xf32>
    %391 = math.exp %390 : vector<8x256xf32>
    %cst_61 = arith.constant 1.000000e+00 : f32
    %392 = vector.broadcast %cst_61 : f32 to vector<8x256xf32>
    %393 = arith.addf %392, %391 : vector<8x256xf32>
    %394 = arith.divf %392, %393 : vector<8x256xf32>
    %395 = vector.extract_strided_slice %394 {offsets = [0, 0], sizes = [8, 128], strides = [1, 1]} : vector<8x256xf32> to vector<8x128xf32>
    %396 = vector.extract_strided_slice %394 {offsets = [0, 128], sizes = [8, 128], strides = [1, 1]} : vector<8x256xf32> to vector<8x128xf32>
    %397 = vector.extract_strided_slice %386 {offsets = [0, 256], sizes = [8, 128], strides = [1, 1]} : vector<8x384xf32> to vector<8x128xf32>
    %398 = vector.extract_strided_slice %358 {offsets = [0, 256], sizes = [8, 128], strides = [1, 1]} : vector<8x384xf32> to vector<8x128xf32>
    %399 = vector.broadcast %9 : vector<1x128xf32> to vector<8x128xf32>
    %400 = arith.addf %398, %399 : vector<8x128xf32>
    %401 = arith.mulf %395, %400 : vector<8x128xf32>
    %402 = arith.addf %397, %401 : vector<8x128xf32>
    %403 = math.tanh %402 : vector<8x128xf32>
    %cst_62 = arith.constant 1.000000e+00 : f32
    %404 = vector.broadcast %cst_62 : f32 to vector<8x128xf32>
    %405 = arith.subf %404, %396 : vector<8x128xf32>
    %406 = arith.mulf %405, %403 : vector<8x128xf32>
    %407 = arith.mulf %396, %355 : vector<8x128xf32>
    %408 = arith.addf %406, %407 : vector<8x128xf32>
    %409 = arith.truncf %408 : vector<8x128xf32> to vector<8x128xbf16>
    %cst_63 = arith.constant dense<0.000000e+00> : vector<8x768xf32>
    %410 = tpu.matmul %409, %6, %cst_63 {dimension_numbers = #tpu.dot_dimension_numbers<[1], [0], [0], [1], [0, 0, 1, 1], [], []>} : vector<8x128xbf16>, vector<128x768xbf16>, vector<8x768xf32> -> vector<8x768xf32>
    %411 = vector.extract_strided_slice %410 {offsets = [0, 384], sizes = [8, 384], strides = [1, 1]} : vector<8x768xf32> to vector<8x384xf32>
    %412 = vector.broadcast %8 : vector<1x384xf32> to vector<8x384xf32>
    %413 = arith.addf %411, %412 : vector<8x384xf32>
    %414 = vector.extract_strided_slice %413 {offsets = [0, 0], sizes = [8, 256], strides = [1, 1]} : vector<8x384xf32> to vector<8x256xf32>
    %415 = vector.extract_strided_slice %385 {offsets = [0, 0], sizes = [8, 256], strides = [1, 1]} : vector<8x384xf32> to vector<8x256xf32>
    %416 = arith.addf %414, %415 : vector<8x256xf32>
    %417 = arith.negf %416 : vector<8x256xf32>
    %418 = math.exp %417 : vector<8x256xf32>
    %cst_64 = arith.constant 1.000000e+00 : f32
    %419 = vector.broadcast %cst_64 : f32 to vector<8x256xf32>
    %420 = arith.addf %419, %418 : vector<8x256xf32>
    %421 = arith.divf %419, %420 : vector<8x256xf32>
    %422 = vector.extract_strided_slice %421 {offsets = [0, 0], sizes = [8, 128], strides = [1, 1]} : vector<8x256xf32> to vector<8x128xf32>
    %423 = vector.extract_strided_slice %421 {offsets = [0, 128], sizes = [8, 128], strides = [1, 1]} : vector<8x256xf32> to vector<8x128xf32>
    %424 = vector.extract_strided_slice %413 {offsets = [0, 256], sizes = [8, 128], strides = [1, 1]} : vector<8x384xf32> to vector<8x128xf32>
    %425 = vector.extract_strided_slice %385 {offsets = [0, 256], sizes = [8, 128], strides = [1, 1]} : vector<8x384xf32> to vector<8x128xf32>
    %426 = vector.broadcast %10 : vector<1x128xf32> to vector<8x128xf32>
    %427 = arith.addf %425, %426 : vector<8x128xf32>
    %428 = arith.mulf %422, %427 : vector<8x128xf32>
    %429 = arith.addf %424, %428 : vector<8x128xf32>
    %430 = math.tanh %429 : vector<8x128xf32>
    %cst_65 = arith.constant 1.000000e+00 : f32
    %431 = vector.broadcast %cst_65 : f32 to vector<8x128xf32>
    %432 = arith.subf %431, %423 : vector<8x128xf32>
    %433 = arith.mulf %432, %430 : vector<8x128xf32>
    %434 = arith.mulf %423, %383 : vector<8x128xf32>
    %435 = arith.addf %433, %434 : vector<8x128xf32>
    %c0_66 = arith.constant 0 : index
    %436 = memref.load %arg11[%c0_66] : memref<3xf32, #tpu.memory_space<smem>>
    %c1 = arith.constant 1 : index
    %437 = memref.load %arg11[%c1] : memref<3xf32, #tpu.memory_space<smem>>
    %c2 = arith.constant 2 : index
    %438 = memref.load %arg11[%c2] : memref<3xf32, #tpu.memory_space<smem>>
    %c0_67 = arith.constant 0 : index
    %c0_68 = arith.constant 0 : index
    %439 = vector.load %arg8[%c0_67, %c0_68] : memref<128x16xf32, #tpu.memory_space<vmem>>, vector<128x16xf32>
    %cst_69 = arith.constant dense<0.000000e+00> : vector<8x16xf32>
    %440 = tpu.matmul %435, %439, %cst_69 {dimension_numbers = #tpu.dot_dimension_numbers<[1], [0], [0], [1], [0, 0, 1, 1], [], []>} : vector<8x128xf32>, vector<128x16xf32>, vector<8x16xf32> -> vector<8x16xf32>
    %441 = arith.mulf %435, %435 : vector<8x128xf32>
    %cst_70 = arith.constant dense<0.000000e+00> : vector<8xf32>
    %442 = vector.multi_reduction <add>, %441, %cst_70 [1] : vector<8x128xf32> to vector<8xf32>
    %443 = vector.shape_cast %442 : vector<8xf32> to vector<8x1xf32>
    %c0_71 = arith.constant 0 : index
    %c0_72 = arith.constant 0 : index
    %444 = vector.load %arg9[%c0_71, %c0_72] : memref<1x16xf32, #tpu.memory_space<vmem>>, vector<1x16xf32>
    %445 = vector.broadcast %443 : vector<8x1xf32> to vector<8x16xf32>
    %446 = vector.broadcast %444 : vector<1x16xf32> to vector<8x16xf32>
    %447 = arith.addf %445, %446 : vector<8x16xf32>
    %cst_73 = arith.constant 2.000000e+00 : f32
    %448 = vector.broadcast %cst_73 : f32 to vector<8x16xf32>
    %449 = arith.mulf %448, %440 : vector<8x16xf32>
    %450 = arith.subf %447, %449 : vector<8x16xf32>
    %cst_74 = arith.constant 0.000000e+00 : f32
    %451 = vector.broadcast %cst_74 : f32 to vector<8x16xf32>
    %452 = arith.maximumf %450, %451 : vector<8x16xf32>
    %453 = math.sqrt %452 : vector<8x16xf32>
    %454 = vector.broadcast %436 : f32 to vector<8x16xf32>
    %455 = arith.mulf %453, %454 : vector<8x16xf32>
    %cst_75 = arith.constant 2.23606801 : f32
    %456 = vector.broadcast %cst_75 : f32 to vector<8x16xf32>
    %457 = arith.mulf %456, %455 : vector<8x16xf32>
    %cst_76 = arith.constant 1.000000e+00 : f32
    %458 = vector.broadcast %cst_76 : f32 to vector<8x16xf32>
    %459 = arith.addf %458, %457 : vector<8x16xf32>
    %460 = arith.mulf %455, %455 : vector<8x16xf32>
    %cst_77 = arith.constant 1.66666663 : f32
    %461 = vector.broadcast %cst_77 : f32 to vector<8x16xf32>
    %462 = arith.mulf %461, %460 : vector<8x16xf32>
    %463 = arith.addf %459, %462 : vector<8x16xf32>
    %cst_78 = arith.constant -2.23606801 : f32
    %464 = vector.broadcast %cst_78 : f32 to vector<8x16xf32>
    %465 = arith.mulf %464, %455 : vector<8x16xf32>
    %466 = math.exp %465 : vector<8x16xf32>
    %467 = arith.mulf %463, %466 : vector<8x16xf32>
    %cst_79 = arith.constant 0.000000e+00 : f32
    %468 = vector.broadcast %cst_79 : f32 to vector<8x16xf32>
    %469 = arith.subf %468, %452 : vector<8x16xf32>
    %470 = vector.broadcast %437 : f32 to vector<8x16xf32>
    %471 = arith.mulf %469, %470 : vector<8x16xf32>
    %472 = math.exp %471 : vector<8x16xf32>
    %473 = arith.addf %467, %472 : vector<8x16xf32>
    %c0_80 = arith.constant 0 : index
    %c0_81 = arith.constant 0 : index
    %474 = vector.load %arg10[%c0_80, %c0_81] : memref<1x16xf32, #tpu.memory_space<vmem>>, vector<1x16xf32>
    %475 = vector.broadcast %474 : vector<1x16xf32> to vector<8x16xf32>
    %476 = arith.mulf %473, %475 : vector<8x16xf32>
    %cst_82 = arith.constant dense<0.000000e+00> : vector<8xf32>
    %477 = vector.multi_reduction <add>, %476, %cst_82 [1] : vector<8x16xf32> to vector<8xf32>
    %478 = vector.shape_cast %477 : vector<8xf32> to vector<8x1xf32>
    %479 = vector.broadcast %438 : f32 to vector<8x1xf32>
    %480 = arith.addf %478, %479 : vector<8x1xf32>
    %481 = vector.shape_cast %480 : vector<8x1xf32> to vector<8x1xf32>
    %482 = vector.broadcast %481 : vector<8x1xf32> to vector<8x128xf32>
    %c0_83 = arith.constant 0 : index
    %c0_84 = arith.constant 0 : index
    %483 = vector.load %arg12[%c0_83, %c0_84] : memref<8x128xf32, #tpu.memory_space<vmem>>, vector<8x128xf32>
    tpu.vector_store %arg12[%c0_83, %c0_84], %482 {strides = array<i32>} : memref<8x128xf32, #tpu.memory_space<vmem>>, vector<8x128xf32>,
    return
  }
}

</mosaic_0001>

<bundles_post_ra>
// kernel: residual_model_forward.1
= control target key start
LH: loop header
LB: loop body
LE: loop exit
PB: predicated region body
PF: predicated region fallthrough
CT: control target
= control target key end

     0   :  { %17 = vsyncpa [#allocation3], 0  ;;  %s4486_s0 = inlined_call_operand.vmem [shape: f32[64,6], index: 0, kind: input, shape index: {}]   ;;  %s4487_s1 = inlined_call_operand.vmem [shape: f32[6,384], index: 1, kind: input, shape index: {}]   ;;  %s4488_s2 = inlined_call_operand.vmem [shape: f32[1,384], index: 2, kind: input, shape index: {}]   ;;  %s4489_s3 = inlined_call_operand.vmem [shape: f32[1,128], index: 3, kind: input, shape index: {}]   ;;  %s4490_s4 = inlined_call_operand.hbm [shape: bf16[128,768], index: 4, kind: input, shape index: {}]   ;;  %s4491_s5 = inlined_call_operand.vmem [shape: bf16[128,384], index: 5, kind: input, shape index: {}]   ;;  %s4492_s6 = inlined_call_operand.vmem [shape: f32[1,384], index: 6, kind: input, shape index: {}]   ;;  %s4493_s7 = inlined_call_operand.vmem [shape: f32[1,128], index: 7, kind: input, shape index: {}]   ;;  %s4494_s8 = inlined_call_operand.vmem [shape: f32[128,16], index: 8, kind: input, shape index: {}]   ;;  %s4495_s9 = inlined_call_operand.vmem [shape: f32[1,16], index: 9, kind: input, shape index: {}]   ;;  %s4496_s10 = inlined_call_operand.vmem [shape: f32[1,16], index: 10, kind: input, shape index: {}]   ;;  %s4497_s11 = inlined_call_operand.vmem [shape: f32[3], index: 11, kind: input, shape index: {}]   ;;  %s4498_s12 = inlined_call_operand.vmem [shape: f32[8,128], index: 12, kind: output, shape index: {}]  }
   0x1   :  { %s31_s23 = sshll.u32 %s4490_s4, 4  ;;  %s32_s23 = int_to_ptr.hbm [resolvable:$true] %s31_s23 }
   0x2   :  { %18 = vsyncpa [#allocation4], 0  ;;  %s3112_s24 = smov [#allocation2]   ;;  %s57_s28 = sshll.u32 %s4497_s11, 4  ;;  %s58_s28 = int_to_ptr.vmem [resolvable:$true] %s57_s28 }
   0x3   :  { %s33_s25 = sshll.u32 %s3112_s24, 4  ;;  %s3113_s29 = smov 384   ;;  %s34_s25 = int_to_ptr.vmem [resolvable:$true] %s33_s25 }
   0x4   :  { %s3114_s30 = smov 24   ;;  %s3115_s13 = smov [#allocation5]  }
   0x5   :  { %39 = dma.hbm_to_vmem [thread:$0]  %s32_s23, 6144, %s34_s25, [#allocation3], %s3113_s29, %s3113_s29, %s3114_s30  }
   0x6   :  { %60 = dma.vmem_to_smem %s58_s28, 16, %s3115_s13, [#allocation4]  }
   0x7   :  { %3108 = dma.done.wait [#allocation3], 6144  }
   0x8   :  { %3109 = vsyncadd [#allocation3], 4294961152 }
   0x9   :  { %3110 = dma.done.wait [#allocation4], 16  }
   0xa   :  { %3111 = vsyncadd [#allocation4], 4294967280 }
   0xb   :  { %69 = sfence }
   0xc   :  { %v78_v0 = vld [vmem:[%s4487_s1] sm:$0x3f]  ;;  %vm114_vm0 = vcmask 1045504   ;;  %v79_v1 = vld [vmem:[%s4487_s1 + $0x8] sm:$0x3f]  ;;  %vm89_vm1 = vcmask 48128  }
   0xd   :  { %v70_v2 = vld [vmem:[%s4486_s0] sm:$0xff]  ;;  %2473 = vmatpush.msk.msra.mxu0 %vm114_vm0, %v78_v0  ;;  %2482 = vmatpush.msk.msra.mxu1 %vm114_vm0, %v79_v1  ;;  %v80_v3 = vld [vmem:[%s4487_s1 + $0x10] sm:$0x3f]  ;;  %v2867_v5 = vld [vmem:[#allocation2 + $0x164] sm:$0xf0]  ;;  %s2376_s13 = sld [smem:[#allocation5]] }
   0xe   :  { %v2672_v4 = vld [vmem:[#allocation2 + $0x150] sm:$0xf]  ;;  %2474 = vmatmul.msk.f32.vlgmr.msra.gmra.mxu0 %vm89_vm1, %v70_v2  ;;  %2483 = vmatmul.msk.f32.vlgmr.msra.gmra.mxu1 %vm89_vm1, %v70_v2  ;;  %v2865_v6 = vld [vmem:[#allocation2 + $0x15c] sm:$0xf]  ;;  %v2682_v7 = vld [vmem:[#allocation2 + $0x170] sm:$0xf0] }
   0xf   :  { %2491 = vmatpush.msk.msra.mxu2 %vm114_vm0, %v80_v3  ;;  %v3201_v8 = vor.u32 %v2867_v5, %v2672_v4  ;;  %v3203_v9 = vor.u32 %v2865_v6, %v2682_v7  ;;  %v2648_v10 = vld [vmem:[#allocation2 + $0x120] sm:$0xf]  ;;  %v2861_v11 = vld [vmem:[#allocation2 + $0x134] sm:$0xf0]  ;;  %v2624_v16 = vld [vmem:[#allocation2 + $0xf0] sm:$0xf] }
  0x10   :  { %v2688_v12 = vld [vmem:[#allocation2 + $0x160] sm:$0xf]  ;;  %2492 = vmatmul.msk.f32.vlgmr.msra.gmra.mxu2 %vm89_vm1, %v70_v2  ;;  %v2869_v13 = vld [vmem:[#allocation2 + $0x174] sm:$0xf0]  ;;  %v3208_v14 = vor.u32 %v2861_v11, %v2648_v10  ;;  %v2855_v17 = vld [vmem:[#allocation2 + $0x104] sm:$0xf0] }
  0x11   :  { %4616 = vst [vmem:[#allocation8_spill] sm:$0xff] %v3201_v8  ;;  %622 = vmatpush.bf16.msra.mxu3 %v3201_v8  ;;  %661 = vmatpush.bf16.msrb.mxu1 %v3203_v9  ;;  %v3210_v15 = vor.u32 %v2869_v13, %v2688_v12  ;;  %v71_v18 = vld [vmem:[%s4486_s0 + $0x8] sm:$0xff]  ;;  %v3217_v19 = vor.u32 %v2855_v17, %v2624_v16  ;;  %v72_v20 = vld [vmem:[%s4486_s0 + $0x10] sm:$0xff]  ;;  %v2600_v21 = vld [vmem:[#allocation2 + $0xc0] sm:$0xf]  ;;  %s2821_s14 = sld [smem:[#allocation5 + $0x2]] }
  0x12   :  { %4617 = vst [vmem:[#allocation9_spill] sm:$0xff] %v3208_v14  ;;  %v2849_v22 = vld [vmem:[#allocation2 + $0xd4] sm:$0xf0]  ;;  %v2576_v24 = vld [vmem:[#allocation2 + $0x90] sm:$0xf]  ;;  %v74_v36 = vld [vmem:[%s4486_s0 + $0x20] sm:$0xff] }
  0x13   :  { %4618 = vst [vmem:[#allocation10_spill] sm:$0xff] %v3210_v15  ;;  %674 = vmatpush.bf16.msrb.mxu2 %v3210_v15  ;;  %v3229_v23 = vor.u32 %v2849_v22, %v2600_v21  ;;  %v2843_v25 = vld [vmem:[#allocation2 + $0xa4] sm:$0xf0]  ;;  %v73_v27 = vld [vmem:[%s4486_s0 + $0x18] sm:$0xff]  ;;  %v2552_v28 = vld [vmem:[#allocation2 + $0x60] sm:$0xf] }
  0x14   :  { %4619 = vst [vmem:[#allocation11_spill] sm:$0xff] %v3217_v19  ;;  %v3232_v26 = vor.u32 %v2843_v25, %v2576_v24  ;;  %v2837_v29 = vld [vmem:[#allocation2 + $0x74] sm:$0xf0]  ;;  %v2528_v31 = vld [vmem:[#allocation2 + $0x30] sm:$0xf]  ;;  %v75_v62 = vld [vmem:[%s4486_s0 + $0x28] sm:$0xff] }
  0x15   :  { %623 = vmatpush.bf16.msra.mxu3 %v3208_v14  ;;  %4620 = vst [vmem:[#allocation12_spill] sm:$0xff] %v3229_v23  ;;  %v3241_v30 = vor.u32 %v2837_v29, %v2552_v28  ;;  %v2831_v32 = vld [vmem:[#allocation2 + $0x44] sm:$0xf0]  ;;  %v2680_v34 = vld [vmem:[#allocation2 + $0x158] sm:$0xf] }
  0x16   :  { %2475 = vmatmul.msk.f32.gmra.mxu0 %vm89_vm1, %v71_v18  ;;  %2484 = vmatmul.msk.f32.gmra.mxu1 %vm89_vm1, %v71_v18  ;;  %4621 = vst [vmem:[#allocation13_spill] sm:$0xff] %v3232_v26  ;;  %v3244_v33 = vor.u32 %v2831_v32, %v2528_v31  ;;  %v2868_v35 = vld [vmem:[#allocation2 + $0x16c] sm:$0xf0]  ;;  %v2504_v38 = vld [vmem:[#allocation2] sm:$0xf] }
  0x17   :  { %4622 = vst [vmem:[#allocation14_spill] sm:$0xff] %v3241_v30  ;;  %v3250_v37 = vor.u32 %v2868_v35, %v2680_v34  ;;  %v2825_v39 = vld [vmem:[#allocation2 + $0x14] sm:$0xf0]  ;;  %v2864_v41 = vld [vmem:[#allocation2 + $0x154] sm:$0xf] }
  0x18   :  { %2493 = vmatmul.msk.f32.gmra.mxu2 %vm89_vm1, %v71_v18  ;;  %4623 = vst [vmem:[#allocation15_spill] sm:$0xff] %v3244_v33  ;;  %v3256_v40 = vor.u32 %v2825_v39, %v2504_v38  ;;  %v2674_v42 = vld [vmem:[#allocation2 + $0x168] sm:$0xf0]  ;;  %v2658_v44 = vld [vmem:[#allocation2 + $0x140] sm:$0xf0]  ;;  %v76_v39 = vld [vmem:[%s4486_s0 + $0x30] sm:$0xff] }
  0x19   :  { %624 = vmatpush.bf16.msra.mxu3 %v3217_v19  ;;  %4624 = vst [vmem:[#allocation16_spill] sm:$0xff] %v3250_v37  ;;  %648 = vmatpush.bf16.msrb.mxu0 %v3250_v37  ;;  %v2859_v43 = vld [vmem:[#allocation2 + $0x12c] sm:$0xf]  ;;  %v2664_v45 = vld [vmem:[#allocation2 + $0x130] sm:$0xf]  ;;  %v3258_v46 = vor.u32 %v2864_v41, %v2674_v42 }
  0x1a   :  { %4625 = vst [vmem:[#allocation17_spill] sm:$0xff] %v3256_v40  ;;  %v3260_v47 = vor.u32 %v2859_v43, %v2658_v44  ;;  %v2863_v48 = vld [vmem:[#allocation2 + $0x144] sm:$0xf0]  ;;  %v2862_v50 = vld [vmem:[#allocation2 + $0x13c] sm:$0xf0] }
  0x1b   :  { %4626 = vst [vmem:[#allocation18_spill] sm:$0xff] %v3258_v46  ;;  %v2656_v49 = vld [vmem:[#allocation2 + $0x128] sm:$0xf]  ;;  %v3263_v51 = vor.u32 %v2863_v48, %v2664_v45  ;;  %v3271_v53 = vld [vmem:[%s4488_s2] sm:$0x7]  ;;  %s2820_s2 = sld [smem:[#allocation5 + $0x1]] }
  0x1c   :  { %4627 = vst [vmem:[#allocation19_spill] sm:$0xff] %v3260_v47  ;;  %v3266_v52 = vor.u32 %v2862_v50, %v2656_v49  ;;  %662 = vmatpush.bf16.msrb.mxu1 %v3260_v47  ;;  %v2858_v54 = vld [vmem:[#allocation2 + $0x124] sm:$0xf]  ;;  %v2650_v55 = vld [vmem:[#allocation2 + $0x138] sm:$0xf0]  ;;  %v3284_v0 = vperm.slane %v3271_v53, 0 }
  0x1d   :  { %625 = vmatpush.bf16.msra.mxu3 %v3229_v23  ;;  %4628 = vst [vmem:[#allocation20_spill] sm:$0xff] %v3263_v51  ;;  %675 = vmatpush.bf16.msrb.mxu2 %v3263_v51  ;;  %v2853_v56 = vld [vmem:[#allocation2 + $0xfc] sm:$0xf]  ;;  %v2634_v57 = vld [vmem:[#allocation2 + $0x110] sm:$0xf0]  ;;  %v3276_v59 = vor.u32 %v2858_v54, %v2650_v55  ;;  %v3287_v1 = vperm.slane %v3271_v53, 1 }
  0x1e   :  { %2476 = vmatmul.msk.f32.gmra.mxu0 %vm89_vm1, %v72_v20  ;;  %2485 = vmatmul.msk.f32.gmra.mxu1 %vm89_vm1, %v72_v20  ;;  %4629 = vst [vmem:[#allocation21_spill] sm:$0xff] %v3266_v52  ;;  %v2640_v58 = vld [vmem:[#allocation2 + $0x100] sm:$0xf]  ;;  %v3278_v60 = vor.u32 %v2853_v56, %v2634_v57  ;;  %v2857_v61 = vld [vmem:[#allocation2 + $0x114] sm:$0xf0] }
  0x1f   :  { %649 = vmatpush.bf16.msrb.mxu0 %v3266_v52  ;;  %4630 = vst [vmem:[#allocation22_spill] sm:$0xff] %v3276_v59  ;;  %v2632_v63 = vld [vmem:[#allocation2 + $0xf8] sm:$0xf]  ;;  %v3289_v2 = vor.u32 %v2857_v61, %v2640_v58  ;;  %v2856_v3 = vld [vmem:[#allocation2 + $0x10c] sm:$0xf0] }
  0x20   :  { %2494 = vmatmul.msk.f32.gmra.mxu2 %vm89_vm1, %v72_v20  ;;  %4631 = vst [vmem:[#allocation23_spill] sm:$0xff] %v3278_v60  ;;  %663 = vmatpush.bf16.msrb.mxu1 %v3278_v60  ;;  %v2847_v4 = vld [vmem:[#allocation2 + $0xcc] sm:$0xf]  ;;  %v2610_v5 = vld [vmem:[#allocation2 + $0xe0] sm:$0xf0]  ;;  %v3295_v7 = vor.u32 %v2856_v3, %v2632_v63 }
  0x21   :  { %626 = vmatpush.bf16.msra.mxu3 %v3232_v26  ;;  %4632 = vst [vmem:[#allocation24_spill] sm:$0xff] %v3284_v0  ;;  %v2616_v6 = vld [vmem:[#allocation2 + $0xd0] sm:$0xf]  ;;  %676 = vmatpush.bf16.msrb.mxu2 %v3289_v2  ;;  %v3298_v10 = vor.u32 %v2847_v4, %v2610_v5  ;;  %v2851_v11 = vld [vmem:[#allocation2 + $0xe4] sm:$0xf0] }
  0x22   :  { %4633 = vst [vmem:[#allocation25_spill] sm:$0xff] %v3287_v1  ;;  %v2841_v12 = vld [vmem:[#allocation2 + $0x9c] sm:$0xf]  ;;  %v2586_v13 = vld [vmem:[#allocation2 + $0xb0] sm:$0xf0]  ;;  %v3301_v16 = vor.u32 %v2851_v11, %v2616_v6 }
  0x23   :  { %4634 = vst [vmem:[#allocation26_spill] sm:$0xff] %v3289_v2  ;;  %650 = vmatpush.bf16.msrb.mxu0 %v3295_v7  ;;  %v2592_v17 = vld [vmem:[#allocation2 + $0xa0] sm:$0xf]  ;;  %v2845_v18 = vld [vmem:[#allocation2 + $0xb4] sm:$0xf0]  ;;  %v3305_v25 = vor.u32 %v2841_v12, %v2586_v13 }
  0x24   :  { %4635 = vst [vmem:[#allocation27_spill] sm:$0xff] %v3295_v7  ;;  %v2852_v20 = vld [vmem:[#allocation2 + $0xf4] sm:$0xf]  ;;  %v2626_v21 = vld [vmem:[#allocation2 + $0x108] sm:$0xf0]  ;;  %664 = vmatpush.bf16.msrb.mxu1 %v3298_v10  ;;  %v3312_v31 = vor.u32 %v2845_v18, %v2592_v17  ;;  %v77_v17 = vld [vmem:[%s4486_s0 + $0x38] sm:$0xff] }
  0x25   :  { %627 = vmatpush.bf16.msra.mxu3 %v3241_v30  ;;  %4636 = vst [vmem:[#allocation28_spill] sm:$0xff] %v3298_v10  ;;  %v2608_v22 = vld [vmem:[#allocation2 + $0xc8] sm:$0xf]  ;;  %v2850_v24 = vld [vmem:[#allocation2 + $0xdc] sm:$0xf0]  ;;  %677 = vmatpush.bf16.msrb.mxu2 %v3301_v16 }
  0x26   :  { %2477 = vmatmul.msk.f32.gmra.mxu0 %vm89_vm1, %v73_v27  ;;  %2486 = vmatmul.msk.f32.gmra.mxu1 %vm89_vm1, %v73_v27  ;;  %4637 = vst [vmem:[#allocation29_spill] sm:$0xff] %v3301_v16  ;;  %v3309_v28 = vor.u32 %v2850_v24, %v2608_v22  ;;  %v2846_v29 = vld [vmem:[#allocation2 + $0xc4] sm:$0xf]  ;;  %v2602_v32 = vld [vmem:[#allocation2 + $0xd8] sm:$0xf0] }
  0x27   :  { %4638 = vst [vmem:[#allocation30_spill] sm:$0xff] %v3305_v25  ;;  %v2584_v34 = vld [vmem:[#allocation2 + $0x98] sm:$0xf]  ;;  %v2844_v35 = vld [vmem:[#allocation2 + $0xac] sm:$0xf0]  ;;  %v3319_v41 = vor.u32 %v2846_v29, %v2602_v32 }
  0x28   :  { %2495 = vmatmul.msk.f32.gmra.mxu2 %vm89_vm1, %v73_v27  ;;  %v3307_v27 = vor.u32 %v2852_v20, %v2626_v21  ;;  %4640 = vst [vmem:[#allocation32_spill] sm:$0xff] %v3309_v28  ;;  %651 = vmatpush.bf16.msrb.mxu0 %v3309_v28  ;;  %v3321_v42 = vor.u32 %v2844_v35, %v2584_v34  ;;  %v2840_v45 = vld [vmem:[#allocation2 + $0x94] sm:$0xf]  ;;  %v2578_v48 = vld [vmem:[#allocation2 + $0xa8] sm:$0xf0] }
  0x29   :  { %628 = vmatpush.bf16.msra.mxu3 %v3244_v33  ;;  %4641 = vst [vmem:[#allocation33_spill] sm:$0xff] %v3312_v31  ;;  %665 = vmatpush.bf16.msrb.mxu1 %v3305_v25  ;;  %v2835_v54 = vld [vmem:[#allocation2 + $0x6c] sm:$0xf]  ;;  %v2562_v55 = vld [vmem:[#allocation2 + $0x80] sm:$0xf0]  ;;  %v3332_v58 = vor.u32 %v2840_v45, %v2578_v48 }
  0x2a   :  { %4639 = vst [vmem:[#allocation31_spill] sm:$0xff] %v3307_v27  ;;  %678 = vmatpush.bf16.msrb.mxu2 %v3312_v31  ;;  %v2568_v56 = vld [vmem:[#allocation2 + $0x70] sm:$0xf]  ;;  %v2839_v57 = vld [vmem:[#allocation2 + $0x84] sm:$0xf0]  ;;  %v3334_v61 = vor.u32 %v2835_v54, %v2562_v55 }
  0x2b   :  { %4642 = vst [vmem:[#allocation34_spill] sm:$0xff] %v3319_v41  ;;  %v2560_v63 = vld [vmem:[#allocation2 + $0x68] sm:$0xf]  ;;  %v2838_v3 = vld [vmem:[#allocation2 + $0x7c] sm:$0xf0] }
  0x2c   :  { %4643 = vst [vmem:[#allocation35_spill] sm:$0xff] %v3321_v42  ;;  %652 = vmatpush.bf16.msrb.mxu0 %v3321_v42  ;;  %v3338_v4 = vor.u32 %v2838_v3, %v2560_v63  ;;  %v2834_v5 = vld [vmem:[#allocation2 + $0x64] sm:$0xf]  ;;  %v2554_v6 = vld [vmem:[#allocation2 + $0x78] sm:$0xf0] }
  0x2d   :  { %629 = vmatpush.bf16.msra.mxu3 %v3256_v40  ;;  %4644 = vst [vmem:[#allocation36_spill] sm:$0xff] %v3332_v58  ;;  %666 = vmatpush.bf16.msrb.mxu1 %v3334_v61  ;;  %v2829_v11 = vld [vmem:[#allocation2 + $0x3c] sm:$0xf]  ;;  %v2538_v12 = vld [vmem:[#allocation2 + $0x50] sm:$0xf0]  ;;  %v3347_v18 = vor.u32 %v2834_v5, %v2554_v6 }
  0x2e   :  { %2478 = vmatmul.msk.f32.gmra.mxu0 %vm89_vm1, %v74_v36  ;;  %2487 = vmatmul.msk.f32.gmra.mxu1 %vm89_vm1, %v74_v36  ;;  %4645 = vst [vmem:[#allocation37_spill] sm:$0xff] %v3334_v61  ;;  %v2536_v13 = vld [vmem:[#allocation2 + $0x38] sm:$0xf]  ;;  %v3349_v20 = vor.u32 %v2829_v11, %v2538_v12  ;;  %v2832_v21 = vld [vmem:[#allocation2 + $0x4c] sm:$0xf0] }
  0x2f   :  { %4647 = vst [vmem:[#allocation39_spill] sm:$0xff] %v3338_v4  ;;  %v2544_v22 = vld [vmem:[#allocation2 + $0x40] sm:$0xf]  ;;  %v3353_v24 = vor.u32 %v2832_v21, %v2536_v13  ;;  %v2833_v29 = vld [vmem:[#allocation2 + $0x54] sm:$0xf0] }
  0x30   :  { %2496 = vmatmul.msk.f32.gmra.mxu2 %vm89_vm1, %v74_v36  ;;  %653 = vmatpush.bf16.msrb.mxu0 %v3338_v4  ;;  %4648 = vst [vmem:[#allocation40_spill] sm:$0xff] %v3347_v18  ;;  %v3356_v32 = vor.u32 %v2833_v29, %v2544_v22  ;;  %v2828_v34 = vld [vmem:[#allocation2 + $0x34] sm:$0xf]  ;;  %v2530_v35 = vld [vmem:[#allocation2 + $0x48] sm:$0xf0] }
  0x31   :  { %635 = vmatpush.bf16.msrb.mxu3 %v3258_v46  ;;  %4649 = vst [vmem:[#allocation41_spill] sm:$0xff] %v3349_v20  ;;  %667 = vmatpush.bf16.msrb.mxu1 %v3349_v20  ;;  %v3361_v48 = vor.u32 %v2828_v34, %v2530_v35  ;;  %v2822_v63 = vld [vmem:[#allocation2 + $0x4] sm:$0xf]  ;;  %v2506_v3 = vld [vmem:[#allocation2 + $0x18] sm:$0xf0]  ;;  %v3378_v34 = vperm.slane %v3271_v53, 2 }
  0x32   :  { %4650 = vst [vmem:[#allocation42_spill] sm:$0xff] %v3353_v24  ;;  %v3373_v6 = vor.u32 %v2822_v63, %v2506_v3 }
  0x33   :  { %4651 = vst [vmem:[#allocation43_spill] sm:$0xff] %v3356_v32 }
  0x34   :  { %654 = vmatpush.bf16.msrb.mxu0 %v3353_v24  ;;  %4652 = vst [vmem:[#allocation44_spill] sm:$0xff] %v3361_v48 }
  0x35   :  { %636 = vmatpush.bf16.msrb.mxu3 %v3276_v59  ;;  %4656 = vst [vmem:[#allocation48_spill] sm:$0xff] %v3373_v6 }
  0x36   :  { %2479 = vmatmul.msk.f32.gmra.mxu0 %vm89_vm1, %v75_v62  ;;  %2488 = vmatmul.msk.f32.gmra.mxu1 %vm89_vm1, %v75_v62  ;;  %4657 = vst [vmem:[#allocation49_spill] sm:$0xff] %v3378_v34 }
  0x38   :  { %2497 = vmatmul.msk.f32.gmra.mxu2 %vm89_vm1, %v75_v62  ;;  %v3336_v62 = vor.u32 %v2839_v57, %v2568_v56  ;;  %v2520_v56 = vld [vmem:[#allocation2 + $0x10] sm:$0xf]  ;;  %v2827_v57 = vld [vmem:[#allocation2 + $0x24] sm:$0xf0] }
  0x39   :  { %637 = vmatpush.bf16.msrb.mxu3 %v3307_v27  ;;  %v3371_v5 = vor.u32 %v2827_v57, %v2520_v56 }
  0x3a   :  { %4646 = vst [vmem:[#allocation38_spill] sm:$0xff] %v3336_v62  ;;  %679 = vmatpush.bf16.msrb.mxu2 %v3336_v62 }
  0x3b   :  { %4655 = vst [vmem:[#allocation47_spill] sm:$0xff] %v3371_v5 }
  0x3d   :  { %638 = vmatpush.bf16.msrb.mxu3 %v3319_v41 }
  0x3e   :  { %2480 = vmatmul.msk.f32.gmra.mxu0 %vm89_vm1, %v76_v39  ;;  %2489 = vmatmul.msk.f32.gmra.mxu1 %vm89_vm1, %v76_v39 }
  0x3f   :  { %680 = vmatpush.bf16.msrb.mxu2 %v3356_v32 }
  0x40   :  { %2498 = vmatmul.msk.f32.gmra.mxu2 %vm89_vm1, %v76_v39  ;;  %v2826_v39 = vld [vmem:[#allocation2 + $0x1c] sm:$0xf0] }
  0x41   :  { %639 = vmatpush.bf16.msrb.mxu3 %v3332_v58 }
  0x43   :  { %681 = vmatpush.bf16.msrb.mxu2 %v3371_v5 }
  0x45   :  { %640 = vmatpush.bf16.msrb.mxu3 %v3347_v18 }
  0x46   :  { %2481 = vmatmul.msk.f32.gmra.mxu0 %vm89_vm1, %v77_v17  ;;  %2490 = vmatmul.msk.f32.gmra.mxu1 %vm89_vm1, %v77_v17 }
  0x48   :  { %2499 = vmatmul.msk.f32.gmra.mxu2 %vm89_vm1, %v77_v17 }
  0x49   :  { %641 = vmatpush.bf16.msrb.mxu3 %v3361_v48 }
  0x4d   :  { %642 = vmatpush.bf16.msrb.mxu3 %v3373_v6 }
  0x8b   :  { %v141_v36 = vpop.f32.mrf.mxu0  ;;  %v182_v38 = vpop.f32.mrf.mxu1 }
  0x8c   :  { %v142_v43 = vadd.f32 %v141_v36, %v3284_v0  ;;  %v183_v44 = vadd.f32 %v182_v38, %v3287_v1  ;;  %v2512_v38 = vld [vmem:[#allocation2 + $0x8] sm:$0xf] }
  0x8e   :  { %v2500_v49 = vmul.f32 -1.442695, %v142_v43  ;;  %v2501_v50 = vmul.f32 -1.442695, %v183_v44  ;;  %v2823_v43 = vld [vmem:[#allocation2 + $0xc] sm:$0xf] }
  0x90   :  { %2902 = vpow2.f32 %v2500_v49  ;;  %v3363_v49 = vor.u32 %v2826_v39, %v2512_v38 }
  0x91   :  { %2904 = vpow2.f32 %v2501_v50  ;;  %v2514_v50 = vld [vmem:[#allocation2 + $0x20] sm:$0xf0] }
  0x92   :  { %4653 = vst [vmem:[#allocation45_spill] sm:$0xff] %v3363_v49  ;;  %v3366_v55 = vor.u32 %v2823_v43, %v2514_v50  ;;  %655 = vmatpush.bf16.msrb.mxu0 %v3363_v49 }
  0x93   :  { %v223_v39 = vpop.f32.mrf.mxu2 }
  0x94   :  { %4654 = vst [vmem:[#allocation46_spill] sm:$0xff] %v3366_v55  ;;  %668 = vmatpush.bf16.msrb.mxu1 %v3366_v55  ;;  %v224_v56 = vadd.f32 %v223_v39, %v3378_v34 }
  0x96   :  { %v2903_v36 = vpop.eup %2902 }
  0x97   :  { %v2905_v44 = vpop.eup %2904  ;;  %v338_v45 = vadd.f32 1.0, %v2903_v36 }
  0x98   :  { %v339_v54 = vadd.f32 1.0, %v2905_v44  ;;  %v3383_v44 = vld [vmem:[%s4489_s3] ss:$0 sm:$0xff] }
  0x99   :  { %2906 = vrcp.f32 %v338_v45  ;;  %v351_v29 = vand.u32 2147483648, %v338_v45  ;;  %v349_v36 = vand.u32 2147483647, %v338_v45  ;;  %vm345_vm3 = vweird.f32 %v338_v45 }
  0x9a   :  { %2908 = vrcp.f32 %v339_v54  ;;  %vm360_vm6 = vweird.f32 %v339_v54  ;;  %v366_v3 = vand.u32 2147483648, %v339_v54 }
  0x9b   :  { %v352_v50 = vor.u32 1.1754944e-38, %v351_v29  ;;  %vm350_vm5 = vcmp.eq.f32.partialorder %v349_v36, 8.507059e+37  ;;  %v2866_v36 = vld [vmem:[#allocation2 + $0x164] sm:$0xf] }
  0x9f   :  { %v2907_v11 = vpop.eup %2906 }
  0xa0   :  { %v2909_v12 = vpop.eup %2908  ;;  %v341_v13 = vmul.f32 %v2907_v11, %v338_v45  ;;  %vm346_vm2 = vweird.f32 %v2907_v11 }
  0xa1   :  { %v356_v17 = vmul.f32 %v2909_v12, %v339_v54  ;;  %vm347_vm4 = vmor %vm345_vm3, %vm346_vm2  ;;  %vm361_vm7 = vweird.f32 %v2909_v12 }
  0xa2   :  { %v342_v21 = vsub.f32 1.0, %v341_v13  ;;  %vm362_vm8 = vmor %vm360_vm6, %vm361_vm7 }
  0xa3   :  { %v357_v22 = vsub.f32 1.0, %v356_v17  ;;  %v364_v17 = vand.u32 2147483647, %v339_v54  ;;  %v2860_v54 = vld [vmem:[#allocation2 + $0x134] sm:$0xf] }
  0xa4   :  { %v343_v35 = vmul.f32 %v2907_v11, %v342_v21 }
  0xa5   :  { %v358_v38 = vmul.f32 %v2909_v12, %v357_v22  ;;  %v367_v22 = vor.u32 1.1754944e-38, %v366_v3  ;;  %vm365_vm9 = vcmp.eq.f32.partialorder %v364_v17, 8.507059e+37  ;;  %v2618_v3 = vld [vmem:[#allocation2 + $0xe8] sm:$0xf0]  ;;  %v2842_v17 = vld [vmem:[#allocation2 + $0xa4] sm:$0xf] }
  0xa6   :  { %v344_v43 = vadd.f32 %v2907_v11, %v343_v35 }
  0xa7   :  { %v359_v63 = vadd.f32 %v2909_v12, %v358_v38 }
  0xa8   :  { %v348_v57 = vsel %vm347_vm4, %v2907_v11, %v344_v43  ;;  %v2690_v43 = vld [vmem:[#allocation2 + $0x178] sm:$0xf0] }
  0xa9   :  { %v353_v53 = vsel %vm350_vm5, %v352_v50, %v348_v57  ;;  %v363_v21 = vsel %vm362_vm8, %v2909_v12, %v359_v63  ;;  %v3391_v50 = vor.u32 %v2866_v36, %v2690_v43  ;;  %v2642_v57 = vld [vmem:[#allocation2 + $0x118] sm:$0xf0]  ;;  %v2848_v63 = vld [vmem:[#allocation2 + $0xd4] sm:$0xf] }
  0xaa   :  { %v374_v13 = vmul.f32 %v3383_v44, %v353_v53  ;;  %v368_v35 = vsel %vm365_vm9, %v367_v22, %v363_v21  ;;  %v2836_v22 = vld [vmem:[#allocation2 + $0x74] sm:$0xf] }
  0xab   :  { %v377_v29 = vsub.f32 1.0, %v368_v35  ;;  %v379_v11 = vmul.f32 0.0, %v368_v35  ;;  %v2570_v35 = vld [vmem:[#allocation2 + $0x88] sm:$0xf0]  ;;  %v2824_v43 = vld [vmem:[#allocation2 + $0x14] sm:$0xf] }
  0xac   :  { %v375_v45 = vadd.f32 %v374_v13, %v224_v56  ;;  %v2666_v56 = vld [vmem:[#allocation2 + $0x148] sm:$0xf0]  ;;  %v3400_v13 = vor.u32 %v2848_v63, %v2618_v3  ;;  %v2782_v63 = vld [vmem:[%s4491_s5 + $0xa8] sm:$0xf]  ;;  %v2892_v3 = vld [vmem:[%s4491_s5 + $0xb0] sm:$0xf0] }
  0xad   :  { %v3394_v12 = vor.u32 %v2860_v54, %v2666_v56  ;;  %v2522_v54 = vld [vmem:[#allocation2 + $0x28] sm:$0xf0] }
  0xae   :  { %2910 = vtanh.f32 %v375_v45  ;;  %v2594_v45 = vld [vmem:[#allocation2 + $0xb8] sm:$0xf0]  ;;  %v3412_v56 = vor.u32 %v2824_v43, %v2522_v54 }
  0xaf   :  { %v3403_v21 = vor.u32 %v2842_v17, %v2594_v45  ;;  %v3436_v17 = vor.u32 %v2892_v3, %v2782_v63 }
  0xb0   :  { %4659 = vst [vmem:[#allocation51_spill] sm:$0xff] %v3412_v56 }
  0xb1   :  { %890 = vmatpush.bf16.msra.mxu0 %v3436_v17 }
  0xb4   :  { %v2911_v55 = vpop.eup %2910 }
  0xb5   :  { %v378_v39 = vmul.f32 %v2911_v55, %v377_v29  ;;  %v2854_v55 = vld [vmem:[#allocation2 + $0x104] sm:$0xf]  ;;  %v3406_v29 = vor.u32 %v2836_v22, %v2570_v35 }
  0xb6   :  { %v3397_v53 = vor.u32 %v2854_v55, %v2642_v57  ;;  %v3421_v55 = vpop.f32.mrf.mxu0  ;;  %v3424_v57 = vpop.f32.mrf.mxu1 }
  0xb7   :  { %v3387_v34 = vadd.f32 %v379_v11, %v378_v39  ;;  %v2830_v39 = vld [vmem:[#allocation2 + $0x44] sm:$0xf]  ;;  %v2546_v11 = vld [vmem:[#allocation2 + $0x58] sm:$0xf0] }
  0xb8   :  { %v3409_v36 = vor.u32 %v2830_v39, %v2546_v11 }
  0xb9   :  { %v381_v38 = vpack.c.bf16 %v3387_v34, %v3387_v34 }
  0xba   :  { %4658 = vst [vmem:[#allocation50_spill] sm:$0xff] %v3409_v36 }
  0xbb   :  { %630 = vmatmul.bf16.vlgmr.msra.gmra.mxu3 %v381_v38  ;;  %656 = vmatmul.bf16.vlgmr.msrb.gmra.mxu0 %v381_v38 }
  0xbc   :  { %669 = vmatmul.bf16.vlgmr.msrb.gmra.mxu1 %v381_v38  ;;  %682 = vmatmul.bf16.vlgmr.msrb.gmra.mxu2 %v381_v38 }
  0xbd   :  { %687 = vmatpush.bf16.msra.mxu3 %v3391_v50 }
  0xbe   :  { %v3439_v45 = vpop.f32.mrf.mxu0  ;;  %v3442_v22 = vpop.f32.mrf.mxu1 }
  0xbf   :  { %4660 = vst [vmem:[#allocation52_spill] sm:$0xff] %v3439_v45 }
  0xc0   :  { %4661 = vst [vmem:[#allocation53_spill] sm:$0xff] %v3442_v22 }
  0xc1   :  { %688 = vmatpush.bf16.msra.mxu3 %v3394_v12 }
  0xc5   :  { %689 = vmatpush.bf16.msra.mxu3 %v3397_v53 }
  0xc6   :  { %v3448_v39 = vpop.f32.mrf.mxu0  ;;  %v3450_v11 = vpop.f32.mrf.mxu1 }
  0xc7   :  { %4663 = vst [vmem:[#allocation55_spill] sm:$0xff] %v3448_v39  ;;  %v2889_v39 = vld [vmem:[%s4491_s5 + $0x98] sm:$0xf0] }
  0xc8   :  { %4664 = vst [vmem:[#allocation56_spill] sm:$0xff] %v3450_v11  ;;  %v2770_v11 = vld [vmem:[%s4491_s5 + $0x90] sm:$0xf] }
  0xc9   :  { %690 = vmatpush.bf16.msra.mxu3 %v3400_v13 }
  0xcb   :  { %643 = vmatmul.bf16.vlgmr.msrb.gmra.mxu3 %v381_v38 }
  0xcd   :  { %691 = vmatpush.bf16.msra.mxu3 %v3403_v21 }
  0xce   :  { %v3457_v54 = vpop.f32.mrf.mxu0  ;;  %v3459_v63 = vpop.f32.mrf.mxu1 }
  0xcf   :  { %4666 = vst [vmem:[#allocation58_spill] sm:$0xff] %v3457_v54 }
  0xd0   :  { %4667 = vst [vmem:[#allocation59_spill] sm:$0xff] %v3459_v63  ;;  %v2886_v63 = vld [vmem:[%s4491_s5 + $0x80] sm:$0xf0] }
  0xd1   :  { %692 = vmatpush.bf16.msra.mxu3 %v3406_v29 }
  0xd5   :  { %693 = vmatpush.bf16.msra.mxu3 %v3409_v36 }
  0xd6   :  { %v3474_v22 = vpop.f32.mrf.mxu1 }
  0xd7   :  { %4670 = vst [vmem:[#allocation62_spill] sm:$0xff] %v3474_v22 }
  0xd9   :  { %694 = vmatpush.bf16.msra.mxu3 %v3412_v56 }
  0xdc   :  { %695 = vmatmul.bf16.vlgmr.msra.gmra.mxu3 %v381_v38  ;;  %v3428_v38 = vpop.f32.mrf.mxu2 }
  0xdd   :  { %978 = vmatpush.bf16.msrb.mxu3 %v3201_v8 }
  0xe1   :  { %979 = vmatpush.bf16.msrb.mxu3 %v3208_v14 }
  0xe4   :  { %v3445_v35 = vpop.f32.mrf.mxu2 }
  0xe5   :  { %980 = vmatpush.bf16.msrb.mxu3 %v3217_v19  ;;  %4662 = vst [vmem:[#allocation54_spill] sm:$0xff] %v3445_v35  ;;  %v3470_v35 = vpop.f32.mrf.mxu0  ;;  %v2881_v19 = vld [vmem:[%s4491_s5 + $0x58] sm:$0xf0] }
  0xe6   :  { %4669 = vst [vmem:[#allocation61_spill] sm:$0xff] %v3470_v35  ;;  %v2891_v35 = vld [vmem:[%s4491_s5 + $0xac] sm:$0xf] }
  0xe9   :  { %981 = vmatpush.bf16.msrb.mxu3 %v3229_v23 }
  0xec   :  { %v3454_v43 = vpop.f32.mrf.mxu2 }
  0xed   :  { %982 = vmatpush.bf16.msrb.mxu3 %v3232_v26  ;;  %4665 = vst [vmem:[#allocation57_spill] sm:$0xff] %v3454_v43  ;;  %v3472_v43 = vor.u32 %v2889_v39, %v2770_v11  ;;  %v2746_v39 = vld [vmem:[%s4491_s5 + $0x60] sm:$0xf]  ;;  %v2883_v11 = vld [vmem:[%s4491_s5 + $0x68] sm:$0xf0] }
  0xee   :  { %v3494_v22 = vor.u32 %v2883_v11, %v2746_v39  ;;  %v3510_v39 = vpop.f32.mrf.mxu0  ;;  %v2742_v26 = vld [vmem:[%s4491_s5 + $0x50] sm:$0xf] }
  0xef   :  { %891 = vmatpush.bf16.msra.mxu0 %v3472_v43  ;;  %4672 = vst [vmem:[#allocation64_spill] sm:$0xff] %v3510_v39 }
  0xf1   :  { %983 = vmatpush.bf16.msrb.mxu3 %v3241_v30 }
  0xf4   :  { %v3462_v3 = vpop.f32.mrf.mxu2 }
  0xf5   :  { %984 = vmatpush.bf16.msrb.mxu3 %v3244_v33  ;;  %4668 = vst [vmem:[#allocation60_spill] sm:$0xff] %v3462_v3  ;;  %v2758_v3 = vld [vmem:[%s4491_s5 + $0x78] sm:$0xf] }
  0xf6   :  { %v3483_v54 = vor.u32 %v2886_v63, %v2758_v3  ;;  %v2784_v63 = vld [vmem:[%s4491_s5 + $0xb4] sm:$0xf0]  ;;  %v2790_v3 = vld [vmem:[%s4491_s5 + $0xb0] sm:$0xf] }
  0xf8   :  { %892 = vmatpush.bf16.msra.mxu0 %v3483_v54 }
  0xf9   :  { %985 = vmatpush.bf16.msrb.mxu3 %v3256_v40  ;;  %v2754_v40 = vld [vmem:[%s4491_s5 + $0x68] sm:$0xf] }
  0xfc   :  { %v3486_v45 = vpop.f32.mrf.mxu2  ;;  %893 = vmatpush.bf16.msra.mxu0 %v3494_v22 }
  0xfd   :  { %1030 = vmatpush.bf16.msra.mxu3 %v3210_v15  ;;  %4671 = vst [vmem:[#allocation63_spill] sm:$0xff] %v3486_v45  ;;  %v3505_v45 = vor.u32 %v2891_v35, %v2784_v63  ;;  %v2880_v35 = vld [vmem:[%s4491_s5 + $0x50] sm:$0xf0]  ;;  %v2710_v15 = vld [vmem:[%s4491_s5 + $0x18] sm:$0xf] }
  0xff   :  { %903 = vmatpush.bf16.msra.mxu1 %v3505_v45 }
 0x101   :  { %1031 = vmatpush.bf16.msra.mxu3 %v3263_v51 }
 0x105   :  { %1032 = vmatpush.bf16.msra.mxu3 %v3289_v2  ;;  %v3563_v2 = vpop.f32.mrf.mxu2 }
 0x106   :  { %4674 = vst [vmem:[#allocation66_spill] sm:$0xff] %v3563_v2  ;;  %v2874_v2 = vld [vmem:[%s4491_s5 + $0x20] sm:$0xf0] }
 0x109   :  { %1033 = vmatpush.bf16.msra.mxu3 %v3301_v16  ;;  %v2877_v16 = vld [vmem:[%s4491_s5 + $0x38] sm:$0xf0] }
 0x10d   :  { %1034 = vmatpush.bf16.msra.mxu3 %v3312_v31  ;;  %v2890_v31 = vld [vmem:[%s4491_s5 + $0xa0] sm:$0xf0] }
 0x111   :  { %1035 = vmatpush.bf16.msra.mxu3 %v3336_v62  ;;  %v2734_v62 = vld [vmem:[%s4491_s5 + $0x48] sm:$0xf] }
 0x112   :  { %v3525_v63 = vor.u32 %v2880_v35, %v2734_v62  ;;  %v2722_v35 = vld [vmem:[%s4491_s5 + $0x30] sm:$0xf] }
 0x114   :  { %894 = vmatpush.bf16.msra.mxu0 %v3525_v63 }
 0x115   :  { %1036 = vmatpush.bf16.msra.mxu3 %v3356_v32  ;;  %v3515_v32 = vpop.f32.mrf.mxu1 }
 0x116   :  { %4673 = vst [vmem:[#allocation65_spill] sm:$0xff] %v3515_v32  ;;  %v2778_v32 = vld [vmem:[%s4491_s5 + $0x98] sm:$0xf] }
 0x117   :  { %v3542_v62 = vor.u32 %v2890_v31, %v2778_v32  ;;  %v2760_v31 = vld [vmem:[%s4491_s5 + $0x84] sm:$0xf0]  ;;  %v2766_v32 = vld [vmem:[%s4491_s5 + $0x80] sm:$0xf] }
 0x119   :  { %1037 = vmatpush.bf16.msra.mxu3 %v3371_v5  ;;  %v2893_v5 = vld [vmem:[%s4491_s5 + $0xb8] sm:$0xf0] }
 0x11a   :  { %v3513_v11 = vor.u32 %v2893_v5, %v2790_v3  ;;  %v2888_v5 = vld [vmem:[%s4491_s5 + $0x94] sm:$0xf]  ;;  %v2772_v3 = vld [vmem:[%s4491_s5 + $0x9c] sm:$0xf0] }
 0x11b   :  { %v3536_v39 = vor.u32 %v2888_v5, %v2772_v3  ;;  %v3552_v5 = vor.u32 %v2877_v16, %v2722_v35  ;;  %v2885_v3 = vld [vmem:[%s4491_s5 + $0x7c] sm:$0xf]  ;;  %v2887_v16 = vld [vmem:[%s4491_s5 + $0x88] sm:$0xf0] }
 0x11c   :  { %916 = vmatpush.bf16.msra.mxu2 %v3513_v11  ;;  %v3565_v51 = vor.u32 %v2885_v3, %v2760_v31  ;;  %v3571_v35 = vor.u32 %v2887_v16, %v2766_v32  ;;  %v3580_v3 = vpop.f32.mrf.mxu0  ;;  %v3583_v31 = vor.u32 %v2874_v2, %v2710_v15  ;;  %v2882_v32 = vld [vmem:[%s4491_s5 + $0x64] sm:$0xf]  ;;  %v2748_v16 = vld [vmem:[%s4491_s5 + $0x6c] sm:$0xf0]  ;;  %v2884_v15 = vld [vmem:[%s4491_s5 + $0x70] sm:$0xf0] }
 0x11d   :  { %904 = vmatpush.bf16.msra.mxu1 %v3536_v39  ;;  %895 = vmatpush.bf16.msra.mxu0 %v3552_v5  ;;  %4675 = vst [vmem:[#allocation67_spill] sm:$0xff] %v3580_v3  ;;  %v3594_v33 = vpop.f32.mrf.mxu1  ;;  %v3596_v30 = vor.u32 %v2882_v32, %v2748_v16  ;;  %v3602_v2 = vor.u32 %v2884_v15, %v2754_v40  ;;  %v3607_v3 = vld [vmem:[%s4492_s6] sm:$0x7]  ;;  %v2871_v16 = vld [vmem:[%s4491_s5 + $0x8] sm:$0xf0] }
 0x11e   :  { %4676 = vst [vmem:[#allocation68_spill] sm:$0xff] %v3583_v31  ;;  %v2698_v32 = vld [vmem:[%s4491_s5] sm:$0xf]  ;;  %v2879_v40 = vld [vmem:[%s4491_s5 + $0x4c] sm:$0xf]  ;;  %v3639_v14 = vperm.slane %v3607_v3, 0 }
 0x11f   :  { %4677 = vst [vmem:[#allocation69_spill] sm:$0xff] %v3594_v33  ;;  %v3617_v33 = vor.u32 %v2871_v16, %v2698_v32  ;;  %v2736_v15 = vld [vmem:[%s4491_s5 + $0x54] sm:$0xf0]  ;;  %v3634_v32 = vor.u32 %v2881_v19, %v2742_v26  ;;  %v3636_v16 = vpop.f32.mrf.mxu2  ;;  %v2724_v19 = vld [vmem:[%s4491_s5 + $0x3c] sm:$0xf0] }
 0x120   :  { %917 = vmatpush.bf16.msra.mxu2 %v3542_v62  ;;  %v3628_v23 = vor.u32 %v2879_v40, %v2736_v15  ;;  %4679 = vst [vmem:[#allocation71_spill] sm:$0xff] %v3636_v16  ;;  %v2876_v40 = vld [vmem:[%s4491_s5 + $0x34] sm:$0xf]  ;;  %v2730_v26 = vld [vmem:[%s4491_s5 + $0x38] sm:$0xf] }
 0x121   :  { %905 = vmatpush.bf16.msra.mxu1 %v3565_v51  ;;  %896 = vmatpush.bf16.msra.mxu0 %v3583_v31  ;;  %4678 = vst [vmem:[#allocation70_spill] sm:$0xff] %v3617_v33  ;;  %v3653_v15 = vor.u32 %v2876_v40, %v2724_v19  ;;  %v2878_v16 = vld [vmem:[%s4491_s5 + $0x40] sm:$0xf0]  ;;  %v2873_v40 = vld [vmem:[%s4491_s5 + $0x1c] sm:$0xf]  ;;  %v145_v31 = vadd.f32 %v3421_v55, %v3284_v0 }
 0x122   :  { %4680 = vst [vmem:[#allocation72_spill] sm:$0xff] %v3639_v14  ;;  %v2712_v19 = vld [vmem:[%s4491_s5 + $0x24] sm:$0xf0] }
 0x123   :  { %v2706_v55 = vld [vmem:[%s4491_s5 + $0x8] sm:$0xf] }
 0x124   :  { %918 = vmatpush.bf16.msra.mxu2 %v3571_v35 }
 0x125   :  { %906 = vmatpush.bf16.msra.mxu1 %v3596_v30  ;;  %897 = vmatpush.bf16.msra.mxu0 %v3617_v33  ;;  %v3660_v33 = vor.u32 %v2878_v16, %v2730_v26  ;;  %v2718_v16 = vld [vmem:[%s4491_s5 + $0x20] sm:$0xf]  ;;  %v3675_v26 = vor.u32 %v2873_v40, %v2712_v19 }
 0x127   :  { %4681 = vst [vmem:[#allocation73_spill] sm:$0xff] %v3660_v33 }
 0x128   :  { %919 = vmatpush.bf16.msra.mxu2 %v3602_v2  ;;  %4682 = vst [vmem:[#allocation74_spill] sm:$0xff] %v3675_v26 }
 0x129   :  { %907 = vmatpush.bf16.msra.mxu1 %v3628_v23  ;;  %991 = vmatpush.bf16.msrb.mxu0 %v3258_v46 }
 0x12c   :  { %920 = vmatpush.bf16.msra.mxu2 %v3634_v32 }
 0x12d   :  { %908 = vmatpush.bf16.msra.mxu1 %v3653_v15  ;;  %992 = vmatpush.bf16.msrb.mxu0 %v3276_v59  ;;  %v3681_v59 = vperm.slane %v3607_v3, 1 }
 0x12f   :  { %4683 = vst [vmem:[#allocation75_spill] sm:$0xff] %v3681_v59 }
 0x130   :  { %921 = vmatpush.bf16.msra.mxu2 %v3660_v33 }
 0x131   :  { %909 = vmatpush.bf16.msra.mxu1 %v3675_v26  ;;  %993 = vmatpush.bf16.msrb.mxu0 %v3307_v27 }
 0x135   :  { %994 = vmatpush.bf16.msrb.mxu0 %v3319_v41 }
 0x138   :  { %v3658_v46 = vpop.f32.mrf.mxu0 }
 0x139   :  { %v670_v8 = vpop.f32.mrf.mxu1  ;;  %995 = vmatpush.bf16.msrb.mxu0 %v3332_v58 }
 0x13a   :  { %v707_v56 = vadd.f32 %v3639_v14, %v670_v8  ;;  %v2875_v8 = vld [vmem:[%s4491_s5 + $0x28] sm:$0xf0] }
 0x13b   :  { %v3683_v33 = vor.u32 %v2875_v8, %v2718_v16  ;;  %v2700_v16 = vld [vmem:[%s4491_s5 + $0xc] sm:$0xf0] }
 0x13c   :  { %v2694_v14 = vmul.f32 -1.442695, %v707_v56  ;;  %v2870_v56 = vld [vmem:[%s4491_s5 + $0x4] sm:$0xf] }
 0x13d   :  { %4684 = vst [vmem:[#allocation76_spill] sm:$0xff] %v3683_v33  ;;  %922 = vmatpush.bf16.msra.mxu2 %v3683_v33  ;;  %v3700_v0 = vor.u32 %v2870_v56, %v2700_v16  ;;  %996 = vmatpush.bf16.msrb.mxu0 %v3347_v18 }
 0x13e   :  { %2912 = vpow2.f32 %v2694_v14  ;;  %v631_v40 = vpop.f32.mrf.mxu3 }
 0x13f   :  { %v929_v19 = vadd.f32 %v631_v40, %v145_v31  ;;  %v683_v36 = vpop.f32.mrf.mxu2  ;;  %4685 = vst [vmem:[#allocation77_spill] sm:$0xff] %v3700_v0  ;;  %v2872_v31 = vld [vmem:[%s4491_s5 + $0x10] sm:$0xf0]  ;;  %910 = vmatpush.bf16.msra.mxu1 %v3700_v0 }
 0x140   :  { %v708_v8 = vadd.f32 %v3681_v59, %v683_v36  ;;  %v659_v14 = vpop.f32.mrf.mxu0  ;;  %v3705_v33 = vor.u32 %v2872_v31, %v2706_v55  ;;  %v186_v31 = vadd.f32 %v3424_v57, %v3287_v1 }
 0x141   :  { %v2792_v40 = vmul.f32 -1.442695, %v929_v19  ;;  %v672_v27 = vpop.f32.mrf.mxu1  ;;  %997 = vmatpush.bf16.msrb.mxu0 %v3361_v48 }
 0x142   :  { %v2695_v26 = vmul.f32 -1.442695, %v708_v8  ;;  %923 = vmatpush.bf16.msra.mxu2 %v3705_v33 }
 0x143   :  { %2914 = vpow2.f32 %v2792_v40  ;;  %1004 = vmatpush.bf16.msrb.mxu1 %v3250_v37 }
 0x144   :  { %v2913_v36 = vpop.eup %2912  ;;  %2916 = vpow2.f32 %v2695_v26 }
 0x145   :  { %v3712_v56 = vadd.f32 1.0, %v2913_v36  ;;  %998 = vmatpush.bf16.msrb.mxu0 %v3373_v6 }
 0x146   :  { %1017 = vmatpush.bf16.msrb.mxu2 %v3203_v9  ;;  %v633_v27 = vpop.f32.mrf.mxu3 }
 0x147   :  { %2918 = vrcp.f32 %v3712_v56  ;;  %v685_v19 = vpop.f32.mrf.mxu2  ;;  %1005 = vmatpush.bf16.msrb.mxu1 %v3266_v52  ;;  %vm725_vm12 = vweird.f32 %v3712_v56 }
 0x149   :  { %v2915_v16 = vpop.eup %2914 }
 0x14a   :  { %1018 = vmatpush.bf16.msrb.mxu2 %v3260_v47  ;;  %v2917_v55 = vpop.eup %2916  ;;  %v937_v8 = vadd.f32 1.0, %v2915_v16 }
 0x14b   :  { %v3719_v26 = vadd.f32 1.0, %v2917_v55  ;;  %1006 = vmatpush.bf16.msrb.mxu1 %v3295_v7 }
 0x14c   :  { %2920 = vrcp.f32 %v937_v8  ;;  %vm944_vm13 = vweird.f32 %v937_v8 }
 0x14d   :  { %v2919_v14 = vpop.eup %2918  ;;  %2922 = vrcp.f32 %v3719_v26  ;;  %vm740_vm3 = vweird.f32 %v3719_v26 }
 0x14e   :  { %1019 = vmatpush.bf16.msrb.mxu2 %v3278_v60  ;;  %v721_v40 = vmul.f32 %v2919_v14, %v3712_v56  ;;  %v644_v36 = vpop.f32.mrf.mxu3  ;;  %vm726_vm10 = vweird.f32 %v2919_v14 }
 0x14f   :  { %v930_v27 = vadd.f32 %v644_v36, %v186_v31  ;;  %1007 = vmatpush.bf16.msrb.mxu1 %v3309_v28  ;;  %vm3742_vm14 = vmor %vm725_vm12, %vm726_vm10 }
 0x150   :  { %v722_v19 = vsub.f32 1.0, %v721_v40 }
 0x151   :  { %v2793_v16 = vmul.f32 -1.442695, %v930_v27  ;;  %v731_v27 = vand.u32 2147483648, %v3712_v56 }
 0x152   :  { %1020 = vmatpush.bf16.msrb.mxu2 %v3298_v10  ;;  %v2921_v55 = vpop.eup %2920  ;;  %v723_v59 = vmul.f32 %v2919_v14, %v722_v19  ;;  %v950_v19 = vand.u32 2147483648, %v937_v8 }
 0x153   :  { %v3731_v18 = vpop.eup %2922  ;;  %v940_v57 = vmul.f32 %v2921_v55, %v937_v8  ;;  %2924 = vpow2.f32 %v2793_v16  ;;  %1008 = vmatpush.bf16.msrb.mxu1 %v3321_v42  ;;  %vm945_vm11 = vweird.f32 %v2921_v55  ;;  %v948_v16 = vand.u32 2147483647, %v937_v8 }
 0x154   :  { %v736_v1 = vmul.f32 %v3731_v18, %v3719_v26  ;;  %v724_v36 = vadd.f32 %v2919_v14, %v723_v59  ;;  %v729_v42 = vand.u32 2147483647, %v3712_v56  ;;  %vm946_vm15 = vmor %vm944_vm13, %vm945_vm11  ;;  %v732_v58 = vor.u32 1.1754944e-38, %v731_v27 }
 0x155   :  { %v941_v31 = vsub.f32 1.0, %v940_v57  ;;  %vm949_vm0 = vcmp.eq.f32.partialorder %v948_v16, 8.507059e+37  ;;  %vm741_vm2 = vweird.f32 %v3731_v18 }
 0x156   :  { %1021 = vmatpush.bf16.msrb.mxu2 %v3305_v25  ;;  %v646_v40 = vpop.f32.mrf.mxu3  ;;  %v737_v48 = vsub.f32 1.0, %v736_v1  ;;  %v728_v1 = vsel %vm3742_vm14, %v2919_v14, %v724_v36  ;;  %vm730_vm1 = vcmp.eq.f32.partialorder %v729_v42, 8.507059e+37  ;;  %vm742_vm4 = vmor %vm740_vm3, %vm741_vm2 }
 0x157   :  { %v942_v6 = vmul.f32 %v2921_v55, %v941_v31  ;;  %1009 = vmatpush.bf16.msrb.mxu1 %v3338_v4  ;;  %v951_v4 = vor.u32 1.1754944e-38, %v950_v19  ;;  %v733_v8 = vsel %vm730_vm1, %v732_v58, %v728_v1  ;;  %v4690_v19 = vld [vmem:[#allocation46_spill] sm:$0xff] }
 0x158   :  { %v738_v10 = vmul.f32 %v3731_v18, %v737_v48  ;;  %v969_v48 = vadd.f32 %v3383_v44, %v3658_v46  ;;  %v744_v46 = vand.u32 2147483647, %v3719_v26 }
 0x159   :  { %v2925_v25 = vpop.eup %2924  ;;  %v943_v57 = vadd.f32 %v2921_v55, %v942_v6  ;;  %v3751_v6 = vperm.slane %v3607_v3, 2  ;;  %v746_v3 = vand.u32 2147483648, %v3719_v26 }
 0x15a   :  { %1022 = vmatpush.bf16.msrb.mxu2 %v3334_v61  ;;  %v938_v31 = vadd.f32 1.0, %v2925_v25  ;;  %v3756_v25 = vld [vmem:[%s4493_s7] ss:$0 sm:$0xff]  ;;  %vm745_vm5 = vcmp.eq.f32.partialorder %v744_v46, 8.507059e+37 }
 0x15b   :  { %v947_v40 = vsel %vm946_vm15, %v2921_v55, %v943_v57  ;;  %1010 = vmatpush.bf16.msrb.mxu1 %v3353_v24  ;;  %4688 = vst [vmem:[#allocation78_spill] sm:$0xff] %v3751_v6  ;;  %v739_v55 = vadd.f32 %v3731_v18, %v738_v10  ;;  %v754_v27 = vmul.f32 %v3756_v25, %v733_v8 }
 0x15c   :  { %2926 = vrcp.f32 %v938_v31  ;;  %4689 = vst [vmem:[#allocation79_spill] sm:$0xff] %v3756_v25  ;;  %v952_v56 = vsel %vm949_vm0, %v951_v4, %v947_v40  ;;  %v4691_v4 = vld [vmem:[#allocation49_spill] sm:$0xff]  ;;  %v747_v40 = vor.u32 1.1754944e-38, %v746_v3  ;;  %v965_v8 = vand.u32 2147483648, %v938_v31 }
 0x15d   :  { %v970_v42 = vmul.f32 %v969_v48, %v952_v56  ;;  %v227_v16 = vadd.f32 %v3428_v38, %v4691_v4  ;;  %v743_v59 = vsel %vm742_vm4, %v3731_v18, %v739_v55  ;;  %vm959_vm7 = vweird.f32 %v938_v31 }
 0x15e   :  { %1023 = vmatpush.bf16.msrb.mxu2 %v3349_v20  ;;  %v748_v48 = vsel %vm745_vm5, %v747_v40, %v743_v59  ;;  %v4697_v40 = vld [vmem:[#allocation8_spill] sm:$0xff] }
 0x15f   :  { %v696_v14 = vpop.f32.mrf.mxu3  ;;  %1011 = vmatpush.bf16.msrb.mxu1 %v3363_v49  ;;  %v971_v1 = vadd.f32 %v970_v42, %v227_v16  ;;  %v757_v38 = vsub.f32 1.0, %v748_v48  ;;  %v759_v55 = vmul.f32 0.0, %v748_v48  ;;  %v4700_v48 = vld [vmem:[#allocation76_spill] sm:$0xff] }
 0x160   :  { %v709_v36 = vadd.f32 %v3751_v6, %v696_v14  ;;  %v963_v6 = vand.u32 2147483647, %v938_v31 }
 0x162   :  { %1024 = vmatpush.bf16.msrb.mxu2 %v4690_v19  ;;  %v2927_v58 = vpop.eup %2926  ;;  %v755_v10 = vadd.f32 %v754_v27, %v709_v36  ;;  %v966_v36 = vor.u32 1.1754944e-38, %v965_v8  ;;  %vm964_vm9 = vcmp.eq.f32.partialorder %v963_v6, 8.507059e+37  ;;  %v4699_v8 = vld [vmem:[#allocation18_spill] sm:$0xff] }
 0x163   :  { %v955_v57 = vmul.f32 %v2927_v58, %v938_v31  ;;  %vm960_vm6 = vweird.f32 %v2927_v58 }
 0x164   :  { %2928 = vtanh.f32 %v755_v10  ;;  %vm961_vm8 = vmor %vm959_vm7, %vm960_vm6 }
 0x165   :  { %v956_v56 = vsub.f32 1.0, %v955_v57  ;;  %2930 = vtanh.f32 %v971_v1  ;;  %v4696_v1 = vld [vmem:[#allocation51_spill] sm:$0xff] }
 0x167   :  { %v957_v14 = vmul.f32 %v2927_v58, %v956_v56  ;;  %v698_v26 = vpop.f32.mrf.mxu3  ;;  %v4698_v56 = vld [vmem:[#allocation70_spill] sm:$0xff] }
 0x168   :  { %v4702_v26 = vld [vmem:[#allocation22_spill] sm:$0xff] }
 0x169   :  { %v958_v25 = vadd.f32 %v2927_v58, %v957_v14  ;;  %v4701_v14 = vld [vmem:[#allocation9_spill] sm:$0xff] }
 0x16a   :  { %v2929_v4 = vpop.eup %2928 }
 0x16b   :  { %v962_v27 = vsel %vm961_vm8, %v2927_v58, %v958_v25  ;;  %v758_v18 = vmul.f32 %v2929_v4, %v757_v38  ;;  %v2931_v16 = vpop.eup %2930  ;;  %v4693_v25 = vld [vmem:[#allocation68_spill] sm:$0xff]  ;;  %v4694_v58 = vld [vmem:[#allocation73_spill] sm:$0xff]  ;;  %v4695_v4 = vld [vmem:[#allocation74_spill] sm:$0xff] }
 0x16c   :  { %v967_v42 = vsel %vm964_vm9, %v966_v36, %v962_v27  ;;  %v4703_v38 = vld [vmem:[#allocation11_spill] sm:$0xff]  ;;  %v4705_v27 = vld [vmem:[#allocation12_spill] sm:$0xff] }
 0x16d   :  { %v973_v3 = vsub.f32 1.0, %v967_v42  ;;  %v3773_v46 = vadd.f32 %v759_v55, %v758_v18  ;;  %v975_v10 = vmul.f32 %v967_v42, %v3387_v34  ;;  %v4692_v34 = vld [vmem:[#allocation50_spill] sm:$0xff]  ;;  %v4704_v36 = vld [vmem:[#allocation31_spill] sm:$0xff]  ;;  %v4706_v18 = vld [vmem:[#allocation13_spill] sm:$0xff] }
 0x16e   :  { %v4707_v55 = vld [vmem:[#allocation36_spill] sm:$0xff] }
 0x16f   :  { %v761_v57 = vpack.c.bf16 %v3773_v46, %v3773_v46  ;;  %v974_v59 = vmul.f32 %v2931_v16, %v973_v3  ;;  %v4708_v42 = vld [vmem:[#allocation28_spill] sm:$0xff]  ;;  %v4709_v3 = vld [vmem:[#allocation35_spill] sm:$0xff]  ;;  %v4710_v16 = vld [vmem:[#allocation14_spill] sm:$0xff] }
 0x171   :  { %898 = vmatmul.bf16.vlgmr.msra.gmra.mxu0 %v761_v57  ;;  %911 = vmatmul.bf16.vlgmr.msra.gmra.mxu1 %v761_v57  ;;  %v3778_v31 = vadd.f32 %v975_v10, %v974_v59  ;;  %v4711_v10 = vld [vmem:[#allocation40_spill] sm:$0xff]  ;;  %v4713_v59 = vld [vmem:[#allocation39_spill] sm:$0xff] }
 0x172   :  { %924 = vmatmul.bf16.vlgmr.msra.gmra.mxu2 %v761_v57  ;;  %1043 = vmatpush.bf16.msra.mxu0 %v3391_v50  ;;  %v4712_v57 = vld [vmem:[#allocation30_spill] sm:$0xff] }
 0x173   :  { %v977_v6 = vpack.c.bf16 %v3778_v31, %v3778_v31  ;;  %1108 = vmatpush.bf16.msra.mxu1 %v3436_v17  ;;  %1121 = vmatpush.bf16.msra.mxu2 %v3505_v45 }
 0x175   :  { %986 = vmatmul.bf16.vlgmr.msrb.gmra.mxu3 %v977_v6 }
 0x176   :  { %1044 = vmatpush.bf16.msra.mxu0 %v3394_v12  ;;  %1134 = vmatpush.bf16.msrb.mxu3 %v3513_v11 }
 0x177   :  { %1109 = vmatpush.bf16.msra.mxu1 %v3472_v43  ;;  %1122 = vmatpush.bf16.msra.mxu2 %v3536_v39 }
 0x17a   :  { %1045 = vmatpush.bf16.msra.mxu0 %v3397_v53  ;;  %1135 = vmatpush.bf16.msrb.mxu3 %v3542_v62 }
 0x17b   :  { %1110 = vmatpush.bf16.msra.mxu1 %v3483_v54  ;;  %1123 = vmatpush.bf16.msra.mxu2 %v3565_v51 }
 0x17e   :  { %1046 = vmatpush.bf16.msra.mxu0 %v3400_v13  ;;  %1136 = vmatpush.bf16.msrb.mxu3 %v3571_v35 }
 0x17f   :  { %1111 = vmatpush.bf16.msra.mxu1 %v3494_v22  ;;  %1124 = vmatpush.bf16.msra.mxu2 %v3596_v30 }
 0x181   :  { %999 = vmatmul.bf16.vlgmr.msrb.gmra.mxu0 %v977_v6  ;;  %1012 = vmatmul.bf16.vlgmr.msrb.gmra.mxu1 %v977_v6 }
 0x182   :  { %1025 = vmatmul.bf16.vlgmr.msrb.gmra.mxu2 %v977_v6  ;;  %1047 = vmatpush.bf16.msra.mxu0 %v3403_v21 }
 0x183   :  { %1112 = vmatpush.bf16.msra.mxu1 %v3525_v63  ;;  %1137 = vmatpush.bf16.msrb.mxu3 %v3602_v2 }
 0x184   :  { %1125 = vmatpush.bf16.msra.mxu2 %v3628_v23 }
 0x185   :  { %1038 = vmatmul.bf16.vlgmr.msra.gmra.mxu3 %v977_v6 }
 0x186   :  { %1048 = vmatpush.bf16.msra.mxu0 %v3406_v29 }
 0x187   :  { %1113 = vmatpush.bf16.msra.mxu1 %v3552_v5  ;;  %1138 = vmatpush.bf16.msrb.mxu3 %v3634_v32 }
 0x188   :  { %1126 = vmatpush.bf16.msra.mxu2 %v3653_v15 }
 0x18a   :  { %1049 = vmatpush.bf16.msra.mxu0 %v4692_v34 }
 0x18b   :  { %1114 = vmatpush.bf16.msra.mxu1 %v4693_v25  ;;  %1139 = vmatpush.bf16.msrb.mxu3 %v4694_v58 }
 0x18c   :  { %1127 = vmatpush.bf16.msra.mxu2 %v4695_v4 }
 0x18e   :  { %1050 = vmatpush.bf16.msra.mxu0 %v4696_v1 }
 0x18f   :  { %1115 = vmatpush.bf16.msra.mxu1 %v4698_v56  ;;  %1140 = vmatpush.bf16.msrb.mxu3 %v4700_v48 }
 0x190   :  { %1128 = vmatpush.bf16.msra.mxu2 %v3700_v0 }
 0x191   :  { %1051 = vmatmul.bf16.vlgmr.msra.gmra.mxu0 %v977_v6  ;;  %v4714_v6 = vld [vmem:[#allocation15_spill] sm:$0xff] }
 0x192   :  { %1196 = vmatpush.bf16.msrb.mxu0 %v4697_v40 }
 0x193   :  { %1209 = vmatpush.bf16.msrb.mxu1 %v4699_v8  ;;  %1141 = vmatpush.bf16.msrb.mxu3 %v3705_v33 }
 0x194   :  { %1222 = vmatpush.bf16.msrb.mxu2 %v3250_v37 }
 0x196   :  { %1197 = vmatpush.bf16.msrb.mxu0 %v4701_v14 }
 0x197   :  { %1210 = vmatpush.bf16.msrb.mxu1 %v4702_v26  ;;  %1235 = vmatpush.bf16.msra.mxu3 %v3203_v9 }
 0x198   :  { %1223 = vmatpush.bf16.msrb.mxu2 %v3266_v52 }
 0x19a   :  { %1198 = vmatpush.bf16.msrb.mxu0 %v4703_v38 }
 0x19b   :  { %1211 = vmatpush.bf16.msrb.mxu1 %v4704_v36  ;;  %1236 = vmatpush.bf16.msra.mxu3 %v3260_v47 }
 0x19c   :  { %1224 = vmatpush.bf16.msrb.mxu2 %v3295_v7  ;;  %v4728_v7 = vld [vmem:[#allocation25_spill] sm:$0xff] }
 0x19e   :  { %1199 = vmatpush.bf16.msrb.mxu0 %v4705_v27 }
 0x19f   :  { %1212 = vmatpush.bf16.msrb.mxu1 %v3319_v41  ;;  %1237 = vmatpush.bf16.msra.mxu3 %v3278_v60  ;;  %v4715_v41 = vld [vmem:[#allocation44_spill] sm:$0xff] }
 0x1a0   :  { %1225 = vmatpush.bf16.msrb.mxu2 %v3309_v28  ;;  %v4726_v28 = vld [vmem:[#allocation24_spill] sm:$0xff] }
 0x1a2   :  { %1200 = vmatpush.bf16.msrb.mxu0 %v4706_v18  ;;  %v4717_v18 = vld [vmem:[#allocation10_spill] sm:$0xff] }
 0x1a3   :  { %1213 = vmatpush.bf16.msrb.mxu1 %v4707_v55  ;;  %1238 = vmatpush.bf16.msra.mxu3 %v4708_v42  ;;  %v4716_v55 = vld [vmem:[#allocation17_spill] sm:$0xff] }
 0x1a4   :  { %1226 = vmatpush.bf16.msrb.mxu2 %v4709_v3  ;;  %v4718_v3 = vld [vmem:[#allocation48_spill] sm:$0xff] }
 0x1a6   :  { %1201 = vmatpush.bf16.msrb.mxu0 %v4710_v16 }
 0x1a7   :  { %1214 = vmatpush.bf16.msrb.mxu1 %v4711_v10  ;;  %1239 = vmatpush.bf16.msra.mxu3 %v4712_v57  ;;  %v4719_v10 = vld [vmem:[#allocation20_spill] sm:$0xff] }
 0x1a8   :  { %1227 = vmatpush.bf16.msrb.mxu2 %v4713_v59  ;;  %v4722_v59 = vld [vmem:[#allocation33_spill] sm:$0xff] }
 0x1aa   :  { %1202 = vmatpush.bf16.msrb.mxu0 %v4714_v6  ;;  %v4720_v6 = vld [vmem:[#allocation26_spill] sm:$0xff] }
 0x1ab   :  { %1215 = vmatpush.bf16.msrb.mxu1 %v4715_v41  ;;  %1240 = vmatpush.bf16.msra.mxu3 %v3334_v61  ;;  %v4721_v41 = vld [vmem:[#allocation29_spill] sm:$0xff] }
 0x1ac   :  { %1228 = vmatpush.bf16.msrb.mxu2 %v3353_v24  ;;  %v4723_v24 = vld [vmem:[#allocation38_spill] sm:$0xff] }
 0x1ae   :  { %1203 = vmatpush.bf16.msrb.mxu0 %v4716_v55  ;;  %v4724_v55 = vld [vmem:[#allocation43_spill] sm:$0xff] }
 0x1af   :  { %1216 = vmatpush.bf16.msrb.mxu1 %v4718_v3  ;;  %1241 = vmatpush.bf16.msra.mxu3 %v3349_v20 }
 0x1b0   :  { %1229 = vmatpush.bf16.msrb.mxu2 %v3363_v49 }
 0x1b2   :  { %1248 = vmatpush.bf16.msra.mxu0 %v4717_v18  ;;  %v4725_v18 = vld [vmem:[#allocation47_spill] sm:$0xff] }
 0x1b3   :  { %1242 = vmatpush.bf16.msra.mxu3 %v4690_v19  ;;  %v4727_v19 = vld [vmem:[#allocation52_spill] sm:$0xff] }
 0x1b4   :  { %v148_v27 = vadd.f32 %v4727_v19, %v4726_v28  ;;  %v4730_v28 = vld [vmem:[#allocation72_spill] sm:$0xff] }
 0x1b6   :  { %1249 = vmatpush.bf16.msra.mxu0 %v4719_v10 }
 0x1ba   :  { %1250 = vmatpush.bf16.msra.mxu0 %v4720_v6 }
 0x1be   :  { %1251 = vmatpush.bf16.msra.mxu0 %v4721_v41 }
 0x1c2   :  { %1252 = vmatpush.bf16.msra.mxu0 %v4722_v59  ;;  %v4729_v59 = vld [vmem:[#allocation53_spill] sm:$0xff] }
 0x1c3   :  { %v189_v36 = vadd.f32 %v4729_v59, %v4728_v7  ;;  %v4731_v59 = vld [vmem:[#allocation75_spill] sm:$0xff] }
 0x1c6   :  { %1253 = vmatpush.bf16.msra.mxu0 %v4723_v24 }
 0x1ca   :  { %1254 = vmatpush.bf16.msra.mxu0 %v4724_v55 }
 0x1ce   :  { %1255 = vmatpush.bf16.msra.mxu0 %v4725_v18 }
 0x1ee   :  { %v899_v3 = vpop.f32.mrf.mxu0  ;;  %v912_v16 = vpop.f32.mrf.mxu1 }
 0x1f5   :  { %v3854_v20 = vpop.f32.mrf.mxu2 }
 0x1f6   :  { %v901_v49 = vpop.f32.mrf.mxu0  ;;  %v914_v10 = vpop.f32.mrf.mxu1 }
 0x1f8   :  { %v987_v6 = vpop.f32.mrf.mxu3 }
 0x1f9   :  { %v1147_v61 = vadd.f32 %v987_v6, %v148_v27 }
 0x1fb   :  { %v2796_v41 = vmul.f32 -1.442695, %v1147_v61 }
 0x1fd   :  { %2932 = vpow2.f32 %v2796_v41  ;;  %v927_v24 = vpop.f32.mrf.mxu2 }
 0x1fe   :  { %v1000_v55 = vpop.f32.mrf.mxu0  ;;  %v1013_v38 = vpop.f32.mrf.mxu1 }
 0x1ff   :  { %v1148_v18 = vadd.f32 %v1000_v55, %v189_v36 }
 0x200   :  { %v989_v57 = vpop.f32.mrf.mxu3 }
 0x201   :  { %v2797_v52 = vmul.f32 -1.442695, %v1148_v18 }
 0x203   :  { %v2933_v26 = vpop.eup %2932  ;;  %2934 = vpow2.f32 %v2797_v52 }
 0x204   :  { %v1155_v49 = vadd.f32 1.0, %v2933_v26 }
 0x205   :  { %v1026_v10 = vpop.f32.mrf.mxu2 }
 0x206   :  { %2936 = vrcp.f32 %v1155_v49  ;;  %v1002_v14 = vpop.f32.mrf.mxu0  ;;  %v1015_v19 = vpop.f32.mrf.mxu1  ;;  %v1056_v27 = vadd.f32 %v1026_v10, %v4730_v28  ;;  %v1168_v57 = vand.u32 2147483648, %v1155_v49  ;;  %vm1162_vm11 = vweird.f32 %v1155_v49  ;;  %v4733_v28 = vld [vmem:[#allocation54_spill] sm:$0xff] }
 0x208   :  { %v1039_v61 = vpop.f32.mrf.mxu3  ;;  %v1059_v42 = vadd.f32 %v1056_v27, %v899_v3  ;;  %v1166_v3 = vand.u32 2147483647, %v1155_v49 }
 0x209   :  { %v2935_v6 = vpop.eup %2934  ;;  %v1057_v41 = vadd.f32 %v1039_v61, %v4731_v59 }
 0x20a   :  { %v1156_v24 = vadd.f32 1.0, %v2935_v6  ;;  %v2794_v7 = vmul.f32 -1.442695, %v1059_v42  ;;  %vm1167_vm13 = vcmp.eq.f32.partialorder %v1166_v3, 8.507059e+37 }
 0x20b   :  { %v1060_v37 = vadd.f32 %v1057_v41, %v912_v16  ;;  %v1169_v16 = vor.u32 1.1754944e-38, %v1168_v57 }
 0x20c   :  { %v2937_v36 = vpop.eup %2936  ;;  %2938 = vrcp.f32 %v1156_v24  ;;  %v1181_v56 = vand.u32 2147483647, %v1156_v24  ;;  %vm1177_vm15 = vweird.f32 %v1156_v24 }
 0x20d   :  { %v1158_v18 = vmul.f32 %v2937_v36, %v1155_v49  ;;  %2940 = vpow2.f32 %v2794_v7  ;;  %v2795_v52 = vmul.f32 -1.442695, %v1060_v37  ;;  %v1028_v26 = vpop.f32.mrf.mxu2  ;;  %vm1163_vm10 = vweird.f32 %v2937_v36 }
 0x20e   :  { %v3862_v55 = vpop.f32.mrf.mxu0  ;;  %vm1164_vm12 = vmor %vm1162_vm11, %vm1163_vm10  ;;  %vm1182_vm1 = vcmp.eq.f32.partialorder %v1181_v56, 8.507059e+37 }
 0x20f   :  { %v1159_v14 = vsub.f32 1.0, %v1158_v18  ;;  %2942 = vpow2.f32 %v2795_v52  ;;  %v1187_v18 = vadd.f32 %v3383_v44, %v1013_v38  ;;  %v4732_v52 = vld [vmem:[#allocation49_spill] sm:$0xff] }
 0x210   :  { %v1041_v10 = vpop.f32.mrf.mxu3 }
 0x211   :  { %v1160_v19 = vmul.f32 %v2937_v36, %v1159_v14  ;;  %v230_v10 = vadd.f32 %v4733_v28, %v4732_v52 }
 0x212   :  { %v2939_v27 = vpop.eup %2938 }
 0x213   :  { %v2941_v61 = vpop.eup %2940  ;;  %v1173_v6 = vmul.f32 %v2939_v27, %v1156_v24  ;;  %v1161_v42 = vadd.f32 %v2937_v36, %v1160_v19  ;;  %vm1178_vm14 = vweird.f32 %v2939_v27  ;;  %v1183_v19 = vand.u32 2147483648, %v1156_v24 }
 0x214   :  { %v1067_v41 = vadd.f32 1.0, %v2941_v61  ;;  %vm1179_vm0 = vmor %vm1177_vm15, %vm1178_vm14 }
 0x215   :  { %v2943_v7 = vpop.eup %2942  ;;  %v1174_v37 = vsub.f32 1.0, %v1173_v6  ;;  %v1165_v26 = vsel %vm1164_vm12, %v2937_v36, %v1161_v42  ;;  %v1184_v36 = vor.u32 1.1754944e-38, %v1183_v19 }
 0x216   :  { %v1170_v14 = vsel %vm1167_vm13, %v1169_v16, %v1165_v26  ;;  %2944 = vrcp.f32 %v1067_v41  ;;  %v1068_v59 = vadd.f32 1.0, %v2943_v7  ;;  %v1054_v0 = vpop.f32.mrf.mxu0  ;;  %v1080_v7 = vand.u32 2147483648, %v1067_v41 }
 0x217   :  { %v1175_v8 = vmul.f32 %v2939_v27, %v1174_v37  ;;  %v1188_v49 = vmul.f32 %v1187_v18, %v1170_v14  ;;  %vm1074_vm3 = vweird.f32 %v1067_v41 }
 0x218   :  { %2946 = vrcp.f32 %v1068_v59  ;;  %v1081_v56 = vor.u32 1.1754944e-38, %v1080_v7  ;;  %vm1089_vm7 = vweird.f32 %v1068_v59 }
 0x219   :  { %v1176_v57 = vadd.f32 %v2939_v27, %v1175_v8  ;;  %v1189_v61 = vadd.f32 %v1188_v49, %v230_v10  ;;  %v1078_v8 = vand.u32 2147483647, %v1067_v41  ;;  %v4734_v49 = vld [vmem:[#allocation79_spill] sm:$0xff] }
 0x21b   :  { %v1180_v3 = vsel %vm1179_vm0, %v2939_v27, %v1176_v57  ;;  %2948 = vtanh.f32 %v1189_v61  ;;  %v1099_v57 = vadd.f32 %v4734_v49, %v3854_v20  ;;  %vm1079_vm5 = vcmp.eq.f32.partialorder %v1078_v8, 8.507059e+37  ;;  %v4737_v8 = vld [vmem:[#allocation18_spill] sm:$0xff] }
 0x21c   :  { %v2945_v44 = vpop.eup %2944  ;;  %v1185_v28 = vsel %vm1182_vm1, %v1184_v36, %v1180_v3 }
 0x21d   :  { %v1070_v38 = vmul.f32 %v2945_v44, %v1067_v41  ;;  %v1191_v16 = vsub.f32 1.0, %v1185_v28  ;;  %vm1075_vm2 = vweird.f32 %v2945_v44  ;;  %v1193_v10 = vmul.f32 %v1185_v28, %v3778_v31  ;;  %v4735_v28 = vld [vmem:[#allocation78_spill] sm:$0xff] }
 0x21e   :  { %v2947_v6 = vpop.eup %2946  ;;  %vm1076_vm4 = vmor %vm1074_vm3, %vm1075_vm2  ;;  %v1095_v31 = vand.u32 2147483648, %v1068_v59  ;;  %v1058_v41 = vadd.f32 %v3862_v55, %v4735_v28 }
 0x21f   :  { %v1085_v42 = vmul.f32 %v2947_v6, %v1068_v59  ;;  %v1071_v0 = vsub.f32 1.0, %v1070_v38  ;;  %vm1090_vm6 = vweird.f32 %v2947_v6 }
 0x220   :  { %vm1091_vm8 = vmor %vm1089_vm7, %vm1090_vm6 }
 0x221   :  { %v2949_v37 = vpop.eup %2948  ;;  %v1086_v26 = vsub.f32 1.0, %v1085_v42  ;;  %v1072_v18 = vmul.f32 %v2945_v44, %v1071_v0  ;;  %v1093_v0 = vand.u32 2147483647, %v1068_v59 }
 0x222   :  { %v1192_v24 = vmul.f32 %v2949_v37, %v1191_v16  ;;  %v1096_v16 = vor.u32 1.1754944e-38, %v1095_v31  ;;  %v4747_v31 = vld [vmem:[#allocation27_spill] sm:$0xff] }
 0x223   :  { %v1087_v14 = vmul.f32 %v2947_v6, %v1086_v26  ;;  %v1073_v27 = vadd.f32 %v2945_v44, %v1072_v18  ;;  %vm1094_vm9 = vcmp.eq.f32.partialorder %v1093_v0, 8.507059e+37  ;;  %v4751_v0 = vld [vmem:[#allocation32_spill] sm:$0xff] }
 0x224   :  { %v3868_v19 = vadd.f32 %v1193_v10, %v1192_v24  ;;  %v4738_v24 = vld [vmem:[#allocation77_spill] sm:$0xff]  ;;  %v4739_v10 = vld [vmem:[#allocation16_spill] sm:$0xff] }
 0x225   :  { %v1077_v61 = vsel %vm1076_vm4, %v2945_v44, %v1073_v27  ;;  %v1088_v38 = vadd.f32 %v2947_v6, %v1087_v14  ;;  %v4740_v14 = vld [vmem:[#allocation28_spill] sm:$0xff]  ;;  %v4741_v27 = vld [vmem:[#allocation9_spill] sm:$0xff] }
 0x226   :  { %v3874_v36 = vpack.c.bf16 %v3868_v19, %v3868_v19  ;;  %v1082_v3 = vsel %vm1079_vm5, %v1081_v56, %v1077_v61  ;;  %v4742_v56 = vld [vmem:[#allocation22_spill] sm:$0xff] }
 0x227   :  { %v1100_v42 = vmul.f32 %v1099_v57, %v1082_v3  ;;  %v1092_v44 = vsel %vm1091_vm8, %v2947_v6, %v1088_v38  ;;  %v4743_v57 = vld [vmem:[#allocation21_spill] sm:$0xff]  ;;  %v4744_v61 = vld [vmem:[#allocation30_spill] sm:$0xff]  ;;  %v4745_v3 = vld [vmem:[#allocation11_spill] sm:$0xff] }
 0x228   :  { %1204 = vmatmul.bf16.vlgmr.msrb.gmra.mxu0 %v3874_v36  ;;  %v1097_v7 = vsel %vm1094_vm9, %v1096_v16, %v1092_v44  ;;  %v4746_v38 = vld [vmem:[#allocation31_spill] sm:$0xff]  ;;  %v4753_v44 = vld [vmem:[#allocation13_spill] sm:$0xff]  ;;  %v4754_v16 = vld [vmem:[#allocation36_spill] sm:$0xff] }
 0x229   :  { %v1101_v20 = vadd.f32 %v1100_v42, %v1058_v41  ;;  %1352 = vmatpush.bf16.msrb.mxu0 %v3513_v11  ;;  %v1103_v37 = vsub.f32 1.0, %v1097_v7  ;;  %v1105_v59 = vmul.f32 %v1097_v7, %v3773_v46  ;;  %v4736_v46 = vld [vmem:[#allocation70_spill] sm:$0xff]  ;;  %v4748_v41 = vld [vmem:[#allocation37_spill] sm:$0xff]  ;;  %v4755_v7 = vld [vmem:[#allocation35_spill] sm:$0xff] }
 0x22a   :  { %v4750_v42 = vld [vmem:[#allocation34_spill] sm:$0xff] }
 0x22b   :  { %2950 = vtanh.f32 %v1101_v20  ;;  %v4752_v20 = vld [vmem:[#allocation41_spill] sm:$0xff] }
 0x22d   :  { %1353 = vmatpush.bf16.msrb.mxu0 %v3542_v62 }
 0x231   :  { %v2951_v26 = vpop.eup %2950  ;;  %1354 = vmatpush.bf16.msrb.mxu0 %v3571_v35 }
 0x232   :  { %v1104_v55 = vmul.f32 %v2951_v26, %v1103_v37  ;;  %v4756_v37 = vld [vmem:[#allocation46_spill] sm:$0xff] }
 0x233   :  { %v4757_v26 = vld [vmem:[#allocation14_spill] sm:$0xff] }
 0x234   :  { %v3883_v18 = vadd.f32 %v1105_v59, %v1104_v55  ;;  %v4758_v55 = vld [vmem:[#allocation40_spill] sm:$0xff]  ;;  %v4759_v59 = vld [vmem:[#allocation39_spill] sm:$0xff] }
 0x235   :  { %1355 = vmatpush.bf16.msrb.mxu0 %v3602_v2 }
 0x236   :  { %v1107_v6 = vpack.c.bf16 %v3883_v18, %v3883_v18 }
 0x238   :  { %1116 = vmatmul.bf16.vlgmr.msra.gmra.mxu1 %v1107_v6  ;;  %1129 = vmatmul.bf16.vlgmr.msra.gmra.mxu2 %v1107_v6 }
 0x239   :  { %1142 = vmatmul.bf16.vlgmr.msrb.gmra.mxu3 %v1107_v6  ;;  %1261 = vmatpush.bf16.msra.mxu1 %v3391_v50  ;;  %v4760_v6 = vld [vmem:[#allocation15_spill] sm:$0xff] }
 0x23a   :  { %1256 = vmatmul.bf16.vlgmr.msra.gmra.mxu0 %v3874_v36  ;;  %1326 = vmatpush.bf16.msra.mxu2 %v3436_v17 }
 0x23b   :  { %1339 = vmatpush.bf16.msrb.mxu3 %v3505_v45  ;;  %1356 = vmatpush.bf16.msrb.mxu0 %v3634_v32 }
 0x23d   :  { %1262 = vmatpush.bf16.msra.mxu1 %v3394_v12 }
 0x23e   :  { %1327 = vmatpush.bf16.msra.mxu2 %v3472_v43 }
 0x23f   :  { %1340 = vmatpush.bf16.msrb.mxu3 %v3536_v39  ;;  %1357 = vmatpush.bf16.msrb.mxu0 %v4694_v58 }
 0x241   :  { %1263 = vmatpush.bf16.msra.mxu1 %v3397_v53 }
 0x242   :  { %1328 = vmatpush.bf16.msra.mxu2 %v3483_v54 }
 0x243   :  { %1341 = vmatpush.bf16.msrb.mxu3 %v3565_v51  ;;  %1358 = vmatpush.bf16.msrb.mxu0 %v4700_v48 }
 0x245   :  { %1264 = vmatpush.bf16.msra.mxu1 %v3400_v13 }
 0x246   :  { %1329 = vmatpush.bf16.msra.mxu2 %v3494_v22 }
 0x247   :  { %1342 = vmatpush.bf16.msrb.mxu3 %v3596_v30  ;;  %1359 = vmatpush.bf16.msrb.mxu0 %v3705_v33 }
 0x248   :  { %1217 = vmatmul.bf16.vlgmr.msrb.gmra.mxu1 %v3874_v36  ;;  %1230 = vmatmul.bf16.vlgmr.msrb.gmra.mxu2 %v3874_v36 }
 0x249   :  { %1243 = vmatmul.bf16.vlgmr.msra.gmra.mxu3 %v3874_v36  ;;  %1265 = vmatpush.bf16.msra.mxu1 %v3403_v21 }
 0x24a   :  { %1330 = vmatpush.bf16.msra.mxu2 %v3525_v63 }
 0x24b   :  { %1453 = vmatpush.bf16.msra.mxu0 %v3203_v9  ;;  %1343 = vmatpush.bf16.msrb.mxu3 %v3628_v23 }
 0x24d   :  { %1266 = vmatpush.bf16.msra.mxu1 %v3406_v29 }
 0x24e   :  { %1331 = vmatpush.bf16.msra.mxu2 %v3552_v5 }
 0x24f   :  { %1454 = vmatpush.bf16.msra.mxu0 %v3260_v47  ;;  %1344 = vmatpush.bf16.msrb.mxu3 %v3653_v15 }
 0x251   :  { %1267 = vmatpush.bf16.msra.mxu1 %v4692_v34 }
 0x252   :  { %1332 = vmatpush.bf16.msra.mxu2 %v4693_v25 }
 0x253   :  { %1455 = vmatpush.bf16.msra.mxu0 %v3278_v60  ;;  %1345 = vmatpush.bf16.msrb.mxu3 %v4695_v4 }
 0x255   :  { %1268 = vmatpush.bf16.msra.mxu1 %v4696_v1 }
 0x256   :  { %1333 = vmatpush.bf16.msra.mxu2 %v4736_v46 }
 0x257   :  { %1346 = vmatpush.bf16.msrb.mxu3 %v4738_v24  ;;  %1456 = vmatpush.bf16.msra.mxu0 %v4740_v14 }
 0x258   :  { %1269 = vmatmul.bf16.vlgmr.msra.gmra.mxu1 %v3874_v36  ;;  %v4749_v36 = vld [vmem:[#allocation12_spill] sm:$0xff] }
 0x259   :  { %1414 = vmatpush.bf16.msrb.mxu1 %v4697_v40 }
 0x25a   :  { %1427 = vmatpush.bf16.msrb.mxu2 %v4737_v8 }
 0x25b   :  { %1440 = vmatpush.bf16.msra.mxu3 %v4739_v10  ;;  %1457 = vmatpush.bf16.msra.mxu0 %v4744_v61 }
 0x25d   :  { %1415 = vmatpush.bf16.msrb.mxu1 %v4741_v27 }
 0x25e   :  { %1428 = vmatpush.bf16.msrb.mxu2 %v4742_v56 }
 0x25f   :  { %1441 = vmatpush.bf16.msra.mxu3 %v4743_v57  ;;  %1458 = vmatpush.bf16.msra.mxu0 %v4748_v41 }
 0x261   :  { %1416 = vmatpush.bf16.msrb.mxu1 %v4745_v3 }
 0x262   :  { %1429 = vmatpush.bf16.msrb.mxu2 %v4746_v38 }
 0x263   :  { %1442 = vmatpush.bf16.msra.mxu3 %v4747_v31  ;;  %1459 = vmatpush.bf16.msra.mxu0 %v4752_v20 }
 0x265   :  { %1417 = vmatpush.bf16.msrb.mxu1 %v4749_v36  ;;  %v4763_v36 = vld [vmem:[#allocation17_spill] sm:$0xff] }
 0x266   :  { %1430 = vmatpush.bf16.msrb.mxu2 %v4750_v42  ;;  %v4761_v42 = vld [vmem:[#allocation44_spill] sm:$0xff] }
 0x267   :  { %1443 = vmatpush.bf16.msra.mxu3 %v4751_v0  ;;  %1460 = vmatpush.bf16.msra.mxu0 %v4756_v37  ;;  %v4762_v0 = vld [vmem:[#allocation42_spill] sm:$0xff]  ;;  %v4767_v37 = vld [vmem:[#allocation20_spill] sm:$0xff] }
 0x269   :  { %1418 = vmatpush.bf16.msrb.mxu1 %v4753_v44  ;;  %v4764_v44 = vld [vmem:[#allocation10_spill] sm:$0xff] }
 0x26a   :  { %1431 = vmatpush.bf16.msrb.mxu2 %v4754_v16  ;;  %v4765_v16 = vld [vmem:[#allocation48_spill] sm:$0xff] }
 0x26b   :  { %1444 = vmatpush.bf16.msra.mxu3 %v4755_v7  ;;  %v4766_v7 = vld [vmem:[#allocation45_spill] sm:$0xff] }
 0x26d   :  { %1419 = vmatpush.bf16.msrb.mxu1 %v4757_v26  ;;  %v4768_v26 = vld [vmem:[#allocation26_spill] sm:$0xff] }
 0x26e   :  { %1432 = vmatpush.bf16.msrb.mxu2 %v4758_v55  ;;  %v4769_v55 = vld [vmem:[#allocation29_spill] sm:$0xff] }
 0x26f   :  { %1445 = vmatpush.bf16.msra.mxu3 %v4759_v59  ;;  %v4770_v59 = vld [vmem:[#allocation33_spill] sm:$0xff] }
 0x271   :  { %1420 = vmatpush.bf16.msrb.mxu1 %v4760_v6  ;;  %v4771_v6 = vld [vmem:[#allocation38_spill] sm:$0xff] }
 0x272   :  { %1433 = vmatpush.bf16.msrb.mxu2 %v4761_v42  ;;  %v4772_v42 = vld [vmem:[#allocation43_spill] sm:$0xff] }
 0x273   :  { %1446 = vmatpush.bf16.msra.mxu3 %v4762_v0  ;;  %v4773_v0 = vld [vmem:[#allocation47_spill] sm:$0xff] }
 0x275   :  { %1421 = vmatpush.bf16.msrb.mxu1 %v4763_v36  ;;  %v4774_v36 = vld [vmem:[#allocation24_spill] sm:$0xff] }
 0x276   :  { %1434 = vmatpush.bf16.msrb.mxu2 %v4765_v16 }
 0x277   :  { %1447 = vmatpush.bf16.msra.mxu3 %v4766_v7 }
 0x279   :  { %1466 = vmatpush.bf16.msra.mxu1 %v4764_v44  ;;  %v4775_v44 = vld [vmem:[#allocation55_spill] sm:$0xff] }
 0x27a   :  { %v151_v20 = vadd.f32 %v4775_v44, %v4774_v36 }
 0x27d   :  { %1467 = vmatpush.bf16.msra.mxu1 %v4767_v37 }
 0x281   :  { %1468 = vmatpush.bf16.msra.mxu1 %v4768_v26 }
 0x285   :  { %1469 = vmatpush.bf16.msra.mxu1 %v4769_v55 }
 0x289   :  { %1470 = vmatpush.bf16.msra.mxu1 %v4770_v59 }
 0x28d   :  { %1471 = vmatpush.bf16.msra.mxu1 %v4771_v6 }
 0x291   :  { %1472 = vmatpush.bf16.msra.mxu1 %v4772_v42  ;;  %v4776_v42 = vld [vmem:[#allocation75_spill] sm:$0xff] }
 0x295   :  { %1473 = vmatpush.bf16.msra.mxu1 %v4773_v0 }
 0x2a5   :  { %v1205_v16 = vpop.f32.mrf.mxu0 }
 0x2a6   :  { %v1365_v31 = vadd.f32 %v1205_v16, %v151_v20  ;;  %v4777_v20 = vld [vmem:[#allocation25_spill] sm:$0xff] }
 0x2a8   :  { %v2800_v7 = vmul.f32 -1.442695, %v1365_v31  ;;  %v4778_v31 = vld [vmem:[#allocation56_spill] sm:$0xff] }
 0x2a9   :  { %v192_v16 = vadd.f32 %v4778_v31, %v4777_v20 }
 0x2aa   :  { %2952 = vpow2.f32 %v2800_v7 }
 0x2ad   :  { %v1207_v37 = vpop.f32.mrf.mxu0 }
 0x2b0   :  { %v2953_v38 = vpop.eup %2952 }
 0x2b1   :  { %v1373_v3 = vadd.f32 1.0, %v2953_v38 }
 0x2b3   :  { %2954 = vrcp.f32 %v1373_v3  ;;  %v1386_v40 = vand.u32 2147483648, %v1373_v3  ;;  %vm1380_vm11 = vweird.f32 %v1373_v3 }
 0x2b5   :  { %v1117_v26 = vpop.f32.mrf.mxu1 }
 0x2b7   :  { %v1257_v55 = vpop.f32.mrf.mxu0 }
 0x2b8   :  { %v1275_v57 = vadd.f32 %v1257_v55, %v4776_v42  ;;  %v4779_v55 = vld [vmem:[#allocation72_spill] sm:$0xff] }
 0x2b9   :  { %v2955_v56 = vpop.eup %2954 }
 0x2ba   :  { %v1376_v36 = vmul.f32 %v2955_v56, %v1373_v3  ;;  %vm1381_vm10 = vweird.f32 %v2955_v56 }
 0x2bb   :  { %v1130_v59 = vpop.f32.mrf.mxu2  ;;  %vm1382_vm12 = vmor %vm1380_vm11, %vm1381_vm10 }
 0x2bc   :  { %v3963_v41 = vpop.f32.mrf.mxu3  ;;  %v1278_v27 = vadd.f32 %v1275_v57, %v1130_v59  ;;  %v1377_v10 = vsub.f32 1.0, %v1376_v36 }
 0x2bd   :  { %v1119_v6 = vpop.f32.mrf.mxu1 }
 0x2be   :  { %v2799_v38 = vmul.f32 -1.442695, %v1278_v27  ;;  %v1378_v6 = vmul.f32 %v2955_v56, %v1377_v10  ;;  %v3972_v10 = vld [vmem:[%s4489_s3] ss:$0 sm:$0xff] }
 0x2bf   :  { %v1259_v0 = vpop.f32.mrf.mxu0  ;;  %4780 = vst [vmem:[#allocation50_spill] sm:$0xff] %v3972_v10 }
 0x2c0   :  { %v1379_v57 = vadd.f32 %v2955_v56, %v1378_v6  ;;  %v4781_v6 = vld [vmem:[#allocation57_spill] sm:$0xff] }
 0x2c3   :  { %v1132_v44 = vpop.f32.mrf.mxu2 }
 0x2c4   :  { %v1145_v7 = vpop.f32.mrf.mxu3 }
 0x2c5   :  { %v1218_v37 = vpop.f32.mrf.mxu1 }
 0x2c6   :  { %v1366_v61 = vadd.f32 %v1218_v37, %v192_v16  ;;  %v1384_v16 = vand.u32 2147483647, %v1373_v3 }
 0x2c8   :  { %v2801_v24 = vmul.f32 -1.442695, %v1366_v61  ;;  %vm1385_vm13 = vcmp.eq.f32.partialorder %v1384_v16, 8.507059e+37 }
 0x2ca   :  { %2956 = vpow2.f32 %v2801_v24  ;;  %v1383_v24 = vsel %vm1382_vm12, %v2955_v56, %v1379_v57 }
 0x2cb   :  { %2958 = vpow2.f32 %v2799_v38  ;;  %v1231_v8 = vpop.f32.mrf.mxu2 }
 0x2cc   :  { %v1244_v46 = vpop.f32.mrf.mxu3 }
 0x2cd   :  { %v1274_v0 = vadd.f32 %v1244_v46, %v4779_v55  ;;  %v1220_v42 = vpop.f32.mrf.mxu1  ;;  %v1405_v46 = vadd.f32 %v3972_v10, %v1231_v8 }
 0x2ce   :  { %v1387_v42 = vor.u32 1.1754944e-38, %v1386_v40 }
 0x2cf   :  { %v1277_v59 = vadd.f32 %v1274_v0, %v1117_v26  ;;  %v233_v0 = vadd.f32 %v4781_v6, %v4732_v52 }
 0x2d0   :  { %v2957_v44 = vpop.eup %2956  ;;  %v1388_v3 = vsel %vm1385_vm13, %v1387_v42, %v1383_v24 }
 0x2d1   :  { %v2959_v31 = vpop.eup %2958  ;;  %v1374_v7 = vadd.f32 1.0, %v2957_v44  ;;  %v2798_v27 = vmul.f32 -1.442695, %v1277_v59  ;;  %v1406_v38 = vmul.f32 %v1405_v46, %v1388_v3 }
 0x2d2   :  { %v3975_v36 = vadd.f32 1.0, %v2959_v31 }
 0x2d3   :  { %2960 = vrcp.f32 %v1374_v7  ;;  %v1233_v61 = vpop.f32.mrf.mxu2  ;;  %v1407_v44 = vadd.f32 %v1406_v38, %v233_v0  ;;  %v1401_v31 = vand.u32 2147483648, %v1374_v7  ;;  %v1399_v16 = vand.u32 2147483647, %v1374_v7 }
 0x2d4   :  { %2962 = vpow2.f32 %v2798_v27  ;;  %v1246_v26 = vpop.f32.mrf.mxu3  ;;  %vm1395_vm15 = vweird.f32 %v1374_v7  ;;  %vm1307_vm7 = vweird.f32 %v3975_v36 }
 0x2d5   :  { %v1270_v37 = vpop.f32.mrf.mxu1  ;;  %2964 = vrcp.f32 %v3975_v36  ;;  %v1402_v42 = vor.u32 1.1754944e-38, %v1401_v31  ;;  %vm1400_vm1 = vcmp.eq.f32.partialorder %v1399_v16, 8.507059e+37 }
 0x2d9   :  { %v2961_v56 = vpop.eup %2960 }
 0x2da   :  { %v2963_v57 = vpop.eup %2962  ;;  %v1391_v59 = vmul.f32 %v2961_v56, %v1374_v7  ;;  %vm1396_vm14 = vweird.f32 %v2961_v56 }
 0x2db   :  { %v1285_v8 = vadd.f32 1.0, %v2963_v57  ;;  %v2965_v27 = vpop.eup %2964  ;;  %vm1397_vm0 = vmor %vm1395_vm15, %vm1396_vm14 }
 0x2dc   :  { %v1392_v61 = vsub.f32 1.0, %v1391_v59  ;;  %v1303_v46 = vmul.f32 %v2965_v27, %v3975_v36  ;;  %vm1308_vm6 = vweird.f32 %v2965_v27 }
 0x2dd   :  { %2966 = vrcp.f32 %v1285_v8  ;;  %v1272_v40 = vpop.f32.mrf.mxu1  ;;  %v1298_v20 = vand.u32 2147483648, %v1285_v8  ;;  %vm1292_vm3 = vweird.f32 %v1285_v8  ;;  %vm1309_vm8 = vmor %vm1307_vm7, %vm1308_vm6 }
 0x2de   :  { %v1393_v26 = vmul.f32 %v2961_v56, %v1392_v61  ;;  %2968 = vtanh.f32 %v1407_v44  ;;  %v1304_v52 = vsub.f32 1.0, %v1303_v46 }
 0x2df   :  { %v1299_v16 = vor.u32 1.1754944e-38, %v1298_v20  ;;  %v1311_v20 = vand.u32 2147483647, %v3975_v36 }
 0x2e0   :  { %v1394_v24 = vadd.f32 %v2961_v56, %v1393_v26  ;;  %v1296_v26 = vand.u32 2147483647, %v1285_v8  ;;  %v1305_v55 = vmul.f32 %v2965_v27, %v1304_v52  ;;  %v1313_v52 = vand.u32 2147483648, %v3975_v36 }
 0x2e1   :  { %vm1312_vm9 = vcmp.eq.f32.partialorder %v1311_v20, 8.507059e+37  ;;  %v4799_v20 = vld [vmem:[#allocation46_spill] sm:$0xff] }
 0x2e2   :  { %v1398_v3 = vsel %vm1397_vm0, %v2961_v56, %v1394_v24  ;;  %v1317_v24 = vadd.f32 %v4734_v49, %v3963_v41  ;;  %vm1297_vm5 = vcmp.eq.f32.partialorder %v1296_v26, 8.507059e+37  ;;  %v1306_v46 = vadd.f32 %v2965_v27, %v1305_v55  ;;  %v4788_v26 = vld [vmem:[#allocation9_spill] sm:$0xff] }
 0x2e3   :  { %v2967_v6 = vpop.eup %2966  ;;  %v1403_v38 = vsel %vm1400_vm1, %v1402_v42, %v1398_v3  ;;  %v1276_v42 = vadd.f32 %v1270_v37, %v4735_v28 }
 0x2e4   :  { %v1409_v0 = vsub.f32 1.0, %v1403_v38  ;;  %v1288_v57 = vmul.f32 %v2967_v6, %v1285_v8  ;;  %v2969_v59 = vpop.eup %2968  ;;  %v1411_v61 = vmul.f32 %v1403_v38, %v3868_v19  ;;  %vm1293_vm2 = vweird.f32 %v2967_v6 }
 0x2e5   :  { %vm1294_vm4 = vmor %vm1292_vm3, %vm1293_vm2  ;;  %v1310_v41 = vsel %vm1309_vm8, %v2965_v27, %v1306_v46  ;;  %v1314_v8 = vor.u32 1.1754944e-38, %v1313_v52  ;;  %v4783_v27 = vld [vmem:[#allocation70_spill] sm:$0xff]  ;;  %v4794_v46 = vld [vmem:[#allocation27_spill] sm:$0xff] }
 0x2e6   :  { %v1410_v40 = vmul.f32 %v2969_v59, %v1409_v0  ;;  %v1289_v10 = vsub.f32 1.0, %v1288_v57  ;;  %v4784_v59 = vld [vmem:[#allocation18_spill] sm:$0xff]  ;;  %v4795_v52 = vld [vmem:[#allocation41_spill] sm:$0xff] }
 0x2e7   :  { %v1315_v55 = vsel %vm1312_vm9, %v1314_v8, %v1310_v41  ;;  %v4801_v41 = vld [vmem:[#allocation36_spill] sm:$0xff]  ;;  %v4802_v8 = vld [vmem:[#allocation35_spill] sm:$0xff] }
 0x2e8   :  { %v3982_v44 = vadd.f32 %v1411_v61, %v1410_v40  ;;  %v1290_v7 = vmul.f32 %v2967_v6, %v1289_v10  ;;  %v1323_v37 = vmul.f32 %v1315_v55, %v3883_v18  ;;  %v4782_v18 = vld [vmem:[#allocation8_spill] sm:$0xff]  ;;  %v4785_v40 = vld [vmem:[#allocation77_spill] sm:$0xff] }
 0x2e9   :  { %v4786_v61 = vld [vmem:[#allocation16_spill] sm:$0xff] }
 0x2ea   :  { %v3986_v56 = vpack.c.bf16 %v3982_v44, %v3982_v44  ;;  %v1291_v31 = vadd.f32 %v2967_v6, %v1290_v7  ;;  %v4787_v7 = vld [vmem:[#allocation30_spill] sm:$0xff] }
 0x2ec   :  { %v1295_v19 = vsel %vm1294_vm4, %v2967_v6, %v1291_v31  ;;  %1422 = vmatmul.bf16.vlgmr.msrb.gmra.mxu1 %v3986_v56  ;;  %v1321_v6 = vsub.f32 1.0, %v1315_v55  ;;  %v4789_v31 = vld [vmem:[#allocation22_spill] sm:$0xff] }
 0x2ed   :  { %v1300_v10 = vsel %vm1297_vm5, %v1299_v16, %v1295_v19  ;;  %1570 = vmatpush.bf16.msrb.mxu1 %v3513_v11  ;;  %v4790_v16 = vld [vmem:[#allocation21_spill] sm:$0xff]  ;;  %v4792_v19 = vld [vmem:[#allocation11_spill] sm:$0xff]  ;;  %v4803_v55 = vld [vmem:[#allocation14_spill] sm:$0xff] }
 0x2ee   :  { %v1318_v3 = vmul.f32 %v1317_v24, %v1300_v10  ;;  %v4791_v24 = vld [vmem:[#allocation37_spill] sm:$0xff]  ;;  %v4793_v10 = vld [vmem:[#allocation31_spill] sm:$0xff] }
 0x2f0   :  { %v1319_v49 = vadd.f32 %v1318_v3, %v1276_v42  ;;  %v4797_v42 = vld [vmem:[#allocation34_spill] sm:$0xff]  ;;  %v4798_v3 = vld [vmem:[#allocation32_spill] sm:$0xff] }
 0x2f1   :  { %1571 = vmatpush.bf16.msrb.mxu1 %v3542_v62 }
 0x2f2   :  { %2970 = vtanh.f32 %v1319_v49  ;;  %v4800_v49 = vld [vmem:[#allocation13_spill] sm:$0xff] }
 0x2f5   :  { %1572 = vmatpush.bf16.msrb.mxu1 %v3571_v35 }
 0x2f8   :  { %v2971_v38 = vpop.eup %2970 }
 0x2f9   :  { %v1322_v0 = vmul.f32 %v2971_v38, %v1321_v6  ;;  %1573 = vmatpush.bf16.msrb.mxu1 %v3602_v2  ;;  %v4804_v6 = vld [vmem:[#allocation40_spill] sm:$0xff]  ;;  %v4805_v38 = vld [vmem:[#allocation39_spill] sm:$0xff] }
 0x2fb   :  { %v4000_v57 = vadd.f32 %v1323_v37, %v1322_v0  ;;  %v4806_v0 = vld [vmem:[#allocation15_spill] sm:$0xff]  ;;  %v4807_v37 = vld [vmem:[#allocation44_spill] sm:$0xff] }
 0x2fc   :  { %1474 = vmatmul.bf16.vlgmr.msra.gmra.mxu1 %v3986_v56 }
 0x2fd   :  { %v1325_v36 = vpack.c.bf16 %v4000_v57, %v4000_v57  ;;  %1574 = vmatpush.bf16.msrb.mxu1 %v3634_v32 }
 0x2ff   :  { %1334 = vmatmul.bf16.vlgmr.msra.gmra.mxu2 %v1325_v36  ;;  %1347 = vmatmul.bf16.vlgmr.msrb.gmra.mxu3 %v1325_v36 }
 0x300   :  { %1360 = vmatmul.bf16.vlgmr.msrb.gmra.mxu0 %v1325_v36  ;;  %1479 = vmatpush.bf16.msra.mxu2 %v3391_v50  ;;  %v4808_v36 = vld [vmem:[#allocation42_spill] sm:$0xff] }
 0x301   :  { %1544 = vmatpush.bf16.msrb.mxu3 %v3436_v17  ;;  %1557 = vmatpush.bf16.msrb.mxu0 %v3505_v45 }
 0x302   :  { %1575 = vmatpush.bf16.msrb.mxu1 %v4694_v58 }
 0x304   :  { %1480 = vmatpush.bf16.msra.mxu2 %v3394_v12 }
 0x305   :  { %1545 = vmatpush.bf16.msrb.mxu3 %v3472_v43  ;;  %1558 = vmatpush.bf16.msrb.mxu0 %v3536_v39 }
 0x306   :  { %1576 = vmatpush.bf16.msrb.mxu1 %v4700_v48 }
 0x308   :  { %1481 = vmatpush.bf16.msra.mxu2 %v3397_v53 }
 0x309   :  { %1546 = vmatpush.bf16.msrb.mxu3 %v3483_v54  ;;  %1559 = vmatpush.bf16.msrb.mxu0 %v3565_v51 }
 0x30a   :  { %1577 = vmatpush.bf16.msrb.mxu1 %v3705_v33 }
 0x30c   :  { %1482 = vmatpush.bf16.msra.mxu2 %v3400_v13 }
 0x30d   :  { %1547 = vmatpush.bf16.msrb.mxu3 %v3494_v22  ;;  %1560 = vmatpush.bf16.msrb.mxu0 %v3596_v30 }
 0x30e   :  { %1671 = vmatpush.bf16.msra.mxu1 %v3203_v9 }
 0x30f   :  { %1435 = vmatmul.bf16.vlgmr.msrb.gmra.mxu2 %v3986_v56  ;;  %1448 = vmatmul.bf16.vlgmr.msra.gmra.mxu3 %v3986_v56 }
 0x310   :  { %1461 = vmatmul.bf16.vlgmr.msra.gmra.mxu0 %v3986_v56  ;;  %1483 = vmatpush.bf16.msra.mxu2 %v3403_v21 }
 0x311   :  { %1548 = vmatpush.bf16.msrb.mxu3 %v3525_v63  ;;  %1561 = vmatpush.bf16.msrb.mxu0 %v3628_v23 }
 0x312   :  { %1672 = vmatpush.bf16.msra.mxu1 %v3260_v47 }
 0x314   :  { %1484 = vmatpush.bf16.msra.mxu2 %v3406_v29 }
 0x315   :  { %1549 = vmatpush.bf16.msrb.mxu3 %v3552_v5  ;;  %1562 = vmatpush.bf16.msrb.mxu0 %v3653_v15 }
 0x316   :  { %1673 = vmatpush.bf16.msra.mxu1 %v3278_v60 }
 0x318   :  { %1485 = vmatpush.bf16.msra.mxu2 %v4692_v34 }
 0x319   :  { %1550 = vmatpush.bf16.msrb.mxu3 %v4693_v25  ;;  %1563 = vmatpush.bf16.msrb.mxu0 %v4695_v4 }
 0x31a   :  { %1674 = vmatpush.bf16.msra.mxu1 %v4740_v14  ;;  %v4823_v14 = vld [vmem:[#allocation72_spill] sm:$0xff] }
 0x31c   :  { %1486 = vmatpush.bf16.msra.mxu2 %v4696_v1 }
 0x31d   :  { %1551 = vmatpush.bf16.msrb.mxu3 %v4783_v27  ;;  %1564 = vmatpush.bf16.msrb.mxu0 %v4785_v40 }
 0x31e   :  { %1675 = vmatpush.bf16.msra.mxu1 %v4787_v7 }
 0x31f   :  { %1487 = vmatmul.bf16.vlgmr.msra.gmra.mxu2 %v3986_v56  ;;  %v4796_v56 = vld [vmem:[#allocation12_spill] sm:$0xff] }
 0x320   :  { %1632 = vmatpush.bf16.msrb.mxu2 %v4782_v18 }
 0x321   :  { %1645 = vmatpush.bf16.msra.mxu3 %v4784_v59  ;;  %1658 = vmatpush.bf16.msra.mxu0 %v4786_v61 }
 0x322   :  { %1676 = vmatpush.bf16.msra.mxu1 %v4791_v24 }
 0x324   :  { %1633 = vmatpush.bf16.msrb.mxu2 %v4788_v26  ;;  %v4824_v26 = vld [vmem:[#allocation25_spill] sm:$0xff] }
 0x325   :  { %1646 = vmatpush.bf16.msra.mxu3 %v4789_v31  ;;  %1659 = vmatpush.bf16.msra.mxu0 %v4790_v16 }
 0x326   :  { %1677 = vmatpush.bf16.msra.mxu1 %v4795_v52  ;;  %v4809_v52 = vld [vmem:[#allocation17_spill] sm:$0xff] }
 0x328   :  { %1634 = vmatpush.bf16.msrb.mxu2 %v4792_v19 }
 0x329   :  { %1647 = vmatpush.bf16.msra.mxu3 %v4793_v10  ;;  %1660 = vmatpush.bf16.msra.mxu0 %v4794_v46 }
 0x32a   :  { %1678 = vmatpush.bf16.msra.mxu1 %v4799_v20  ;;  %v4810_v20 = vld [vmem:[#allocation10_spill] sm:$0xff] }
 0x32c   :  { %1635 = vmatpush.bf16.msrb.mxu2 %v4796_v56 }
 0x32d   :  { %1648 = vmatpush.bf16.msra.mxu3 %v4797_v42  ;;  %1661 = vmatpush.bf16.msra.mxu0 %v4798_v3 }
 0x330   :  { %1636 = vmatpush.bf16.msrb.mxu2 %v4800_v49  ;;  %v4811_v49 = vld [vmem:[#allocation48_spill] sm:$0xff] }
 0x331   :  { %1649 = vmatpush.bf16.msra.mxu3 %v4801_v41  ;;  %1662 = vmatpush.bf16.msra.mxu0 %v4802_v8  ;;  %v4812_v41 = vld [vmem:[#allocation45_spill] sm:$0xff]  ;;  %v4813_v8 = vld [vmem:[#allocation20_spill] sm:$0xff] }
 0x334   :  { %1637 = vmatpush.bf16.msrb.mxu2 %v4803_v55  ;;  %v4814_v55 = vld [vmem:[#allocation26_spill] sm:$0xff] }
 0x335   :  { %1650 = vmatpush.bf16.msra.mxu3 %v4804_v6  ;;  %1663 = vmatpush.bf16.msra.mxu0 %v4805_v38  ;;  %v4815_v6 = vld [vmem:[#allocation29_spill] sm:$0xff] }
 0x336   :  { %v4816_v38 = vld [vmem:[#allocation33_spill] sm:$0xff] }
 0x338   :  { %1638 = vmatpush.bf16.msrb.mxu2 %v4806_v0  ;;  %v4817_v0 = vld [vmem:[#allocation38_spill] sm:$0xff] }
 0x339   :  { %1651 = vmatpush.bf16.msra.mxu3 %v4807_v37  ;;  %1664 = vmatpush.bf16.msra.mxu0 %v4808_v36  ;;  %v4818_v37 = vld [vmem:[#allocation43_spill] sm:$0xff] }
 0x33a   :  { %v4819_v36 = vld [vmem:[#allocation47_spill] sm:$0xff] }
 0x33c   :  { %1639 = vmatpush.bf16.msrb.mxu2 %v4809_v52  ;;  %v4820_v52 = vld [vmem:[#allocation24_spill] sm:$0xff] }
 0x33d   :  { %1652 = vmatpush.bf16.msra.mxu3 %v4811_v49  ;;  %1665 = vmatpush.bf16.msra.mxu0 %v4812_v41 }
 0x340   :  { %1684 = vmatpush.bf16.msra.mxu2 %v4810_v20  ;;  %v4821_v20 = vld [vmem:[#allocation58_spill] sm:$0xff] }
 0x341   :  { %v154_v24 = vadd.f32 %v4821_v20, %v4820_v52 }
 0x344   :  { %1685 = vmatpush.bf16.msra.mxu2 %v4813_v8 }
 0x348   :  { %1686 = vmatpush.bf16.msra.mxu2 %v4814_v55 }
 0x34c   :  { %1687 = vmatpush.bf16.msra.mxu2 %v4815_v6 }
 0x350   :  { %1688 = vmatpush.bf16.msra.mxu2 %v4816_v38 }
 0x354   :  { %1689 = vmatpush.bf16.msra.mxu2 %v4817_v0  ;;  %v4822_v0 = vld [vmem:[#allocation75_spill] sm:$0xff] }
 0x358   :  { %1690 = vmatpush.bf16.msra.mxu2 %v4818_v37 }
 0x35c   :  { %1691 = vmatpush.bf16.msra.mxu2 %v4819_v36 }
 0x369   :  { %v1423_v49 = vpop.f32.mrf.mxu1 }
 0x36a   :  { %v1583_v3 = vadd.f32 %v1423_v49, %v154_v24 }
 0x36c   :  { %v2804_v41 = vmul.f32 -1.442695, %v1583_v3 }
 0x36e   :  { %2972 = vpow2.f32 %v2804_v41 }
 0x371   :  { %v1425_v8 = vpop.f32.mrf.mxu1 }
 0x374   :  { %v2973_v42 = vpop.eup %2972 }
 0x375   :  { %v1591_v55 = vadd.f32 1.0, %v2973_v42 }
 0x377   :  { %2974 = vrcp.f32 %v1591_v55  ;;  %v1604_v31 = vand.u32 2147483648, %v1591_v55  ;;  %vm1598_vm11 = vweird.f32 %v1591_v55 }
 0x379   :  { %v1475_v6 = vpop.f32.mrf.mxu1 }
 0x37a   :  { %v1493_v7 = vadd.f32 %v1475_v6, %v4822_v0  ;;  %v1602_v6 = vand.u32 2147483647, %v1591_v55 }
 0x37c   :  { %vm1603_vm13 = vcmp.eq.f32.partialorder %v1602_v6, 8.507059e+37 }
 0x37d   :  { %v4079_v56 = vpop.f32.mrf.mxu0  ;;  %v2975_v38 = vpop.eup %2974 }
 0x37e   :  { %v1594_v46 = vmul.f32 %v2975_v38, %v1591_v55  ;;  %vm1599_vm10 = vweird.f32 %v2975_v38  ;;  %v4827_v55 = vld [vmem:[#allocation49_spill] sm:$0xff] }
 0x37f   :  { %vm1600_vm12 = vmor %vm1598_vm11, %vm1599_vm10 }
 0x380   :  { %v1595_v52 = vsub.f32 1.0, %v1594_v46 }
 0x381   :  { %v1477_v37 = vpop.f32.mrf.mxu1 }
 0x382   :  { %v1335_v36 = vpop.f32.mrf.mxu2  ;;  %v1348_v10 = vpop.f32.mrf.mxu3  ;;  %v1596_v3 = vmul.f32 %v2975_v38, %v1595_v52 }
 0x383   :  { %v1496_v19 = vadd.f32 %v1493_v7, %v1348_v10  ;;  %v4825_v7 = vld [vmem:[#allocation59_spill] sm:$0xff] }
 0x384   :  { %v1597_v8 = vadd.f32 %v2975_v38, %v1596_v3  ;;  %v195_v10 = vadd.f32 %v4825_v7, %v4824_v26  ;;  %v4826_v3 = vld [vmem:[#allocation50_spill] sm:$0xff] }
 0x385   :  { %v1363_v20 = vpop.f32.mrf.mxu0  ;;  %v2803_v24 = vmul.f32 -1.442695, %v1496_v19 }
 0x386   :  { %v1601_v46 = vsel %vm1600_vm12, %v2975_v38, %v1597_v8 }
 0x387   :  { %2976 = vpow2.f32 %v2803_v24 }
 0x38a   :  { %v1337_v49 = vpop.f32.mrf.mxu2  ;;  %v1350_v41 = vpop.f32.mrf.mxu3 }
 0x38b   :  { %v1605_v49 = vor.u32 1.1754944e-38, %v1604_v31 }
 0x38d   :  { %v1462_v42 = vpop.f32.mrf.mxu0  ;;  %v2977_v0 = vpop.eup %2976 }
 0x38e   :  { %v1492_v16 = vadd.f32 %v1462_v42, %v4823_v14  ;;  %v4086_v60 = vadd.f32 1.0, %v2977_v0  ;;  %v1606_v42 = vsel %vm1603_vm13, %v1605_v49, %v1601_v46 }
 0x390   :  { %v1495_v37 = vadd.f32 %v1492_v16, %v1335_v36  ;;  %v4828_v16 = vld [vmem:[#allocation60_spill] sm:$0xff]  ;;  %v1531_v59 = vand.u32 2147483648, %v4086_v60  ;;  %vm1525_vm6 = vweird.f32 %v4086_v60 }
 0x391   :  { %v236_v36 = vadd.f32 %v4828_v16, %v4827_v55 }
 0x392   :  { %v2802_v19 = vmul.f32 -1.442695, %v1495_v37  ;;  %v1436_v52 = vpop.f32.mrf.mxu2  ;;  %v1449_v20 = vpop.f32.mrf.mxu3 }
 0x393   :  { %v1584_v24 = vadd.f32 %v1436_v52, %v195_v10  ;;  %v1623_v41 = vadd.f32 %v4826_v3, %v1449_v20 }
 0x394   :  { %2978 = vpow2.f32 %v2802_v19 }
 0x395   :  { %v2805_v14 = vmul.f32 -1.442695, %v1584_v24  ;;  %v1624_v61 = vmul.f32 %v1623_v41, %v1606_v42  ;;  %v1464_v40 = vpop.f32.mrf.mxu0 }
 0x397   :  { %2980 = vpow2.f32 %v2805_v14  ;;  %v1625_v38 = vadd.f32 %v1624_v61, %v236_v36 }
 0x398   :  { %2982 = vrcp.f32 %v4086_v60 }
 0x39a   :  { %v2979_v8 = vpop.eup %2978  ;;  %v1438_v31 = vpop.f32.mrf.mxu2 }
 0x39b   :  { %v1451_v37 = vpop.f32.mrf.mxu3  ;;  %v1503_v6 = vadd.f32 1.0, %v2979_v8  ;;  %v4095_v8 = vld [vmem:[%s4493_s7] ss:$0 sm:$0xff] }
 0x39c   :  { %v1535_v31 = vadd.f32 %v4095_v8, %v4079_v56 }
 0x39d   :  { %v2981_v7 = vpop.eup %2980  ;;  %2984 = vrcp.f32 %v1503_v6  ;;  %v1516_v24 = vand.u32 2147483648, %v1503_v6  ;;  %v1514_v42 = vand.u32 2147483647, %v1503_v6  ;;  %vm1510_vm15 = vweird.f32 %v1503_v6 }
 0x39e   :  { %v2983_v0 = vpop.eup %2982  ;;  %v1592_v10 = vadd.f32 1.0, %v2981_v7 }
 0x39f   :  { %v1521_v46 = vmul.f32 %v2983_v0, %v4086_v60  ;;  %vm1526_vm2 = vweird.f32 %v2983_v0  ;;  %vm1515_vm3 = vcmp.eq.f32.partialorder %v1514_v42, 8.507059e+37 }
 0x3a0   :  { %2986 = vrcp.f32 %v1592_v10  ;;  %v1619_v37 = vand.u32 2147483648, %v1592_v10  ;;  %v1617_v55 = vand.u32 2147483647, %v1592_v10  ;;  %vm1613_vm4 = vweird.f32 %v1592_v10  ;;  %vm1527_vm8 = vmor %vm1525_vm6, %vm1526_vm2 }
 0x3a1   :  { %v1522_v49 = vsub.f32 1.0, %v1521_v46  ;;  %2988 = vtanh.f32 %v1625_v38 }
 0x3a2   :  { %v1488_v19 = vpop.f32.mrf.mxu2  ;;  %v1620_v56 = vor.u32 1.1754944e-38, %v1619_v37  ;;  %vm1618_vm7 = vcmp.eq.f32.partialorder %v1617_v55, 8.507059e+37 }
 0x3a3   :  { %v2985_v52 = vpop.eup %2984  ;;  %v1523_v16 = vmul.f32 %v2983_v0, %v1522_v49 }
 0x3a4   :  { %v1506_v20 = vmul.f32 %v2985_v52, %v1503_v6  ;;  %vm1511_vm14 = vweird.f32 %v2985_v52  ;;  %v1494_v6 = vadd.f32 %v1488_v19, %v4735_v28 }
 0x3a5   :  { %vm1512_vm1 = vmor %vm1510_vm15, %vm1511_vm14  ;;  %v1524_v26 = vadd.f32 %v2983_v0, %v1523_v16 }
 0x3a6   :  { %v2987_v40 = vpop.eup %2986  ;;  %v1507_v14 = vsub.f32 1.0, %v1506_v20 }
 0x3a7   :  { %v1609_v61 = vmul.f32 %v2987_v40, %v1592_v10  ;;  %vm1614_vm0 = vweird.f32 %v2987_v40  ;;  %v1528_v42 = vsel %vm1527_vm8, %v2983_v0, %v1524_v26  ;;  %v2989_v16 = vpop.eup %2988  ;;  %v4830_v26 = vld [vmem:[#allocation77_spill] sm:$0xff]  ;;  %v4831_v0 = vld [vmem:[#allocation16_spill] sm:$0xff] }
 0x3a8   :  { %v1508_v41 = vmul.f32 %v2985_v52, %v1507_v14  ;;  %v1517_v14 = vor.u32 1.1754944e-38, %v1516_v24  ;;  %vm1615_vm5 = vmor %vm1613_vm4, %vm1614_vm0  ;;  %v1529_v24 = vand.u32 2147483647, %v4086_v60 }
 0x3a9   :  { %v1610_v36 = vsub.f32 1.0, %v1609_v61 }
 0x3aa   :  { %v1509_v7 = vadd.f32 %v2985_v52, %v1508_v41  ;;  %v1490_v46 = vpop.f32.mrf.mxu2  ;;  %vm1530_vm9 = vcmp.eq.f32.partialorder %v1529_v24, 8.507059e+37  ;;  %v4839_v24 = vld [vmem:[#allocation27_spill] sm:$0xff] }
 0x3ab   :  { %v1611_v20 = vmul.f32 %v2987_v40, %v1610_v36 }
 0x3ac   :  { %v1513_v49 = vsel %vm1512_vm1, %v2985_v52, %v1509_v7  ;;  %v1532_v7 = vor.u32 1.1754944e-38, %v1531_v59 }
 0x3ad   :  { %v1612_v61 = vadd.f32 %v2987_v40, %v1611_v20  ;;  %v1518_v3 = vsel %vm1515_vm3, %v1517_v14, %v1513_v49  ;;  %v4832_v14 = vld [vmem:[#allocation23_spill] sm:$0xff]  ;;  %v4833_v49 = vld [vmem:[#allocation9_spill] sm:$0xff] }
 0x3ae   :  { %v1536_v41 = vmul.f32 %v1535_v31, %v1518_v3  ;;  %v1533_v3 = vsel %vm1530_vm9, %v1532_v7, %v1528_v42  ;;  %v4843_v42 = vld [vmem:[#allocation32_spill] sm:$0xff]  ;;  %v4845_v7 = vld [vmem:[#allocation13_spill] sm:$0xff] }
 0x3af   :  { %v1616_v36 = vsel %vm1615_vm5, %v2987_v40, %v1612_v61  ;;  %v1539_v60 = vsub.f32 1.0, %v1533_v3  ;;  %v1541_v20 = vmul.f32 %v1533_v3, %v4000_v57  ;;  %v4829_v57 = vld [vmem:[#allocation18_spill] sm:$0xff]  ;;  %v4848_v3 = vld [vmem:[#allocation41_spill] sm:$0xff] }
 0x3b0   :  { %v1621_v38 = vsel %vm1618_vm7, %v1620_v56, %v1616_v36  ;;  %v1537_v52 = vadd.f32 %v1536_v41, %v1494_v6  ;;  %v4834_v61 = vld [vmem:[#allocation22_spill] sm:$0xff]  ;;  %v4835_v56 = vld [vmem:[#allocation21_spill] sm:$0xff]  ;;  %v4836_v6 = vld [vmem:[#allocation28_spill] sm:$0xff] }
 0x3b1   :  { %v1627_v10 = vsub.f32 1.0, %v1621_v38  ;;  %v1629_v37 = vmul.f32 %v1621_v38, %v3982_v44  ;;  %v4837_v41 = vld [vmem:[#allocation11_spill] sm:$0xff]  ;;  %v4840_v38 = vld [vmem:[#allocation30_spill] sm:$0xff] }
 0x3b2   :  { %2990 = vtanh.f32 %v1537_v52  ;;  %v4838_v36 = vld [vmem:[#allocation31_spill] sm:$0xff]  ;;  %v4841_v52 = vld [vmem:[#allocation12_spill] sm:$0xff] }
 0x3b3   :  { %v1628_v46 = vmul.f32 %v2989_v16, %v1627_v10  ;;  %v4842_v10 = vld [vmem:[#allocation34_spill] sm:$0xff]  ;;  %v4844_v16 = vld [vmem:[#allocation37_spill] sm:$0xff] }
 0x3b5   :  { %v4105_v19 = vadd.f32 %v1629_v37, %v1628_v46  ;;  %v4846_v46 = vld [vmem:[#allocation36_spill] sm:$0xff]  ;;  %v4847_v37 = vld [vmem:[#allocation35_spill] sm:$0xff] }
 0x3b7   :  { %v1631_v55 = vpack.c.bf16 %v4105_v19, %v4105_v19 }
 0x3b8   :  { %v2991_v40 = vpop.eup %2990 }
 0x3b9   :  { %v1540_v31 = vmul.f32 %v2991_v40, %v1539_v60  ;;  %1640 = vmatmul.bf16.vlgmr.msrb.gmra.mxu2 %v1631_v55  ;;  %v4850_v60 = vld [vmem:[#allocation40_spill] sm:$0xff]  ;;  %v4851_v40 = vld [vmem:[#allocation39_spill] sm:$0xff] }
 0x3ba   :  { %1788 = vmatpush.bf16.msrb.mxu2 %v3513_v11 }
 0x3bb   :  { %v4111_v59 = vadd.f32 %v1541_v20, %v1540_v31  ;;  %v4852_v31 = vld [vmem:[#allocation46_spill] sm:$0xff]  ;;  %v4853_v20 = vld [vmem:[#allocation15_spill] sm:$0xff] }
 0x3bd   :  { %v1543_v44 = vpack.c.bf16 %v4111_v59, %v4111_v59 }
 0x3be   :  { %1789 = vmatpush.bf16.msrb.mxu2 %v3542_v62 }
 0x3bf   :  { %1552 = vmatmul.bf16.vlgmr.msrb.gmra.mxu3 %v1543_v44  ;;  %1565 = vmatmul.bf16.vlgmr.msrb.gmra.mxu0 %v1543_v44 }
 0x3c0   :  { %1578 = vmatmul.bf16.vlgmr.msrb.gmra.mxu1 %v1543_v44  ;;  %1697 = vmatpush.bf16.msrb.mxu3 %v3391_v50  ;;  %v4854_v44 = vld [vmem:[#allocation44_spill] sm:$0xff] }
 0x3c1   :  { %1762 = vmatpush.bf16.msrb.mxu0 %v3436_v17  ;;  %1775 = vmatpush.bf16.msrb.mxu1 %v3505_v45 }
 0x3c2   :  { %1790 = vmatpush.bf16.msrb.mxu2 %v3571_v35 }
 0x3c4   :  { %1698 = vmatpush.bf16.msrb.mxu3 %v3394_v12 }
 0x3c5   :  { %1763 = vmatpush.bf16.msrb.mxu0 %v3472_v43  ;;  %1776 = vmatpush.bf16.msrb.mxu1 %v3536_v39 }
 0x3c6   :  { %1791 = vmatpush.bf16.msrb.mxu2 %v3602_v2 }
 0x3c8   :  { %1699 = vmatpush.bf16.msrb.mxu3 %v3397_v53 }
 0x3c9   :  { %1692 = vmatmul.bf16.vlgmr.msra.gmra.mxu2 %v1631_v55  ;;  %1764 = vmatpush.bf16.msrb.mxu0 %v3483_v54 }
 0x3ca   :  { %1777 = vmatpush.bf16.msrb.mxu1 %v3565_v51  ;;  %1792 = vmatpush.bf16.msrb.mxu2 %v3634_v32 }
 0x3cc   :  { %1700 = vmatpush.bf16.msrb.mxu3 %v3400_v13 }
 0x3cd   :  { %1765 = vmatpush.bf16.msrb.mxu0 %v3494_v22 }
 0x3ce   :  { %1778 = vmatpush.bf16.msrb.mxu1 %v3596_v30  ;;  %1793 = vmatpush.bf16.msrb.mxu2 %v4694_v58 }
 0x3cf   :  { %1653 = vmatmul.bf16.vlgmr.msra.gmra.mxu3 %v1631_v55  ;;  %1666 = vmatmul.bf16.vlgmr.msra.gmra.mxu0 %v1631_v55 }
 0x3d0   :  { %1679 = vmatmul.bf16.vlgmr.msra.gmra.mxu1 %v1631_v55  ;;  %1701 = vmatpush.bf16.msrb.mxu3 %v3403_v21 }
 0x3d1   :  { %1766 = vmatpush.bf16.msrb.mxu0 %v3525_v63 }
 0x3d2   :  { %1779 = vmatpush.bf16.msrb.mxu1 %v3628_v23  ;;  %1794 = vmatpush.bf16.msrb.mxu2 %v4700_v48 }
 0x3d4   :  { %1702 = vmatpush.bf16.msrb.mxu3 %v3406_v29 }
 0x3d5   :  { %1767 = vmatpush.bf16.msrb.mxu0 %v3552_v5 }
 0x3d6   :  { %1780 = vmatpush.bf16.msrb.mxu1 %v3653_v15  ;;  %1795 = vmatpush.bf16.msrb.mxu2 %v3705_v33 }
 0x3d8   :  { %1703 = vmatpush.bf16.msrb.mxu3 %v4692_v34 }
 0x3d9   :  { %1768 = vmatpush.bf16.msrb.mxu0 %v4693_v25 }
 0x3da   :  { %1889 = vmatpush.bf16.msra.mxu2 %v3203_v9  ;;  %1781 = vmatpush.bf16.msrb.mxu1 %v4695_v4 }
 0x3dc   :  { %1704 = vmatpush.bf16.msrb.mxu3 %v4696_v1 }
 0x3dd   :  { %1769 = vmatpush.bf16.msrb.mxu0 %v4783_v27 }
 0x3de   :  { %1890 = vmatpush.bf16.msra.mxu2 %v3260_v47  ;;  %1782 = vmatpush.bf16.msrb.mxu1 %v4830_v26 }
 0x3df   :  { %1705 = vmatmul.bf16.vlgmr.msrb.gmra.mxu3 %v1631_v55  ;;  %v4849_v55 = vld [vmem:[#allocation14_spill] sm:$0xff] }
 0x3e0   :  { %1850 = vmatpush.bf16.msra.mxu3 %v4782_v18 }
 0x3e1   :  { %1863 = vmatpush.bf16.msra.mxu0 %v4829_v57 }
 0x3e2   :  { %1876 = vmatpush.bf16.msra.mxu1 %v4831_v0  ;;  %1891 = vmatpush.bf16.msra.mxu2 %v4832_v14 }
 0x3e4   :  { %1851 = vmatpush.bf16.msra.mxu3 %v4833_v49 }
 0x3e5   :  { %1864 = vmatpush.bf16.msra.mxu0 %v4834_v61 }
 0x3e6   :  { %1877 = vmatpush.bf16.msra.mxu1 %v4835_v56  ;;  %1892 = vmatpush.bf16.msra.mxu2 %v4836_v6  ;;  %v4869_v6 = vld [vmem:[#allocation75_spill] sm:$0xff] }
 0x3e8   :  { %1852 = vmatpush.bf16.msra.mxu3 %v4837_v41 }
 0x3e9   :  { %1865 = vmatpush.bf16.msra.mxu0 %v4838_v36 }
 0x3ea   :  { %1878 = vmatpush.bf16.msra.mxu1 %v4839_v24  ;;  %1893 = vmatpush.bf16.msra.mxu2 %v4840_v38 }
 0x3ec   :  { %1853 = vmatpush.bf16.msra.mxu3 %v4841_v52 }
 0x3ed   :  { %1866 = vmatpush.bf16.msra.mxu0 %v4842_v10 }
 0x3ee   :  { %1879 = vmatpush.bf16.msra.mxu1 %v4843_v42  ;;  %1894 = vmatpush.bf16.msra.mxu2 %v4844_v16  ;;  %v4855_v16 = vld [vmem:[#allocation42_spill] sm:$0xff] }
 0x3f0   :  { %1854 = vmatpush.bf16.msra.mxu3 %v4845_v7  ;;  %v4856_v7 = vld [vmem:[#allocation17_spill] sm:$0xff] }
 0x3f1   :  { %1867 = vmatpush.bf16.msra.mxu0 %v4846_v46  ;;  %v4857_v46 = vld [vmem:[#allocation10_spill] sm:$0xff] }
 0x3f2   :  { %1880 = vmatpush.bf16.msra.mxu1 %v4847_v37  ;;  %1895 = vmatpush.bf16.msra.mxu2 %v4848_v3  ;;  %v4858_v37 = vld [vmem:[#allocation48_spill] sm:$0xff]  ;;  %v4859_v3 = vld [vmem:[#allocation45_spill] sm:$0xff] }
 0x3f4   :  { %1855 = vmatpush.bf16.msra.mxu3 %v4849_v55  ;;  %v4860_v55 = vld [vmem:[#allocation20_spill] sm:$0xff] }
 0x3f5   :  { %1868 = vmatpush.bf16.msra.mxu0 %v4850_v60  ;;  %v4861_v60 = vld [vmem:[#allocation26_spill] sm:$0xff] }
 0x3f6   :  { %1881 = vmatpush.bf16.msra.mxu1 %v4851_v40  ;;  %1896 = vmatpush.bf16.msra.mxu2 %v4852_v31  ;;  %v4862_v40 = vld [vmem:[#allocation29_spill] sm:$0xff] }
 0x3f7   :  { %v4863_v31 = vld [vmem:[#allocation33_spill] sm:$0xff] }
 0x3f8   :  { %1856 = vmatpush.bf16.msra.mxu3 %v4853_v20  ;;  %v4864_v20 = vld [vmem:[#allocation38_spill] sm:$0xff] }
 0x3f9   :  { %1869 = vmatpush.bf16.msra.mxu0 %v4854_v44  ;;  %v4865_v44 = vld [vmem:[#allocation43_spill] sm:$0xff] }
 0x3fa   :  { %1882 = vmatpush.bf16.msra.mxu1 %v4855_v16  ;;  %v4866_v16 = vld [vmem:[#allocation47_spill] sm:$0xff] }
 0x3fc   :  { %1857 = vmatpush.bf16.msra.mxu3 %v4856_v7  ;;  %v4867_v7 = vld [vmem:[#allocation24_spill] sm:$0xff] }
 0x3fd   :  { %1870 = vmatpush.bf16.msra.mxu0 %v4858_v37 }
 0x3fe   :  { %1883 = vmatpush.bf16.msra.mxu1 %v4859_v3 }
 0x400   :  { %1902 = vmatpush.bf16.msrb.mxu3 %v4857_v46  ;;  %v4868_v46 = vld [vmem:[#allocation61_spill] sm:$0xff] }
 0x401   :  { %v157_v42 = vadd.f32 %v4868_v46, %v4867_v7  ;;  %v4870_v7 = vld [vmem:[#allocation72_spill] sm:$0xff] }
 0x404   :  { %1903 = vmatpush.bf16.msrb.mxu3 %v4860_v55 }
 0x408   :  { %1904 = vmatpush.bf16.msrb.mxu3 %v4861_v60 }
 0x40c   :  { %1905 = vmatpush.bf16.msrb.mxu3 %v4862_v40 }
 0x410   :  { %1906 = vmatpush.bf16.msrb.mxu3 %v4863_v31 }
 0x414   :  { %1907 = vmatpush.bf16.msrb.mxu3 %v4864_v20 }
 0x418   :  { %1908 = vmatpush.bf16.msrb.mxu3 %v4865_v44 }
 0x41c   :  { %1909 = vmatpush.bf16.msrb.mxu3 %v4866_v16 }
 0x43c   :  { %v1566_v37 = vpop.f32.mrf.mxu0  ;;  %v1641_v10 = vpop.f32.mrf.mxu2 }
 0x43d   :  { %v4188_v3 = vpop.f32.mrf.mxu1  ;;  %v1801_v55 = vadd.f32 %v1641_v10, %v157_v42  ;;  %v4871_v42 = vld [vmem:[#allocation25_spill] sm:$0xff] }
 0x43f   :  { %v2808_v52 = vmul.f32 -1.442695, %v1801_v55 }
 0x441   :  { %2992 = vpow2.f32 %v2808_v52  ;;  %v4872_v52 = vld [vmem:[#allocation62_spill] sm:$0xff] }
 0x442   :  { %v1553_v60 = vpop.f32.mrf.mxu3  ;;  %v198_v55 = vadd.f32 %v4872_v52, %v4871_v42 }
 0x444   :  { %v1568_v40 = vpop.f32.mrf.mxu0  ;;  %v1643_v38 = vpop.f32.mrf.mxu2 }
 0x445   :  { %v1581_v31 = vpop.f32.mrf.mxu1 }
 0x447   :  { %v2993_v24 = vpop.eup %2992 }
 0x448   :  { %v1809_v20 = vadd.f32 1.0, %v2993_v24 }
 0x44a   :  { %2994 = vrcp.f32 %v1809_v20  ;;  %v1555_v44 = vpop.f32.mrf.mxu3  ;;  %vm1816_vm11 = vweird.f32 %v1809_v20  ;;  %v1820_v52 = vand.u32 2147483647, %v1809_v20 }
 0x44c   :  { %v1667_v36 = vpop.f32.mrf.mxu0  ;;  %v1693_v16 = vpop.f32.mrf.mxu2  ;;  %vm1821_vm13 = vcmp.eq.f32.partialorder %v1820_v52, 8.507059e+37 }
 0x44d   :  { %v1680_v41 = vpop.f32.mrf.mxu1  ;;  %v1711_v46 = vadd.f32 %v1693_v16, %v4869_v6 }
 0x44e   :  { %v1710_v56 = vadd.f32 %v1680_v41, %v4870_v7  ;;  %v4875_v7 = vld [vmem:[#allocation63_spill] sm:$0xff] }
 0x44f   :  { %v1714_v61 = vadd.f32 %v1711_v46, %v1566_v37 }
 0x450   :  { %v2995_v49 = vpop.eup %2994  ;;  %v1713_v10 = vadd.f32 %v1710_v56, %v1553_v60 }
 0x451   :  { %v1812_v40 = vmul.f32 %v2995_v49, %v1809_v20  ;;  %v2807_v38 = vmul.f32 -1.442695, %v1714_v61  ;;  %vm1817_vm10 = vweird.f32 %v2995_v49  ;;  %v1822_v61 = vand.u32 2147483648, %v1809_v20 }
 0x452   :  { %v2806_v31 = vmul.f32 -1.442695, %v1713_v10  ;;  %v1654_v14 = vpop.f32.mrf.mxu3  ;;  %vm1818_vm12 = vmor %vm1816_vm11, %vm1817_vm10 }
 0x453   :  { %v1813_v24 = vsub.f32 1.0, %v1812_v40  ;;  %2996 = vpow2.f32 %v2807_v38  ;;  %v1802_v44 = vadd.f32 %v1654_v14, %v198_v55  ;;  %v1823_v55 = vor.u32 1.1754944e-38, %v1822_v61  ;;  %v4873_v40 = vld [vmem:[#allocation50_spill] sm:$0xff] }
 0x454   :  { %2998 = vpow2.f32 %v2806_v31  ;;  %v1669_v0 = vpop.f32.mrf.mxu0  ;;  %v1695_v26 = vpop.f32.mrf.mxu2  ;;  %v1841_v38 = vadd.f32 %v4873_v40, %v1667_v36  ;;  %v1753_v40 = vadd.f32 %v4095_v8, %v4188_v3 }
 0x455   :  { %v2809_v57 = vmul.f32 -1.442695, %v1802_v44  ;;  %v1682_v16 = vpop.f32.mrf.mxu1  ;;  %v1814_v6 = vmul.f32 %v2995_v49, %v1813_v24 }
 0x457   :  { %3000 = vpow2.f32 %v2809_v57  ;;  %v1815_v56 = vadd.f32 %v2995_v49, %v1814_v6 }
 0x459   :  { %v2997_v41 = vpop.eup %2996  ;;  %v1819_v26 = vsel %vm1818_vm12, %v2995_v49, %v1815_v56 }
 0x45a   :  { %v2999_v37 = vpop.eup %2998  ;;  %v4194_v60 = vadd.f32 1.0, %v2997_v41  ;;  %v1656_v46 = vpop.f32.mrf.mxu3  ;;  %v1824_v57 = vsel %vm1821_vm13, %v1823_v55, %v1819_v26 }
 0x45b   :  { %v1721_v10 = vadd.f32 1.0, %v2999_v37  ;;  %v1842_v16 = vmul.f32 %v1841_v38, %v1824_v57  ;;  %v4874_v46 = vld [vmem:[#allocation49_spill] sm:$0xff] }
 0x45c   :  { %3002 = vrcp.f32 %v4194_v60  ;;  %v239_v42 = vadd.f32 %v4875_v7, %v4874_v46  ;;  %vm1743_vm6 = vweird.f32 %v4194_v60 }
 0x45d   :  { %v3001_v14 = vpop.eup %3000  ;;  %3004 = vrcp.f32 %v1721_v10  ;;  %v1734_v61 = vand.u32 2147483648, %v1721_v10  ;;  %v1732_v26 = vand.u32 2147483647, %v1721_v10  ;;  %vm1728_vm15 = vweird.f32 %v1721_v10 }
 0x45e   :  { %v1810_v0 = vadd.f32 1.0, %v3001_v14  ;;  %v1843_v52 = vadd.f32 %v1842_v16, %v239_v42 }
 0x45f   :  { %v1735_v7 = vor.u32 1.1754944e-38, %v1734_v61  ;;  %vm1733_vm3 = vcmp.eq.f32.partialorder %v1732_v26, 8.507059e+37  ;;  %v1747_v61 = vand.u32 2147483647, %v4194_v60 }
 0x460   :  { %3006 = vrcp.f32 %v1810_v0  ;;  %v1837_v27 = vand.u32 2147483648, %v1810_v0  ;;  %v1835_v18 = vand.u32 2147483647, %v1810_v0  ;;  %vm1831_vm2 = vweird.f32 %v1810_v0 }
 0x461   :  { %3008 = vtanh.f32 %v1843_v52  ;;  %vm1748_vm9 = vcmp.eq.f32.partialorder %v1747_v61, 8.507059e+37  ;;  %v4887_v61 = vld [vmem:[#allocation31_spill] sm:$0xff] }
 0x462   :  { %v3003_v6 = vpop.eup %3002  ;;  %v1706_v31 = vpop.f32.mrf.mxu3  ;;  %v1838_v3 = vor.u32 1.1754944e-38, %v1837_v27  ;;  %vm1836_vm7 = vcmp.eq.f32.partialorder %v1835_v18, 8.507059e+37 }
 0x463   :  { %v3005_v24 = vpop.eup %3004  ;;  %v1739_v44 = vmul.f32 %v3003_v6, %v4194_v60  ;;  %vm1744_vm4 = vweird.f32 %v3003_v6 }
 0x464   :  { %v1724_v20 = vmul.f32 %v3005_v24, %v1721_v10  ;;  %vm1729_vm14 = vweird.f32 %v3005_v24  ;;  %v1712_v10 = vadd.f32 %v1706_v31, %v4735_v28  ;;  %vm1745_vm8 = vmor %vm1743_vm6, %vm1744_vm4 }
 0x465   :  { %v1740_v41 = vsub.f32 1.0, %v1739_v44  ;;  %vm1730_vm1 = vmor %vm1728_vm15, %vm1729_vm14 }
 0x466   :  { %v3007_v37 = vpop.eup %3006  ;;  %v1725_v49 = vsub.f32 1.0, %v1724_v20 }
 0x467   :  { %v1827_v56 = vmul.f32 %v3007_v37, %v1810_v0  ;;  %v1741_v55 = vmul.f32 %v3003_v6, %v1740_v41  ;;  %vm1832_vm0 = vweird.f32 %v3007_v37 }
 0x468   :  { %v1726_v14 = vmul.f32 %v3005_v24, %v1725_v49  ;;  %v1749_v49 = vand.u32 2147483648, %v4194_v60  ;;  %vm1833_vm5 = vmor %vm1831_vm2, %vm1832_vm0 }
 0x469   :  { %v1828_v36 = vsub.f32 1.0, %v1827_v56  ;;  %v1742_v41 = vadd.f32 %v3003_v6, %v1741_v55  ;;  %v3009_v55 = vpop.eup %3008 }
 0x46a   :  { %v1727_v57 = vadd.f32 %v3005_v24, %v1726_v14  ;;  %v1708_v38 = vpop.f32.mrf.mxu3 }
 0x46b   :  { %v1829_v44 = vmul.f32 %v3007_v37, %v1828_v36  ;;  %v1746_v26 = vsel %vm1745_vm8, %v3003_v6, %v1742_v41  ;;  %v1750_v36 = vor.u32 1.1754944e-38, %v1749_v49  ;;  %v4881_v41 = vld [vmem:[#allocation23_spill] sm:$0xff]  ;;  %v4882_v49 = vld [vmem:[#allocation9_spill] sm:$0xff] }
 0x46c   :  { %v1731_v42 = vsel %vm1730_vm1, %v3005_v24, %v1727_v57 }
 0x46d   :  { %v1830_v16 = vadd.f32 %v3007_v37, %v1829_v44  ;;  %v1736_v20 = vsel %vm1733_vm3, %v1735_v7, %v1731_v42  ;;  %v1751_v31 = vsel %vm1748_vm9, %v1750_v36, %v1746_v26  ;;  %v4877_v7 = vld [vmem:[#allocation70_spill] sm:$0xff]  ;;  %v4893_v36 = vld [vmem:[#allocation37_spill] sm:$0xff] }
 0x46e   :  { %v1754_v56 = vmul.f32 %v1753_v40, %v1736_v20  ;;  %v1757_v38 = vsub.f32 1.0, %v1751_v31  ;;  %v1759_v44 = vmul.f32 %v1751_v31, %v4111_v59  ;;  %v4876_v59 = vld [vmem:[#allocation8_spill] sm:$0xff]  ;;  %v4878_v42 = vld [vmem:[#allocation18_spill] sm:$0xff]  ;;  %v4896_v31 = vld [vmem:[#allocation35_spill] sm:$0xff] }
 0x46f   :  { %v1834_v14 = vsel %vm1833_vm5, %v3007_v37, %v1830_v16  ;;  %v4879_v16 = vld [vmem:[#allocation77_spill] sm:$0xff]  ;;  %v4880_v20 = vld [vmem:[#allocation16_spill] sm:$0xff]  ;;  %v4891_v26 = vld [vmem:[#allocation34_spill] sm:$0xff] }
 0x470   :  { %v1839_v0 = vsel %vm1836_vm7, %v1838_v3, %v1834_v14  ;;  %v1755_v24 = vadd.f32 %v1754_v56, %v1712_v10  ;;  %v4883_v3 = vld [vmem:[#allocation22_spill] sm:$0xff]  ;;  %v4884_v10 = vld [vmem:[#allocation21_spill] sm:$0xff]  ;;  %v4885_v56 = vld [vmem:[#allocation28_spill] sm:$0xff] }
 0x471   :  { %v1845_v52 = vsub.f32 1.0, %v1839_v0  ;;  %v1847_v57 = vmul.f32 %v1839_v0, %v4105_v19  ;;  %v4886_v14 = vld [vmem:[#allocation11_spill] sm:$0xff] }
 0x472   :  { %3010 = vtanh.f32 %v1755_v24  ;;  %v4888_v0 = vld [vmem:[#allocation27_spill] sm:$0xff]  ;;  %v4889_v24 = vld [vmem:[#allocation30_spill] sm:$0xff] }
 0x473   :  { %v1846_v27 = vmul.f32 %v3009_v55, %v1845_v52  ;;  %v4890_v52 = vld [vmem:[#allocation12_spill] sm:$0xff] }
 0x474   :  { %v4892_v55 = vld [vmem:[#allocation32_spill] sm:$0xff] }
 0x475   :  { %v4208_v40 = vadd.f32 %v1847_v57, %v1846_v27  ;;  %v4894_v57 = vld [vmem:[#allocation13_spill] sm:$0xff]  ;;  %v4895_v27 = vld [vmem:[#allocation36_spill] sm:$0xff] }
 0x477   :  { %v1849_v18 = vpack.c.bf16 %v4208_v40, %v4208_v40 }
 0x478   :  { %v3011_v60 = vpop.eup %3010 }
 0x479   :  { %v1758_v37 = vmul.f32 %v3011_v60, %v1757_v38  ;;  %1858 = vmatmul.bf16.vlgmr.msra.gmra.mxu3 %v1849_v18  ;;  %v4897_v38 = vld [vmem:[#allocation41_spill] sm:$0xff]  ;;  %v4899_v60 = vld [vmem:[#allocation40_spill] sm:$0xff] }
 0x47a   :  { %2006 = vmatpush.bf16.msra.mxu3 %v3513_v11 }
 0x47b   :  { %v4214_v6 = vadd.f32 %v1759_v44, %v1758_v37  ;;  %v4900_v37 = vld [vmem:[#allocation39_spill] sm:$0xff]  ;;  %v4901_v44 = vld [vmem:[#allocation46_spill] sm:$0xff] }
 0x47d   :  { %v1761_v19 = vpack.c.bf16 %v4214_v6, %v4214_v6 }
 0x47e   :  { %2007 = vmatpush.bf16.msra.mxu3 %v3542_v62 }
 0x47f   :  { %1770 = vmatmul.bf16.vlgmr.msrb.gmra.mxu0 %v1761_v19  ;;  %1783 = vmatmul.bf16.vlgmr.msrb.gmra.mxu1 %v1761_v19 }
 0x480   :  { %1796 = vmatmul.bf16.vlgmr.msrb.gmra.mxu2 %v1761_v19  ;;  %1915 = vmatpush.bf16.msrb.mxu0 %v3391_v50  ;;  %v4902_v19 = vld [vmem:[#allocation15_spill] sm:$0xff] }
 0x481   :  { %1980 = vmatpush.bf16.msrb.mxu1 %v3436_v17  ;;  %1993 = vmatpush.bf16.msrb.mxu2 %v3505_v45 }
 0x482   :  { %2008 = vmatpush.bf16.msra.mxu3 %v3571_v35 }
 0x484   :  { %1916 = vmatpush.bf16.msrb.mxu0 %v3394_v12 }
 0x485   :  { %1981 = vmatpush.bf16.msrb.mxu1 %v3472_v43  ;;  %1994 = vmatpush.bf16.msrb.mxu2 %v3536_v39 }
 0x486   :  { %2009 = vmatpush.bf16.msra.mxu3 %v3602_v2 }
 0x488   :  { %1917 = vmatpush.bf16.msrb.mxu0 %v3397_v53 }
 0x489   :  { %1910 = vmatmul.bf16.vlgmr.msrb.gmra.mxu3 %v1849_v18  ;;  %1982 = vmatpush.bf16.msrb.mxu1 %v3483_v54 }
 0x48a   :  { %1995 = vmatpush.bf16.msrb.mxu2 %v3565_v51  ;;  %2010 = vmatpush.bf16.msra.mxu3 %v3634_v32 }
 0x48c   :  { %1918 = vmatpush.bf16.msrb.mxu0 %v3400_v13 }
 0x48d   :  { %1983 = vmatpush.bf16.msrb.mxu1 %v3494_v22 }
 0x48e   :  { %1996 = vmatpush.bf16.msrb.mxu2 %v3596_v30  ;;  %2011 = vmatpush.bf16.msra.mxu3 %v4694_v58 }
 0x48f   :  { %1871 = vmatmul.bf16.vlgmr.msra.gmra.mxu0 %v1849_v18  ;;  %1884 = vmatmul.bf16.vlgmr.msra.gmra.mxu1 %v1849_v18 }
 0x490   :  { %1897 = vmatmul.bf16.vlgmr.msra.gmra.mxu2 %v1849_v18  ;;  %1919 = vmatpush.bf16.msrb.mxu0 %v3403_v21 }
 0x491   :  { %1984 = vmatpush.bf16.msrb.mxu1 %v3525_v63 }
 0x492   :  { %1997 = vmatpush.bf16.msrb.mxu2 %v3628_v23  ;;  %2012 = vmatpush.bf16.msra.mxu3 %v4700_v48 }
 0x494   :  { %1920 = vmatpush.bf16.msrb.mxu0 %v3406_v29 }
 0x495   :  { %1985 = vmatpush.bf16.msrb.mxu1 %v3552_v5 }
 0x496   :  { %1998 = vmatpush.bf16.msrb.mxu2 %v3653_v15  ;;  %2013 = vmatpush.bf16.msra.mxu3 %v3705_v33 }
 0x498   :  { %1921 = vmatpush.bf16.msrb.mxu0 %v4692_v34 }
 0x499   :  { %1986 = vmatpush.bf16.msrb.mxu1 %v4693_v25 }
 0x49a   :  { %2107 = vmatpush.bf16.msrb.mxu3 %v3203_v9  ;;  %1999 = vmatpush.bf16.msrb.mxu2 %v4695_v4 }
 0x49c   :  { %1922 = vmatpush.bf16.msrb.mxu0 %v4696_v1 }
 0x49d   :  { %1987 = vmatpush.bf16.msrb.mxu1 %v4877_v7 }
 0x49e   :  { %2108 = vmatpush.bf16.msrb.mxu3 %v3260_v47  ;;  %2000 = vmatpush.bf16.msrb.mxu2 %v4879_v16 }
 0x49f   :  { %1923 = vmatmul.bf16.vlgmr.msrb.gmra.mxu0 %v1849_v18  ;;  %v4898_v18 = vld [vmem:[#allocation14_spill] sm:$0xff] }
 0x4a0   :  { %2068 = vmatpush.bf16.msra.mxu0 %v4876_v59  ;;  %v4903_v59 = vld [vmem:[#allocation44_spill] sm:$0xff] }
 0x4a1   :  { %2081 = vmatpush.bf16.msra.mxu1 %v4878_v42  ;;  %v4904_v42 = vld [vmem:[#allocation42_spill] sm:$0xff] }
 0x4a2   :  { %2094 = vmatpush.bf16.msra.mxu2 %v4880_v20  ;;  %2109 = vmatpush.bf16.msrb.mxu3 %v4881_v41  ;;  %v4905_v20 = vld [vmem:[#allocation17_spill] sm:$0xff] }
 0x4a4   :  { %2069 = vmatpush.bf16.msra.mxu0 %v4882_v49  ;;  %v4906_v49 = vld [vmem:[#allocation10_spill] sm:$0xff] }
 0x4a5   :  { %2082 = vmatpush.bf16.msra.mxu1 %v4883_v3  ;;  %v4907_v3 = vld [vmem:[#allocation48_spill] sm:$0xff] }
 0x4a6   :  { %2095 = vmatpush.bf16.msra.mxu2 %v4884_v10  ;;  %2110 = vmatpush.bf16.msrb.mxu3 %v4885_v56  ;;  %v4908_v10 = vld [vmem:[#allocation45_spill] sm:$0xff]  ;;  %v4920_v56 = vld [vmem:[#allocation75_spill] sm:$0xff] }
 0x4a8   :  { %2070 = vmatpush.bf16.msra.mxu0 %v4886_v14  ;;  %v4909_v14 = vld [vmem:[#allocation20_spill] sm:$0xff] }
 0x4a9   :  { %2083 = vmatpush.bf16.msra.mxu1 %v4887_v61  ;;  %v4910_v61 = vld [vmem:[#allocation26_spill] sm:$0xff] }
 0x4aa   :  { %2096 = vmatpush.bf16.msra.mxu2 %v4888_v0  ;;  %2111 = vmatpush.bf16.msrb.mxu3 %v4889_v24  ;;  %v4911_v0 = vld [vmem:[#allocation29_spill] sm:$0xff] }
 0x4ac   :  { %2071 = vmatpush.bf16.msra.mxu0 %v4890_v52  ;;  %v4912_v52 = vld [vmem:[#allocation33_spill] sm:$0xff] }
 0x4ad   :  { %2084 = vmatpush.bf16.msra.mxu1 %v4891_v26  ;;  %v4913_v26 = vld [vmem:[#allocation38_spill] sm:$0xff] }
 0x4ae   :  { %2097 = vmatpush.bf16.msra.mxu2 %v4892_v55  ;;  %2112 = vmatpush.bf16.msrb.mxu3 %v4893_v36  ;;  %v4914_v55 = vld [vmem:[#allocation43_spill] sm:$0xff]  ;;  %v4918_v36 = vld [vmem:[#allocation25_spill] sm:$0xff] }
 0x4b0   :  { %2072 = vmatpush.bf16.msra.mxu0 %v4894_v57  ;;  %v4915_v57 = vld [vmem:[#allocation47_spill] sm:$0xff] }
 0x4b1   :  { %2085 = vmatpush.bf16.msra.mxu1 %v4895_v27  ;;  %v4916_v27 = vld [vmem:[#allocation24_spill] sm:$0xff] }
 0x4b2   :  { %2098 = vmatpush.bf16.msra.mxu2 %v4896_v31  ;;  %2113 = vmatpush.bf16.msrb.mxu3 %v4897_v38  ;;  %v4917_v31 = vld [vmem:[#allocation64_spill] sm:$0xff] }
 0x4b4   :  { %2073 = vmatpush.bf16.msra.mxu0 %v4898_v18  ;;  %v160_v18 = vadd.f32 %v4917_v31, %v4916_v27 }
 0x4b5   :  { %2086 = vmatpush.bf16.msra.mxu1 %v4899_v60 }
 0x4b6   :  { %2099 = vmatpush.bf16.msra.mxu2 %v4900_v37  ;;  %2114 = vmatpush.bf16.msrb.mxu3 %v4901_v44 }
 0x4b8   :  { %2074 = vmatpush.bf16.msra.mxu0 %v4902_v19 }
 0x4b9   :  { %2087 = vmatpush.bf16.msra.mxu1 %v4903_v59 }
 0x4ba   :  { %2100 = vmatpush.bf16.msra.mxu2 %v4904_v42 }
 0x4bc   :  { %2075 = vmatpush.bf16.msra.mxu0 %v4905_v20 }
 0x4bd   :  { %2088 = vmatpush.bf16.msra.mxu1 %v4907_v3 }
 0x4be   :  { %2101 = vmatpush.bf16.msra.mxu2 %v4908_v10 }
 0x4c0   :  { %2120 = vmatpush.bf16.msrb.mxu0 %v4906_v49 }
 0x4c4   :  { %2121 = vmatpush.bf16.msrb.mxu0 %v4909_v14 }
 0x4c8   :  { %2122 = vmatpush.bf16.msrb.mxu0 %v4910_v61 }
 0x4cc   :  { %2123 = vmatpush.bf16.msrb.mxu0 %v4911_v0 }
 0x4d0   :  { %2124 = vmatpush.bf16.msrb.mxu0 %v4912_v52 }
 0x4d4   :  { %2125 = vmatpush.bf16.msrb.mxu0 %v4913_v26 }
 0x4d8   :  { %2126 = vmatpush.bf16.msrb.mxu0 %v4914_v55  ;;  %v4919_v55 = vld [vmem:[#allocation65_spill] sm:$0xff] }
 0x4d9   :  { %v201_v52 = vadd.f32 %v4919_v55, %v4918_v36 }
 0x4dc   :  { %2127 = vmatpush.bf16.msrb.mxu0 %v4915_v57 }
 0x4fc   :  { %v1771_v60 = vpop.f32.mrf.mxu0  ;;  %v1784_v37 = vpop.f32.mrf.mxu1 }
 0x4fd   :  { %v1859_v19 = vpop.f32.mrf.mxu3 }
 0x4fe   :  { %v2019_v59 = vadd.f32 %v1859_v19, %v160_v18 }
 0x500   :  { %v2812_v42 = vmul.f32 -1.442695, %v2019_v59 }
 0x502   :  { %3012 = vpow2.f32 %v2812_v42 }
 0x503   :  { %v4291_v20 = vpop.f32.mrf.mxu2 }
 0x504   :  { %v1773_v3 = vpop.f32.mrf.mxu0  ;;  %v1786_v10 = vpop.f32.mrf.mxu1 }
 0x505   :  { %v1861_v44 = vpop.f32.mrf.mxu3 }
 0x508   :  { %v3013_v38 = vpop.eup %3012 }
 0x509   :  { %v2027_v26 = vadd.f32 1.0, %v3013_v38  ;;  %v4921_v38 = vld [vmem:[#allocation72_spill] sm:$0xff] }
 0x50b   :  { %3014 = vrcp.f32 %v2027_v26  ;;  %v1799_v57 = vpop.f32.mrf.mxu2  ;;  %v2038_v47 = vand.u32 2147483647, %v2027_v26  ;;  %vm2034_vm11 = vweird.f32 %v2027_v26 }
 0x50c   :  { %v1872_v24 = vpop.f32.mrf.mxu0  ;;  %v1885_v31 = vpop.f32.mrf.mxu1 }
 0x50d   :  { %v2020_v27 = vadd.f32 %v1872_v24, %v201_v52  ;;  %v1911_v0 = vpop.f32.mrf.mxu3  ;;  %v2040_v24 = vand.u32 2147483648, %v2027_v26  ;;  %vm2039_vm13 = vcmp.eq.f32.partialorder %v2038_v47, 8.507059e+37 }
 0x50e   :  { %v1929_v18 = vadd.f32 %v1911_v0, %v4920_v56 }
 0x50f   :  { %v2813_v19 = vmul.f32 -1.442695, %v2020_v27 }
 0x510   :  { %v1932_v59 = vadd.f32 %v1929_v18, %v1784_v37 }
 0x511   :  { %v3015_v42 = vpop.eup %3014  ;;  %3016 = vpow2.f32 %v2813_v19  ;;  %v2041_v19 = vor.u32 1.1754944e-38, %v2040_v24 }
 0x512   :  { %v2030_v3 = vmul.f32 %v3015_v42, %v2027_v26  ;;  %v2811_v10 = vmul.f32 -1.442695, %v1932_v59  ;;  %vm2035_vm10 = vweird.f32 %v3015_v42  ;;  %v4923_v26 = vld [vmem:[#allocation66_spill] sm:$0xff] }
 0x513   :  { %v1898_v44 = vpop.f32.mrf.mxu2  ;;  %vm2036_vm12 = vmor %vm2034_vm11, %vm2035_vm10 }
 0x514   :  { %v2031_v61 = vsub.f32 1.0, %v2030_v3  ;;  %3018 = vpow2.f32 %v2811_v10  ;;  %v1928_v41 = vadd.f32 %v1898_v44, %v4921_v38  ;;  %v1874_v55 = vpop.f32.mrf.mxu0  ;;  %v1887_v36 = vpop.f32.mrf.mxu1  ;;  %v242_v3 = vadd.f32 %v4923_v26, %v4874_v46 }
 0x515   :  { %v1913_v57 = vpop.f32.mrf.mxu3  ;;  %v4300_v36 = vld [vmem:[%s4489_s3] ss:$0 sm:$0xff] }
 0x516   :  { %v2032_v14 = vmul.f32 %v3015_v42, %v2031_v61  ;;  %v1931_v52 = vadd.f32 %v1928_v41, %v1771_v60  ;;  %4922 = vst [vmem:[#allocation68_spill] sm:$0xff] %v4300_v36  ;;  %v2059_v61 = vadd.f32 %v4300_v36, %v1885_v31 }
 0x517   :  { %v3017_v49 = vpop.eup %3016 }
 0x518   :  { %v2028_v0 = vadd.f32 1.0, %v3017_v49  ;;  %v2033_v27 = vadd.f32 %v3015_v42, %v2032_v14  ;;  %v2810_v37 = vmul.f32 -1.442695, %v1931_v52 }
 0x51a   :  { %v3019_v18 = vpop.eup %3018  ;;  %3020 = vrcp.f32 %v2028_v0  ;;  %v2037_v59 = vsel %vm2036_vm12, %v3015_v42, %v2033_v27  ;;  %v2055_v52 = vand.u32 2147483648, %v2028_v0  ;;  %vm2049_vm15 = vweird.f32 %v2028_v0 }
 0x51b   :  { %v4303_v41 = vadd.f32 1.0, %v3019_v18  ;;  %3022 = vpow2.f32 %v2810_v37  ;;  %v1900_v49 = vpop.f32.mrf.mxu2  ;;  %v2042_v14 = vsel %vm2039_vm13, %v2041_v19, %v2037_v59  ;;  %v2053_v18 = vand.u32 2147483647, %v2028_v0 }
 0x51c   :  { %v1924_v60 = vpop.f32.mrf.mxu0  ;;  %v2060_v10 = vmul.f32 %v2059_v61, %v2042_v14  ;;  %v2056_v59 = vor.u32 1.1754944e-38, %v2055_v52 }
 0x51d   :  { %3024 = vrcp.f32 %v4303_v41  ;;  %vm2054_vm1 = vcmp.eq.f32.partialorder %v2053_v18, 8.507059e+37  ;;  %vm1961_vm7 = vweird.f32 %v4303_v41 }
 0x51e   :  { %v2061_v47 = vadd.f32 %v2060_v10, %v242_v3 }
 0x520   :  { %v3021_v42 = vpop.eup %3020 }
 0x521   :  { %v3023_v44 = vpop.eup %3022  ;;  %v2045_v55 = vmul.f32 %v3021_v42, %v2028_v0  ;;  %vm2050_vm14 = vweird.f32 %v3021_v42 }
 0x522   :  { %v1939_v57 = vadd.f32 1.0, %v3023_v44  ;;  %vm2051_vm0 = vmor %vm2049_vm15, %vm2050_vm14 }
 0x523   :  { %v2046_v24 = vsub.f32 1.0, %v2045_v55  ;;  %v3025_v27 = vpop.eup %3024 }
 0x524   :  { %3026 = vrcp.f32 %v1939_v57  ;;  %v1926_v31 = vpop.f32.mrf.mxu0  ;;  %v1957_v61 = vmul.f32 %v3025_v27, %v4303_v41  ;;  %v1952_v36 = vand.u32 2147483648, %v1939_v57  ;;  %v1950_v52 = vand.u32 2147483647, %v1939_v57 }
 0x525   :  { %v2047_v37 = vmul.f32 %v3021_v42, %v2046_v24  ;;  %3028 = vtanh.f32 %v2061_v47  ;;  %vm1946_vm3 = vweird.f32 %v1939_v57  ;;  %vm1962_vm6 = vweird.f32 %v3025_v27 }
 0x526   :  { %v1958_v55 = vsub.f32 1.0, %v1957_v61  ;;  %vm1951_vm5 = vcmp.eq.f32.partialorder %v1950_v52, 8.507059e+37  ;;  %vm1963_vm8 = vmor %vm1961_vm7, %vm1962_vm6 }
 0x527   :  { %v2048_v19 = vadd.f32 %v3021_v42, %v2047_v37 }
 0x528   :  { %v1959_v37 = vmul.f32 %v3025_v27, %v1958_v55 }
 0x529   :  { %v2052_v49 = vsel %vm2051_vm0, %v3021_v42, %v2048_v19  ;;  %v1953_v19 = vor.u32 1.1754944e-38, %v1952_v36  ;;  %v1965_v36 = vand.u32 2147483647, %v4303_v41 }
 0x52a   :  { %v3027_v14 = vpop.eup %3026  ;;  %v2057_v26 = vsel %vm2054_vm1, %v2056_v59, %v2052_v49  ;;  %v1971_v59 = vadd.f32 %v4095_v8, %v4291_v20  ;;  %v1967_v49 = vand.u32 2147483648, %v4303_v41 }
 0x52b   :  { %v2063_v3 = vsub.f32 1.0, %v2057_v26  ;;  %v1942_v10 = vmul.f32 %v3027_v14, %v1939_v57  ;;  %v3029_v44 = vpop.eup %3028  ;;  %v2065_v24 = vmul.f32 %v2057_v26, %v4208_v40  ;;  %vm1947_vm2 = vweird.f32 %v3027_v14 }
 0x52c   :  { %vm1948_vm4 = vmor %vm1946_vm3, %vm1947_vm2  ;;  %v1930_v26 = vadd.f32 %v1924_v60, %v4735_v28  ;;  %v1968_v57 = vor.u32 1.1754944e-38, %v1967_v49  ;;  %vm1966_vm9 = vcmp.eq.f32.partialorder %v1965_v36, 8.507059e+37 }
 0x52d   :  { %v2064_v31 = vmul.f32 %v3029_v44, %v2063_v3  ;;  %v1943_v46 = vsub.f32 1.0, %v1942_v10 }
 0x52f   :  { %v4310_v47 = vadd.f32 %v2065_v24, %v2064_v31  ;;  %v1944_v0 = vmul.f32 %v3027_v14, %v1943_v46  ;;  %v1960_v46 = vadd.f32 %v3025_v27, %v1959_v37  ;;  %v4941_v24 = vld [vmem:[#allocation25_spill] sm:$0xff] }
 0x531   :  { %v4314_v42 = vpack.c.bf16 %v4310_v47, %v4310_v47  ;;  %v1945_v18 = vadd.f32 %v3027_v14, %v1944_v0  ;;  %v1964_v20 = vsel %vm1963_vm8, %v3025_v27, %v1960_v46  ;;  %v4942_v0 = vld [vmem:[#allocation69_spill] sm:$0xff] }
 0x532   :  { %v204_v52 = vadd.f32 %v4942_v0, %v4941_v24 }
 0x533   :  { %v1949_v40 = vsel %vm1948_vm4, %v3027_v14, %v1945_v18  ;;  %2076 = vmatmul.bf16.vlgmr.msra.gmra.mxu0 %v4314_v42  ;;  %v1969_v14 = vsel %vm1966_vm9, %v1968_v57, %v1964_v20 }
 0x534   :  { %v1954_v61 = vsel %vm1951_vm5, %v1953_v19, %v1949_v40  ;;  %2224 = vmatpush.bf16.msra.mxu0 %v3513_v11  ;;  %v1975_v11 = vsub.f32 1.0, %v1969_v14  ;;  %v1977_v60 = vmul.f32 %v1969_v14, %v4214_v6 }
 0x535   :  { %v1972_v3 = vmul.f32 %v1971_v59, %v1954_v61 }
 0x537   :  { %v1973_v8 = vadd.f32 %v1972_v3, %v1930_v26 }
 0x538   :  { %2225 = vmatpush.bf16.msra.mxu0 %v3542_v62 }
 0x539   :  { %3030 = vtanh.f32 %v1973_v8 }
 0x53c   :  { %2226 = vmatpush.bf16.msra.mxu0 %v3571_v35 }
 0x53f   :  { %v3031_v10 = vpop.eup %3030 }
 0x540   :  { %v1976_v44 = vmul.f32 %v3031_v10, %v1975_v11  ;;  %2227 = vmatpush.bf16.msra.mxu0 %v3602_v2 }
 0x542   :  { %v4328_v55 = vadd.f32 %v1977_v60, %v1976_v44 }
 0x543   :  { %2128 = vmatmul.bf16.vlgmr.msrb.gmra.mxu0 %v4314_v42 }
 0x544   :  { %v1979_v62 = vpack.c.bf16 %v4328_v55, %v4328_v55  ;;  %2228 = vmatpush.bf16.msra.mxu0 %v3634_v32 }
 0x546   :  { %1988 = vmatmul.bf16.vlgmr.msrb.gmra.mxu1 %v1979_v62  ;;  %2001 = vmatmul.bf16.vlgmr.msrb.gmra.mxu2 %v1979_v62 }
 0x547   :  { %2014 = vmatmul.bf16.vlgmr.msra.gmra.mxu3 %v1979_v62  ;;  %2133 = vmatpush.bf16.msrb.mxu1 %v3391_v50  ;;  %v4943_v62 = vld [vmem:[#allocation68_spill] sm:$0xff] }
 0x548   :  { %2198 = vmatpush.bf16.msrb.mxu2 %v3436_v17  ;;  %2211 = vmatpush.bf16.msra.mxu3 %v3505_v45  ;;  %v4928_v17 = vld [vmem:[#allocation26_spill] sm:$0xff]  ;;  %v4930_v45 = vld [vmem:[#allocation29_spill] sm:$0xff] }
 0x549   :  { %2229 = vmatpush.bf16.msra.mxu0 %v4694_v58 }
 0x54b   :  { %2134 = vmatpush.bf16.msrb.mxu1 %v3394_v12 }
 0x54c   :  { %2199 = vmatpush.bf16.msrb.mxu2 %v3472_v43  ;;  %2212 = vmatpush.bf16.msra.mxu3 %v3536_v39  ;;  %v4933_v43 = vld [vmem:[#allocation37_spill] sm:$0xff]  ;;  %v4937_v39 = vld [vmem:[#allocation46_spill] sm:$0xff] }
 0x54d   :  { %2230 = vmatpush.bf16.msra.mxu0 %v4700_v48 }
 0x54f   :  { %2135 = vmatpush.bf16.msrb.mxu1 %v3397_v53 }
 0x550   :  { %2200 = vmatpush.bf16.msrb.mxu2 %v3483_v54  ;;  %2213 = vmatpush.bf16.msra.mxu3 %v3565_v51  ;;  %v4927_v51 = vld [vmem:[#allocation23_spill] sm:$0xff]  ;;  %v4935_v54 = vld [vmem:[#allocation41_spill] sm:$0xff] }
 0x551   :  { %2231 = vmatpush.bf16.msra.mxu0 %v3705_v33  ;;  %v4926_v33 = vld [vmem:[#allocation20_spill] sm:$0xff] }
 0x553   :  { %2136 = vmatpush.bf16.msrb.mxu1 %v3400_v13 }
 0x554   :  { %2201 = vmatpush.bf16.msrb.mxu2 %v3494_v22  ;;  %2214 = vmatpush.bf16.msra.mxu3 %v3596_v30  ;;  %v4925_v30 = vld [vmem:[#allocation19_spill] sm:$0xff]  ;;  %v4931_v22 = vld [vmem:[#allocation30_spill] sm:$0xff] }
 0x556   :  { %2089 = vmatmul.bf16.vlgmr.msra.gmra.mxu1 %v4314_v42  ;;  %2102 = vmatmul.bf16.vlgmr.msra.gmra.mxu2 %v4314_v42 }
 0x557   :  { %2115 = vmatmul.bf16.vlgmr.msrb.gmra.mxu3 %v4314_v42  ;;  %2137 = vmatpush.bf16.msrb.mxu1 %v3403_v21 }
 0x558   :  { %2202 = vmatpush.bf16.msrb.mxu2 %v3525_v63  ;;  %2215 = vmatpush.bf16.msra.mxu3 %v3628_v23  ;;  %v4924_v23 = vld [vmem:[#allocation10_spill] sm:$0xff] }
 0x55b   :  { %2138 = vmatpush.bf16.msrb.mxu1 %v3406_v29 }
 0x55c   :  { %2203 = vmatpush.bf16.msrb.mxu2 %v3552_v5  ;;  %2216 = vmatpush.bf16.msra.mxu3 %v3653_v15  ;;  %v4940_v5 = vld [vmem:[#allocation67_spill] sm:$0xff] }
 0x55f   :  { %2139 = vmatpush.bf16.msrb.mxu1 %v4692_v34 }
 0x560   :  { %2204 = vmatpush.bf16.msrb.mxu2 %v4693_v25  ;;  %2217 = vmatpush.bf16.msra.mxu3 %v4695_v4 }
 0x563   :  { %2140 = vmatpush.bf16.msrb.mxu1 %v4696_v1 }
 0x564   :  { %2205 = vmatpush.bf16.msrb.mxu2 %v4877_v7  ;;  %2218 = vmatpush.bf16.msra.mxu3 %v4879_v16 }
 0x566   :  { %2141 = vmatmul.bf16.vlgmr.msrb.gmra.mxu1 %v4314_v42 }
 0x567   :  { %2286 = vmatpush.bf16.msra.mxu1 %v3203_v9  ;;  %v4929_v9 = vld [vmem:[#allocation28_spill] sm:$0xff] }
 0x568   :  { %2299 = vmatpush.bf16.msra.mxu2 %v4924_v23  ;;  %2312 = vmatpush.bf16.msrb.mxu3 %v3391_v50  ;;  %v4932_v50 = vld [vmem:[#allocation33_spill] sm:$0xff] }
 0x56b   :  { %2287 = vmatpush.bf16.msra.mxu1 %v4925_v30 }
 0x56c   :  { %2300 = vmatpush.bf16.msra.mxu2 %v4926_v33  ;;  %2313 = vmatpush.bf16.msrb.mxu3 %v3394_v12  ;;  %v4934_v12 = vld [vmem:[#allocation38_spill] sm:$0xff] }
 0x56f   :  { %2288 = vmatpush.bf16.msra.mxu1 %v4927_v51 }
 0x570   :  { %2301 = vmatpush.bf16.msra.mxu2 %v4928_v17  ;;  %2314 = vmatpush.bf16.msrb.mxu3 %v3397_v53  ;;  %v4936_v53 = vld [vmem:[#allocation43_spill] sm:$0xff] }
 0x573   :  { %2289 = vmatpush.bf16.msra.mxu1 %v4929_v9 }
 0x574   :  { %2302 = vmatpush.bf16.msra.mxu2 %v4930_v45  ;;  %2315 = vmatpush.bf16.msrb.mxu3 %v3400_v13  ;;  %v4938_v13 = vld [vmem:[#allocation47_spill] sm:$0xff] }
 0x577   :  { %2290 = vmatpush.bf16.msra.mxu1 %v4931_v22 }
 0x578   :  { %2303 = vmatpush.bf16.msra.mxu2 %v4932_v50  ;;  %2316 = vmatpush.bf16.msrb.mxu3 %v3403_v21  ;;  %v4939_v21 = vld [vmem:[#allocation24_spill] sm:$0xff] }
 0x579   :  { %v163_v35 = vadd.f32 %v4940_v5, %v4939_v21 }
 0x57b   :  { %2291 = vmatpush.bf16.msra.mxu1 %v4933_v43  ;;  %v4944_v43 = vld [vmem:[#allocation49_spill] sm:$0xff] }
 0x57c   :  { %2304 = vmatpush.bf16.msra.mxu2 %v4934_v12  ;;  %2317 = vmatpush.bf16.msrb.mxu3 %v3406_v29  ;;  %v4945_v12 = vld [vmem:[#allocation71_spill] sm:$0xff] }
 0x57f   :  { %2292 = vmatpush.bf16.msra.mxu1 %v4935_v54  ;;  %v245_v54 = vadd.f32 %v4945_v12, %v4944_v43 }
 0x580   :  { %2305 = vmatpush.bf16.msra.mxu2 %v4936_v53  ;;  %2318 = vmatpush.bf16.msrb.mxu3 %v4692_v34 }
 0x583   :  { %2293 = vmatpush.bf16.msra.mxu1 %v4937_v39 }
 0x584   :  { %2306 = vmatpush.bf16.msra.mxu2 %v4938_v13  ;;  %2319 = vmatpush.bf16.msrb.mxu3 %v4696_v1 }
 0x5b0   :  { %v2077_v63 = vpop.f32.mrf.mxu0 }
 0x5b1   :  { %v2237_v2 = vadd.f32 %v2077_v63, %v163_v35 }
 0x5b3   :  { %v2816_v32 = vmul.f32 -1.442695, %v2237_v2 }
 0x5b5   :  { %3032 = vpow2.f32 %v2816_v32 }
 0x5b8   :  { %v2079_v15 = vpop.f32.mrf.mxu0 }
 0x5bb   :  { %v3033_v25 = vpop.eup %3032 }
 0x5bc   :  { %v2245_v4 = vadd.f32 1.0, %v3033_v25 }
 0x5be   :  { %3034 = vrcp.f32 %v2245_v4  ;;  %v2258_v57 = vand.u32 2147483648, %v2245_v4  ;;  %vm2252_vm11 = vweird.f32 %v2245_v4  ;;  %v2256_v10 = vand.u32 2147483647, %v2245_v4 }
 0x5c0   :  { %v2129_v29 = vpop.f32.mrf.mxu0  ;;  %v2259_v51 = vor.u32 1.1754944e-38, %v2258_v57  ;;  %vm2257_vm13 = vcmp.eq.f32.partialorder %v2256_v10, 8.507059e+37 }
 0x5c1   :  { %v2147_v1 = vadd.f32 %v2129_v29, %v4920_v56 }
 0x5c3   :  { %v1989_v58 = vpop.f32.mrf.mxu1 }
 0x5c4   :  { %v3035_v16 = vpop.eup %3034 }
 0x5c5   :  { %v2248_v31 = vmul.f32 %v3035_v16, %v2245_v4  ;;  %vm2253_vm10 = vweird.f32 %v3035_v16 }
 0x5c6   :  { %vm2254_vm12 = vmor %vm2252_vm11, %vm2253_vm10 }
 0x5c7   :  { %v2249_v59 = vsub.f32 1.0, %v2248_v31 }
 0x5c8   :  { %v2131_v34 = vpop.f32.mrf.mxu0 }
 0x5c9   :  { %v2002_v48 = vpop.f32.mrf.mxu2  ;;  %v2250_v46 = vmul.f32 %v3035_v16, %v2249_v59 }
 0x5ca   :  { %v4391_v6 = vpop.f32.mrf.mxu3  ;;  %v2150_v41 = vadd.f32 %v2147_v1, %v2002_v48 }
 0x5cb   :  { %v1991_v7 = vpop.f32.mrf.mxu1  ;;  %v2251_v36 = vadd.f32 %v3035_v16, %v2250_v46 }
 0x5cc   :  { %v2815_v19 = vmul.f32 -1.442695, %v2150_v41 }
 0x5cd   :  { %v2255_v60 = vsel %vm2254_vm12, %v3035_v16, %v2251_v36 }
 0x5ce   :  { %v2260_v45 = vsel %vm2257_vm13, %v2259_v51, %v2255_v60 }
 0x5d1   :  { %v2004_v27 = vpop.f32.mrf.mxu2 }
 0x5d2   :  { %v2017_v37 = vpop.f32.mrf.mxu3 }
 0x5d3   :  { %v2090_v42 = vpop.f32.mrf.mxu1 }
 0x5d4   :  { %v2238_v18 = vadd.f32 %v2090_v42, %v204_v52 }
 0x5d6   :  { %v2817_v40 = vmul.f32 -1.442695, %v2238_v18 }
 0x5d8   :  { %3036 = vpow2.f32 %v2817_v40 }
 0x5d9   :  { %3038 = vpow2.f32 %v2815_v19  ;;  %v2103_v61 = vpop.f32.mrf.mxu2 }
 0x5da   :  { %v2116_v49 = vpop.f32.mrf.mxu3  ;;  %v2277_v23 = vadd.f32 %v4943_v62, %v2103_v61  ;;  %v4408_v61 = vld [vmem:[%s4493_s7] ss:$0 sm:$0xff] }
 0x5db   :  { %v2146_v26 = vadd.f32 %v2116_v49, %v4921_v38  ;;  %v2092_v3 = vpop.f32.mrf.mxu1  ;;  %v2189_v46 = vadd.f32 %v4408_v61, %v4391_v6 }
 0x5dc   :  { %v2278_v22 = vmul.f32 %v2277_v23, %v2260_v45  ;;  %v2392_v45 = vld [vmem:[%s4494_s8 + $0x68] sm:$0xff] }
 0x5dd   :  { %v2149_v8 = vadd.f32 %v2146_v26, %v1989_v58 }
 0x5de   :  { %v3037_v20 = vpop.eup %3036  ;;  %v2279_v13 = vadd.f32 %v2278_v22, %v245_v54  ;;  %v2391_v22 = vld [vmem:[%s4494_s8 + $0x60] sm:$0xff]  ;;  %v2390_v54 = vld [vmem:[%s4494_s8 + $0x58] sm:$0xff] }
 0x5df   :  { %v3039_v14 = vpop.eup %3038  ;;  %v2246_v11 = vadd.f32 1.0, %v3037_v20  ;;  %v2814_v44 = vmul.f32 -1.442695, %v2149_v8 }
 0x5e0   :  { %v4398_v33 = vadd.f32 1.0, %v3039_v14 }
 0x5e1   :  { %3040 = vrcp.f32 %v2246_v11  ;;  %v2105_v30 = vpop.f32.mrf.mxu2  ;;  %v2273_v5 = vand.u32 2147483648, %v2246_v11  ;;  %v2271_v15 = vand.u32 2147483647, %v2246_v11  ;;  %vm2267_vm15 = vweird.f32 %v2246_v11 }
 0x5e2   :  { %3042 = vpow2.f32 %v2814_v44  ;;  %v2118_v17 = vpop.f32.mrf.mxu3  ;;  %v2185_v3 = vand.u32 2147483648, %v4398_v33  ;;  %vm2179_vm7 = vweird.f32 %v4398_v33  ;;  %v2183_v20 = vand.u32 2147483647, %v4398_v33 }
 0x5e3   :  { %v2142_v9 = vpop.f32.mrf.mxu1  ;;  %3044 = vrcp.f32 %v4398_v33  ;;  %v2274_v58 = vor.u32 1.1754944e-38, %v2273_v5  ;;  %vm2272_vm1 = vcmp.eq.f32.partialorder %v2271_v15, 8.507059e+37  ;;  %v2394_v17 = vld [vmem:[%s4494_s8 + $0x78] sm:$0xff] }
 0x5e4   :  { %v2148_v36 = vadd.f32 %v2142_v9, %v4735_v28  ;;  %vm2184_vm9 = vcmp.eq.f32.partialorder %v2183_v20, 8.507059e+37  ;;  %2395 = vmatpush.msrb.mxu0 %v2394_v17 }
 0x5e7   :  { %v3041_v50 = vpop.eup %3040 }
 0x5e8   :  { %v3043_v53 = vpop.eup %3042  ;;  %v2263_v39 = vmul.f32 %v3041_v50, %v2246_v11  ;;  %vm2268_vm14 = vweird.f32 %v3041_v50  ;;  %v2186_v11 = vor.u32 1.1754944e-38, %v2185_v3 }
 0x5e9   :  { %v2157_v63 = vadd.f32 1.0, %v3043_v53  ;;  %v3045_v2 = vpop.eup %3044  ;;  %vm2269_vm0 = vmor %vm2267_vm15, %vm2268_vm14 }
 0x5ea   :  { %v2264_v21 = vsub.f32 1.0, %v2263_v39  ;;  %v2175_v25 = vmul.f32 %v3045_v2, %v4398_v33  ;;  %vm2180_vm6 = vweird.f32 %v3045_v2  ;;  %v2389_v39 = vld [vmem:[%s4494_s8 + $0x50] sm:$0xff] }
 0x5eb   :  { %3046 = vrcp.f32 %v2157_v63  ;;  %v2144_v35 = vpop.f32.mrf.mxu1  ;;  %v2170_v0 = vand.u32 2147483648, %v2157_v63  ;;  %v2168_v37 = vand.u32 2147483647, %v2157_v63  ;;  %vm2164_vm3 = vweird.f32 %v2157_v63  ;;  %vm2181_vm8 = vmor %vm2179_vm7, %vm2180_vm6 }
 0x5ec   :  { %v2265_v32 = vmul.f32 %v3041_v50, %v2264_v21  ;;  %3048 = vtanh.f32 %v2279_v13  ;;  %v2176_v41 = vsub.f32 1.0, %v2175_v25  ;;  %v2387_v21 = vld [vmem:[%s4494_s8 + $0x40] sm:$0xff]  ;;  %v2384_v25 = vld [vmem:[%s4494_s8 + $0x28] sm:$0xff] }
 0x5ed   :  { %v2171_v40 = vor.u32 1.1754944e-38, %v2170_v0  ;;  %vm2169_vm5 = vcmp.eq.f32.partialorder %v2168_v37, 8.507059e+37 }
 0x5ee   :  { %v2266_v29 = vadd.f32 %v3041_v50, %v2265_v32  ;;  %v2177_v18 = vmul.f32 %v3045_v2, %v2176_v41  ;;  %v2385_v32 = vld [vmem:[%s4494_s8 + $0x30] sm:$0xff]  ;;  %v2380_v41 = vld [vmem:[%s4494_s8 + $0x8] sm:$0xff] }
 0x5f0   :  { %v2270_v4 = vsel %vm2269_vm0, %v3041_v50, %v2266_v29  ;;  %v2178_v26 = vadd.f32 %v3045_v2, %v2177_v18 }
 0x5f1   :  { %v3047_v34 = vpop.eup %3046  ;;  %v2275_v48 = vsel %vm2272_vm1, %v2274_v58, %v2270_v4  ;;  %v2383_v58 = vld [vmem:[%s4494_s8 + $0x20] sm:$0xff] }
 0x5f2   :  { %v2281_v7 = vsub.f32 1.0, %v2275_v48  ;;  %v2160_v16 = vmul.f32 %v3047_v34, %v2157_v63  ;;  %v3049_v1 = vpop.eup %3048  ;;  %v2283_v24 = vmul.f32 %v2275_v48, %v4310_v47  ;;  %vm2165_vm2 = vweird.f32 %v3047_v34  ;;  %v2382_v48 = vld [vmem:[%s4494_s8 + $0x18] sm:$0xff] }
 0x5f3   :  { %vm2166_vm4 = vmor %vm2164_vm3, %vm2165_vm2  ;;  %v2182_v14 = vsel %vm2181_vm8, %v3045_v2, %v2178_v26  ;;  %v2386_v2 = vld [vmem:[%s4494_s8 + $0x38] sm:$0xff] }
 0x5f4   :  { %v2282_v27 = vmul.f32 %v3049_v1, %v2281_v7  ;;  %v2161_v31 = vsub.f32 1.0, %v2160_v16  ;;  %v2187_v6 = vsel %vm2184_vm9, %v2186_v11, %v2182_v14  ;;  %v2381_v16 = vld [vmem:[%s4494_s8 + $0x10] sm:$0xff] }
 0x5f5   :  { %v2193_v10 = vsub.f32 1.0, %v2187_v6  ;;  %v2195_v62 = vmul.f32 %v2187_v6, %v4328_v55  ;;  %v2393_v55 = vld [vmem:[%s4494_s8 + $0x70] sm:$0xff] }
 0x5f6   :  { %v2162_v52 = vmul.f32 %v3047_v34, %v2161_v31  ;;  %v2284_v42 = vadd.f32 %v2283_v24, %v2282_v27  ;;  %2396 = vmatpush.msrb.mxu0 %v2393_v55  ;;  %v2379_v31 = vld [vmem:[%s4494_s8] sm:$0xff] }
 0x5f8   :  { %v2163_v19 = vadd.f32 %v3047_v34, %v2162_v52  ;;  %v2285_v59 = vpack.c.bf16 %v2284_v42, %v2284_v42  ;;  %2397 = vmatpush.msrb.mxu0 %v2392_v45  ;;  %v2900_v45 = vld [vmem:[%s4495_s9] ss:$0 sm:$0xff] }
 0x5fa   :  { %v2167_v47 = vsel %vm2166_vm4, %v3047_v34, %v2163_v19  ;;  %2294 = vmatmul.bf16.vlgmr.msra.gmra.mxu1 %v2285_v59  ;;  %2398 = vmatpush.msrb.mxu0 %v2391_v22  ;;  %vm2460_vm4 = vcmask 130048  }
 0x5fb   :  { %v2172_v49 = vsel %vm2169_vm5, %v2171_v40, %v2167_v47 }
 0x5fc   :  { %v2190_v8 = vmul.f32 %v2189_v46, %v2172_v49  ;;  %2399 = vmatpush.msrb.mxu0 %v2390_v54 }
 0x5fe   :  { %v2191_v57 = vadd.f32 %v2190_v8, %v2148_v36  ;;  %2400 = vmatpush.msrb.mxu0 %v2389_v39 }
 0x600   :  { %3050 = vtanh.f32 %v2191_v57 }
 0x606   :  { %v3051_v44 = vpop.eup %3050 }
 0x607   :  { %v2194_v60 = vmul.f32 %v3051_v44, %v2193_v10 }
 0x609   :  { %v4417_v23 = vadd.f32 %v2195_v62, %v2194_v60 }
 0x60b   :  { %v2197_v30 = vpack.c.bf16 %v4417_v23, %v4417_v23 }
 0x60d   :  { %2206 = vmatmul.bf16.vlgmr.msrb.gmra.mxu2 %v2197_v30  ;;  %2219 = vmatmul.bf16.vlgmr.msra.gmra.mxu3 %v2197_v30 }
 0x60e   :  { %2232 = vmatmul.bf16.vlgmr.msra.gmra.mxu0 %v2197_v30 }
 0x61d   :  { %2307 = vmatmul.bf16.vlgmr.msra.gmra.mxu2 %v2285_v59  ;;  %2320 = vmatmul.bf16.vlgmr.msrb.gmra.mxu3 %v2285_v59 }
 0x677   :  { %v2295_v33 = vpop.f32.mrf.mxu1 }
 0x678   :  { %v2325_v50 = vadd.f32 %v2295_v33, %v4921_v38  ;;  %v2388_v38 = vld [vmem:[%s4494_s8 + $0x48] sm:$0xff] }
 0x679   :  { %2401 = vmatpush.msrb.mxu0 %v2388_v38 }
 0x67b   :  { %2402 = vmatpush.msrb.mxu0 %v2387_v21 }
 0x67d   :  { %2403 = vmatpush.msrb.mxu0 %v2386_v2 }
 0x67f   :  { %v2297_v51 = vpop.f32.mrf.mxu1  ;;  %2404 = vmatpush.msrb.mxu0 %v2385_v32  ;;  %v2438_v32 = vstv %s2376_s13 }
 0x681   :  { %2405 = vmatpush.msrb.mxu0 %v2384_v25 }
 0x683   :  { %2406 = vmatpush.msrb.mxu0 %v2383_v58 }
 0x685   :  { %2407 = vmatpush.msrb.mxu0 %v2382_v48 }
 0x687   :  { %2408 = vmatpush.msrb.mxu0 %v2381_v16 }
 0x689   :  { %2409 = vmatpush.msrb.mxu0 %v2380_v41 }
 0x68b   :  { %v4427_v9 = vpop.f32.mrf.mxu0  ;;  %2410 = vmatpush.msrb.mxu0 %v2379_v31 }
 0x68c   :  { %v2368_v3 = vadd.f32 %v4408_v61, %v4427_v9 }
 0x690   :  { %v2207_v43 = vpop.f32.mrf.mxu2  ;;  %v2220_v12 = vpop.f32.mrf.mxu3 }
 0x691   :  { %v2328_v53 = vadd.f32 %v2325_v50, %v2207_v43 }
 0x693   :  { %v2818_v13 = vmul.f32 -1.442695, %v2328_v53  ;;  %v2235_v63 = vpop.f32.mrf.mxu0 }
 0x695   :  { %3052 = vpow2.f32 %v2818_v13 }
 0x698   :  { %v2209_v5 = vpop.f32.mrf.mxu2  ;;  %v2222_v35 = vpop.f32.mrf.mxu3 }
 0x69b   :  { %v3053_v15 = vpop.eup %3052 }
 0x69c   :  { %v2336_v29 = vadd.f32 1.0, %v3053_v15  ;;  %v2450_v15 = vstv %s2820_s2 }
 0x69e   :  { %3054 = vrcp.f32 %v2336_v29  ;;  %v2349_v19 = vand.u32 2147483648, %v2336_v29  ;;  %vm2343_vm11 = vweird.f32 %v2336_v29  ;;  %v2347_v59 = vand.u32 2147483647, %v2336_v29 }
 0x6a0   :  { %v2308_v4 = vpop.f32.mrf.mxu2  ;;  %v2321_v34 = vpop.f32.mrf.mxu3  ;;  %v2350_v49 = vor.u32 1.1754944e-38, %v2349_v19  ;;  %vm2348_vm13 = vcmp.eq.f32.partialorder %v2347_v59, 8.507059e+37  ;;  %v2464_v19 = vstv %s2821_s14 }
 0x6a1   :  { %v2326_v7 = vadd.f32 %v2308_v4, %v4920_v56  ;;  %v2327_v20 = vadd.f32 %v2321_v34, %v4735_v28 }
 0x6a3   :  { %v2329_v1 = vadd.f32 %v2326_v7, %v2220_v12 }
 0x6a4   :  { %v3055_v27 = vpop.eup %3054 }
 0x6a5   :  { %v2339_v24 = vmul.f32 %v3055_v27, %v2336_v29  ;;  %v2819_v0 = vmul.f32 -1.442695, %v2329_v1  ;;  %vm2344_vm10 = vweird.f32 %v3055_v27 }
 0x6a6   :  { %vm2345_vm12 = vmor %vm2343_vm11, %vm2344_vm10 }
 0x6a7   :  { %3056 = vpow2.f32 %v2819_v0  ;;  %v2340_v56 = vsub.f32 1.0, %v2339_v24 }
 0x6a8   :  { %v2310_v52 = vpop.f32.mrf.mxu2  ;;  %v2323_v37 = vpop.f32.mrf.mxu3 }
 0x6a9   :  { %v2341_v42 = vmul.f32 %v3055_v27, %v2340_v56  ;;  %v2901_v56 = vld [vmem:[%s4496_s10] ss:$0 sm:$0xff] }
 0x6ab   :  { %v2342_v18 = vadd.f32 %v3055_v27, %v2341_v42 }
 0x6ad   :  { %v3057_v40 = vpop.eup %3056  ;;  %v2346_v47 = vsel %vm2345_vm12, %v3055_v27, %v2342_v18 }
 0x6ae   :  { %v2337_v46 = vadd.f32 1.0, %v3057_v40  ;;  %v2351_v26 = vsel %vm2348_vm13, %v2350_v49, %v2346_v47 }
 0x6af   :  { %v2369_v36 = vmul.f32 %v2368_v3, %v2351_v26 }
 0x6b0   :  { %3058 = vrcp.f32 %v2337_v46  ;;  %v2364_v6 = vand.u32 2147483648, %v2337_v46  ;;  %v2362_v44 = vand.u32 2147483647, %v2337_v46  ;;  %vm2358_vm15 = vweird.f32 %v2337_v46 }
 0x6b1   :  { %v2370_v14 = vadd.f32 %v2369_v36, %v2327_v20 }
 0x6b2   :  { %v2365_v62 = vor.u32 1.1754944e-38, %v2364_v6  ;;  %vm2363_vm1 = vcmp.eq.f32.partialorder %v2362_v44, 8.507059e+37 }
 0x6b3   :  { %3060 = vtanh.f32 %v2370_v14 }
 0x6b6   :  { %v3059_v8 = vpop.eup %3058 }
 0x6b7   :  { %v2354_v57 = vmul.f32 %v3059_v8, %v2337_v46  ;;  %vm2359_vm14 = vweird.f32 %v3059_v8 }
 0x6b8   :  { %vm2360_vm0 = vmor %vm2358_vm15, %vm2359_vm14 }
 0x6b9   :  { %v2355_v11 = vsub.f32 1.0, %v2354_v57  ;;  %v3061_v51 = vpop.eup %3060 }
 0x6bb   :  { %v2356_v10 = vmul.f32 %v3059_v8, %v2355_v11 }
 0x6bd   :  { %v2357_v60 = vadd.f32 %v3059_v8, %v2356_v10 }
 0x6bf   :  { %v2361_v30 = vsel %vm2360_vm0, %v3059_v8, %v2357_v60 }
 0x6c0   :  { %v2366_v33 = vsel %vm2363_vm1, %v2365_v62, %v2361_v30 }
 0x6c1   :  { %v2372_v61 = vsub.f32 1.0, %v2366_v33  ;;  %v2374_v28 = vmul.f32 %v2366_v33, %v4417_v23 }
 0x6c3   :  { %v2373_v17 = vmul.f32 %v3061_v51, %v2372_v61 }
 0x6c5   :  { %v2375_v55 = vadd.f32 %v2374_v28, %v2373_v17 }
 0x6c7   :  { %2411 = vmatmul.f32.vlgmr.msrb.gmra.mxu0 %v2375_v55  ;;  %v2415_v9 = vmul.f32 %v2375_v55, %v2375_v55 }
 0x6c9   :  { %2416 = vadd.xlane.f32.xlu0 %v2415_v9 }
 0x73c   :  { %v2417_v22 = vpop.xlane.xlu0 %2416 }
 0x73d   :  { %v2422_v43 = vadd.f32 %v2900_v45, %v2417_v22 }
 0x744   :  { %v2412_v50 = vpop.f32.mrf.mxu0 }
 0x745   :  { %v2423_v12 = vmul.f32 2.0, %v2412_v50 }
 0x747   :  { %v2424_v54 = vsub.f32 %v2422_v43, %v2423_v12 }
 0x749   :  { %v2425_v53 = vmax.f32 %v2424_v54, 0.0 }
 0x74b   :  { %3062 = vrsqrt.f32 %v2425_v53  ;;  %v2449_v35 = vsub.f32 0.0, %v2425_v53  ;;  %vm2433_vm2 = vcmp.eq.f32.partialorder %v2425_v53, inf  ;;  %v2436_v2 = vand.u32 2147483648, %v2425_v53 }
 0x74c   :  { %vm2435_vm3 = vcmp.eq.f32.partialorder %v2425_v53, 0.0 }
 0x74d   :  { %v2451_v4 = vmul.f32 %v2450_v15, %v2449_v35 }
 0x74f   :  { %v2452_v1 = vmul.f32 1.442695, %v2451_v4 }
 0x751   :  { %v3063_v39 = vpop.eup %3062 }
 0x752   :  { %v2427_v13 = vmul.f32 %v3063_v39, %v2425_v53 }
 0x754   :  { %v2428_v63 = vmul.f32 %v3063_v39, %v2427_v13 }
 0x756   :  { %v2429_v23 = vmul.f32 0.5, %v2428_v63 }
 0x758   :  { %v2430_v38 = vsub.f32 1.5, %v2429_v23 }
 0x75a   :  { %v2431_v21 = vmul.f32 %v3063_v39, %v2430_v38 }
 0x75c   :  { %v2432_v5 = vmul.f32 %v2431_v21, %v2425_v53 }
 0x75e   :  { %v2434_v29 = vsel %vm2433_vm2, %v2425_v53, %v2432_v5 }
 0x75f   :  { %v2437_v25 = vsel %vm2435_vm3, %v2436_v2, %v2434_v29 }
 0x760   :  { %v2439_v58 = vmul.f32 %v2438_v32, %v2437_v25 }
 0x762   :  { %v2445_v34 = vmul.f32 -2.236068, %v2439_v58  ;;  %v2440_v48 = vmul.f32 2.236068, %v2439_v58  ;;  %v2442_v7 = vmul.f32 %v2439_v58, %v2439_v58 }
 0x764   :  { %v2446_v16 = vmul.f32 1.442695, %v2445_v34  ;;  %v2441_v41 = vadd.f32 1.0, %v2440_v48  ;;  %v2443_v27 = vmul.f32 1.6666666, %v2442_v7 }
 0x766   :  { %3064 = vpow2.f32 %v2446_v16  ;;  %v2444_v31 = vadd.f32 %v2443_v27, %v2441_v41 }
 0x767   :  { %3066 = vpow2.f32 %v2452_v1 }
 0x76c   :  { %v3065_v24 = vpop.eup %3064 }
 0x76d   :  { %v2448_v0 = vmul.f32 %v3065_v24, %v2444_v31  ;;  %v3067_v52 = vpop.eup %3066 }
 0x76f   :  { %v2454_v37 = vadd.f32 %v3067_v52, %v2448_v0 }
 0x771   :  { %v2459_v42 = vmul.f32 %v2901_v56, %v2454_v37 }
 0x773   :  { %v2461_v18 = vsel %vm2460_vm4, %v2459_v42, 0.0 }
 0x774   :  { %2462 = vadd.xlane.f32.xlu0 %v2461_v18 }
 0x7e7   :  { %v2463_v59 = vpop.xlane.xlu0 %2462 }
 0x7e8   :  { %v2465_v40 = vadd.f32 %v2464_v19, %v2463_v59 }
 0x7ea   :  { %2466 = vst [vmem:[%s4498_s12] sm:$0xff] %v2465_v40 }
 0x7eb   :  { %2471 = vsyncpa [#allocation3], 1 }
 0x7ec   :  { %2472 = vsyncpa [#allocation4], 1 }

</bundles_post_ra>
